<compile_context>
chip_gen: v5e
topology: v5e:2x2
jax: 0.10.0
libtpu: 0.0.40
codegen_flags: <defaults>
</compile_context>

<pallas_src>
import functools

import jax
import jax.numpy as jnp
import numpy as np
from jax import lax
from jax.experimental import pallas as pl
from jax.experimental.pallas import tpu as pltpu


def _round_up(x, m):
    return (x + m - 1) // m * m


def _choose_tc(T, max_tc=16):
    """Largest divisor of T that is <= max_tc (time-steps per grid iteration)."""
    for tc in range(min(T, max_tc), 0, -1):
        if T % tc == 0:
            return tc
    return 1


# ----------------------------------------------------------------------------
# Shared recurrence over one time chunk (Tc steps, statically unrolled).
# gi: (Tc, Bp, 3*Hp) precomputed input projection (+ folded biases).
# ----------------------------------------------------------------------------
def _gru_recurrence_chunk(gi, w_hh, b_hn, h_ref, out_ref, tc, hp):
    for t in range(tc):  # static unroll; all slice indices are compile-time
        h = h_ref[...]                                        # (Bp, Hp) f32
        gh = jnp.dot(h.astype(w_hh.dtype), w_hh,
                     preferred_element_type=jnp.float32)      # (Bp, 3Hp)
        gi_t = gi[t]                                          # (Bp, 3Hp)
        r = jax.nn.sigmoid(gi_t[:, 0 * hp:1 * hp] + gh[:, 0 * hp:1 * hp])
        z = jax.nn.sigmoid(gi_t[:, 1 * hp:2 * hp] + gh[:, 1 * hp:2 * hp])
        n = jnp.tanh(gi_t[:, 2 * hp:3 * hp] + r * (gh[:, 2 * hp:3 * hp] + b_hn))
        h_new = (1.0 - z) * n + z * h
        h_ref[...] = h_new
        if out_ref is not None:
            out_ref[t] = h_new.astype(out_ref.dtype)


# ----------------------------------------------------------------------------
# GRU layer kernel that emits the full hidden sequence (used for layers 0..L-2).
# ----------------------------------------------------------------------------
def _gru_seq_kernel(x_ref, w_ih_ref, b_i_ref, w_hh_ref, b_hn_ref,
                    out_ref, h_ref, *, tc, hp):
    @pl.when(pl.program_id(0) == 0)
    def _():
        h_ref[...] = jnp.zeros_like(h_ref)

    bp = h_ref.shape[0]
    d_in = x_ref.shape[-1]
    w_ih = w_ih_ref[...]
    # Hoisted input projection: one matmul for all Tc steps in the chunk.
    x_flat = x_ref[...].reshape(tc * bp, d_in).astype(w_ih.dtype)
    gi = (jnp.dot(x_flat, w_ih, preferred_element_type=jnp.float32)
          + b_i_ref[...]).reshape(tc, bp, 3 * hp)

    _gru_recurrence_chunk(gi, w_hh_ref[...], b_hn_ref[...], h_ref, out_ref, tc, hp)


def gru_layer_seq(x_tbd, w_ih, b_i, w_hh, b_hn, *, tc):
    """x_tbd: (T, Bp, Din) -> (T, Bp, Hp)."""
    T, Bp, Din = x_tbd.shape
    Hp = w_hh.shape[0]
    kernel = functools.partial(_gru_seq_kernel, tc=tc, hp=Hp)
    return pl.pallas_call(
        kernel,
        out_shape=jax.ShapeDtypeStruct((T, Bp, Hp), jnp.float32),
        grid_spec=pltpu.PrefetchScalarGridSpec(
            num_scalar_prefetch=0,
            grid=(T // tc,),
            in_specs=[
                pl.BlockSpec((tc, Bp, Din), lambda i: (i, 0, 0)),
                pl.BlockSpec((Din, 3 * Hp), lambda i: (0, 0)),
                pl.BlockSpec((1, 3 * Hp), lambda i: (0, 0)),
                pl.BlockSpec((Hp, 3 * Hp), lambda i: (0, 0)),
                pl.BlockSpec((1, Hp), lambda i: (0, 0)),
            ],
            out_specs=pl.BlockSpec((tc, Bp, Hp), lambda i: (i, 0, 0)),
            scratch_shapes=[pltpu.VMEM((Bp, Hp), jnp.float32)],
        ),
        compiler_params=pltpu.CompilerParams(
            dimension_semantics=("arbitrary",)),  # sequential recurrence over time
    )(x_tbd, w_ih, b_i, w_hh, b_hn)


# ----------------------------------------------------------------------------
# Last GRU layer fused with the FC head: only (Bp, Op) goes back to HBM.
# ----------------------------------------------------------------------------
def _gru_last_fc_kernel(x_ref, w_ih_ref, b_i_ref, w_hh_ref, b_hn_ref,
                        fc_w_ref, fc_b_ref, out_ref, h_ref, *, tc, hp):
    @pl.when(pl.program_id(0) == 0)
    def _():
        h_ref[...] = jnp.zeros_like(h_ref)

    bp = h_ref.shape[0]
    d_in = x_ref.shape[-1]
    w_ih = w_ih_ref[...]
    x_flat = x_ref[...].reshape(tc * bp, d_in).astype(w_ih.dtype)
    gi = (jnp.dot(x_flat, w_ih, preferred_element_type=jnp.float32)
          + b_i_ref[...]).reshape(tc, bp, 3 * hp)

    _gru_recurrence_chunk(gi, w_hh_ref[...], b_hn_ref[...], h_ref, None, tc, hp)

    @pl.when(pl.program_id(0) == pl.num_programs(0) - 1)
    def _():
        h = h_ref[...]
        fc_w = fc_w_ref[...]
        out_ref[...] = (jnp.dot(h.astype(fc_w.dtype), fc_w,
                                preferred_element_type=jnp.float32)
                        + fc_b_ref[...]).astype(out_ref.dtype)


def gru_last_layer_fc(x_tbd, w_ih, b_i, w_hh, b_hn, fc_w, fc_b, *, tc):
    """x_tbd: (T, Bp, Din) -> (Bp, Op) = Linear(h_T)."""
    T, Bp, Din = x_tbd.shape
    Hp = w_hh.shape[0]
    Op = fc_w.shape[-1]
    kernel = functools.partial(_gru_last_fc_kernel, tc=tc, hp=Hp)
    return pl.pallas_call(
        kernel,
        out_shape=jax.ShapeDtypeStruct((Bp, Op), jnp.float32),
        grid_spec=pltpu.PrefetchScalarGridSpec(
            num_scalar_prefetch=0,
            grid=(T // tc,),
            in_specs=[
                pl.BlockSpec((tc, Bp, Din), lambda i: (i, 0, 0)),
                pl.BlockSpec((Din, 3 * Hp), lambda i: (0, 0)),
                pl.BlockSpec((1, 3 * Hp), lambda i: (0, 0)),
                pl.BlockSpec((Hp, 3 * Hp), lambda i: (0, 0)),
                pl.BlockSpec((1, Hp), lambda i: (0, 0)),
                pl.BlockSpec((Hp, Op), lambda i: (0, 0)),
                pl.BlockSpec((1, Op), lambda i: (0, 0)),
            ],
            # Constant index_map -> output block resident across the grid;
            # written once at the last time chunk.
            out_specs=pl.BlockSpec((Bp, Op), lambda i: (0, 0)),
            scratch_shapes=[pltpu.VMEM((Bp, Hp), jnp.float32)],
        ),
        compiler_params=pltpu.CompilerParams(
            dimension_semantics=("arbitrary",)),
    )(x_tbd, w_ih, b_i, w_hh, b_hn, fc_w, fc_b)


# ----------------------------------------------------------------------------
# Full model forward: multi-layer GRU -> last hidden -> Linear (fused).
# ----------------------------------------------------------------------------
@functools.partial(jax.jit, static_argnames=("out_dim",))
def gru_model_forward(x, layers, fc_w, fc_b, *, out_dim):
    """x: (B, T, D) batch_first, like the PyTorch module. Returns (B, out_dim)."""
    B, T, D = x.shape
    Bp = _round_up(B, 8)
    tc = _choose_tc(T)

    h = jnp.transpose(x, (1, 0, 2)).astype(jnp.float32)   # time-major (T, B, D)
    if Bp != B:
        h = jnp.pad(h, ((0, 0), (0, Bp - B), (0, 0)))

    n_layers = len(layers)
    out = None
    for li, (w_ih, b_i, w_hh, b_hn) in enumerate(layers):
        if li < n_layers - 1:
            h = gru_layer_seq(h, w_ih, b_i, w_hh, b_hn, tc=tc)
        else:
            out = gru_last_layer_fc(h, w_ih, b_i, w_hh, b_hn, fc_w, fc_b, tc=tc)
    return out[:B, :out_dim]


# ----------------------------------------------------------------------------
# Parameter packing: PyTorch nn.GRU layout -> fused/padded kernel layout.
# PyTorch: weight_ih_l{k} (3H, Din), weight_hh_l{k} (3H, H), biases (3H,),
# gate order [r, z, n]; fc.weight (O, H), fc.bias (O,).
# ----------------------------------------------------------------------------
def _pack_layer(w_ih, w_hh, b_ih, b_hh, Hp, d_in_pad, dtype):
    three_h, d_in = w_ih.shape
    H = three_h // 3
    w_ih_f = jnp.zeros((d_in_pad, 3 * Hp), dtype)
    w_hh_f = jnp.zeros((Hp, 3 * Hp), dtype)
    b_i = jnp.zeros((1, 3 * Hp), dtype)
    b_hn = jnp.zeros((1, Hp), dtype)
    for g in range(3):  # [r, z, n]
        wi_g = w_ih[g * H:(g + 1) * H, :].T      # (d_in, H)
        wh_g = w_hh[g * H:(g + 1) * H, :].T      # (H, H)
        w_ih_f = w_ih_f.at[:d_in, g * Hp:g * Hp + H].set(wi_g.astype(dtype))
        w_hh_f = w_hh_f.at[:H, g * Hp:g * Hp + H].set(wh_g.astype(dtype))
        if g < 2:   # r, z: fold both biases into the input projection
            bi_g = b_ih[g * H:(g + 1) * H] + b_hh[g * H:(g + 1) * H]
        else:       # n: only b_in folds; b_hn stays inside r*(...)
            bi_g = b_ih[g * H:(g + 1) * H]
        b_i = b_i.at[0, g * Hp:g * Hp + H].set(bi_g.astype(dtype))
    b_hn = b_hn.at[0, :H].set(b_hh[2 * H:3 * H].astype(dtype))
    return (w_ih_f, b_i, w_hh_f, b_hn)


def pack_params(pt_layers, fc_w, fc_b, dtype=jnp.float32):
    """dtype=jnp.bfloat16 is supported (f32 accumulation kept in the kernels)."""
    H = pt_layers[0][1].shape[1]
    Hp = _round_up(H, 128)
    O = fc_w.shape[0]
    Op = _round_up(O, 128)
    packed = []
    for li, (w_ih, w_hh, b_ih, b_hh) in enumerate(pt_layers):
        d_in = w_ih.shape[1]
        d_in_pad = d_in if li == 0 else Hp   # deeper layers consume padded hidden
        packed.append(_pack_layer(w_ih, w_hh, b_ih, b_hh, Hp, d_in_pad, dtype))
    fc_wp = jnp.zeros((Hp, Op), dtype).at[:H, :O].set(fc_w.T.astype(dtype))
    fc_bp = jnp.zeros((1, Op), dtype).at[0, :O].set(fc_b.astype(dtype))
    return tuple(packed), fc_wp, fc_bp


# ----------------------------------------------------------------------------
# Deterministic PyTorch-style init (uniform(-1/sqrt(H), 1/sqrt(H))).
# ----------------------------------------------------------------------------
def init_torch_style_params(key, input_dim, hidden_dim, layer_dim, output_dim):
    k = 1.0 / np.sqrt(hidden_dim)
    layers = []
    for layer in range(layer_dim):
        d_in = input_dim if layer == 0 else hidden_dim
        key, k1, k2, k3, k4 = jax.random.split(key, 5)
        w_ih = jax.random.uniform(k1, (3 * hidden_dim, d_in), jnp.float32, -k, k)
        w_hh = jax.random.uniform(k2, (3 * hidden_dim, hidden_dim), jnp.float32, -k, k)
        b_ih = jax.random.uniform(k3, (3 * hidden_dim,), jnp.float32, -k, k)
        b_hh = jax.random.uniform(k4, (3 * hidden_dim,), jnp.float32, -k, k)
        layers.append((w_ih, w_hh, b_ih, b_hh))
    key, k5, k6 = jax.random.split(key, 3)
    fc_w = jax.random.uniform(k5, (output_dim, hidden_dim), jnp.float32, -k, k)
    fc_b = jax.random.uniform(k6, (output_dim,), jnp.float32, -k, k)
    return layers, fc_w, fc_b


# ----------------------------------------------------------------------------
# Pure-JAX reference (lax.scan over PyTorch-layout weights) for correctness.
# ----------------------------------------------------------------------------
def gru_model_ref(x, pt_layers, fc_w, fc_b):
    B = x.shape[0]
    h_seq = jnp.transpose(x, (1, 0, 2))
    for (w_ih, w_hh, b_ih, b_hh) in pt_layers:
        H = w_hh.shape[1]

        def step(h, x_t, w_ih=w_ih, w_hh=w_hh, b_ih=b_ih, b_hh=b_hh, H=H):
            gi = x_t @ w_ih.T + b_ih           # (B, 3H)
            gh = h @ w_hh.T + b_hh             # (B, 3H)
            r = jax.nn.sigmoid(gi[:, :H] + gh[:, :H])
            z = jax.nn.sigmoid(gi[:, H:2 * H] + gh[:, H:2 * H])
            n = jnp.tanh(gi[:, 2 * H:] + r * gh[:, 2 * H:])
            h_new = (1.0 - z) * n + z * h
            return h_new, h_new

        h0 = jnp.zeros((B, H), jnp.float32)
        _, h_seq = lax.scan(step, h0, h_seq)
    return h_seq[-1] @ fc_w.T + fc_b


if __name__ == "__main__":
    # Shapes consistent with the module: batch=2, seq=8, input_dim=4,
    # hidden_dim=32, layer_dim=2, output_dim=1.
    B, T, D, H, L, O = 2, 8, 4, 32, 2, 1

    key = jax.random.PRNGKey(0)
    key, xkey = jax.random.split(key)
    x = jax.random.normal(xkey, (B, T, D), dtype=jnp.float32)

    pt_layers, fc_w, fc_b = init_torch_style_params(key, D, H, L, O)
    packed_layers, fc_wp, fc_bp = pack_params(pt_layers, fc_w, fc_b,
                                              dtype=jnp.float32)

    out = gru_model_forward(x, packed_layers, fc_wp, fc_bp, out_dim=O)
    out = jax.block_until_ready(out)

    ref = gru_model_ref(x, pt_layers, fc_w, fc_b)
    assert out.shape == (B, O), out.shape
    np.testing.assert_allclose(np.asarray(out), np.asarray(ref),
                               rtol=1e-4, atol=1e-5)

    print("KERNEL_OK")
</pallas_src>

<mosaic_0001>
module attributes {stable_mosaic.version = 11 : i64} {
  func.func @_gru_seq_kernel(%arg0: i32, %arg1: memref<8x8x4xf32, #tpu.memory_space<vmem>>, %arg2: memref<4x384xf32, #tpu.memory_space<vmem>>, %arg3: memref<1x384xf32, #tpu.memory_space<vmem>>, %arg4: memref<128x384xf32, #tpu.memory_space<vmem>>, %arg5: memref<1x128xf32, #tpu.memory_space<vmem>>, %arg6: memref<8x8x128xf32, #tpu.memory_space<vmem>>, %arg7: memref<8x128xf32, #tpu.memory_space<vmem>>) attributes {dimension_semantics = [#tpu.dimension_semantics<arbitrary>], iteration_bounds = array<i64: 1>, scalar_prefetch = 0 : i64, scratch_operands = 1 : i64, tpu.core_type = #tpu.core_type<tc>, window_params = [{transform_indices = @transform_0, window_bounds = array<i64: 8, 8, 4>}, {pipeline_mode = #tpu.pipeline_mode<synchronous>, transform_indices = @transform_1, window_bounds = array<i64: 4, 384>}, {pipeline_mode = #tpu.pipeline_mode<synchronous>, transform_indices = @transform_2, window_bounds = array<i64: 1, 384>}, {pipeline_mode = #tpu.pipeline_mode<synchronous>, transform_indices = @transform_3, window_bounds = array<i64: 128, 384>}, {pipeline_mode = #tpu.pipeline_mode<synchronous>, transform_indices = @transform_4, window_bounds = array<i64: 1, 128>}, {transform_indices = @transform_5, window_bounds = array<i64: 8, 8, 128>}]} {
    %c0_i32 = arith.constant 0 : i32
    %0 = arith.cmpi eq, %arg0, %c0_i32 : i32
    %1 = arith.extui %0 : i1 to i32
    %c0_i32_0 = arith.constant 0 : i32
    %2 = arith.cmpi ne, %1, %c0_i32_0 : i32
    scf.if %2 {
      %cst_92 = arith.constant 0.000000e+00 : f32
      %301 = vector.broadcast %cst_92 : f32 to vector<8x128xf32>
      %c0_93 = arith.constant 0 : index
      %c0_94 = arith.constant 0 : index
      %302 = vector.load %arg7[%c0_93, %c0_94] : memref<8x128xf32, #tpu.memory_space<vmem>>, vector<8x128xf32>
      tpu.vector_store %arg7[%c0_93, %c0_94], %301 {strides = array<i32>} : memref<8x128xf32, #tpu.memory_space<vmem>>, vector<8x128xf32>,
    } else {
    }
    %c0 = arith.constant 0 : index
    %c0_1 = arith.constant 0 : index
    %3 = vector.load %arg2[%c0, %c0_1] : memref<4x384xf32, #tpu.memory_space<vmem>>, vector<4x384xf32>
    %c0_2 = arith.constant 0 : index
    %c0_3 = arith.constant 0 : index
    %c0_4 = arith.constant 0 : index
    %4 = vector.load %arg1[%c0_2, %c0_3, %c0_4] : memref<8x8x4xf32, #tpu.memory_space<vmem>>, vector<8x8x4xf32>
    %5 = vector.shape_cast %4 : vector<8x8x4xf32> to vector<64x4xf32>
    %cst = arith.constant dense<0.000000e+00> : vector<64x384xf32>
    %6 = tpu.matmul %5, %3, %cst {dimension_numbers = #tpu.dot_dimension_numbers<[1], [0], [0], [1], [0, 0, 1, 1], [], []>} : vector<64x4xf32>, vector<4x384xf32>, vector<64x384xf32> -> vector<64x384xf32>
    %c0_5 = arith.constant 0 : index
    %c0_6 = arith.constant 0 : index
    %7 = vector.load %arg3[%c0_5, %c0_6] : memref<1x384xf32, #tpu.memory_space<vmem>>, vector<1x384xf32>
    %8 = vector.broadcast %7 : vector<1x384xf32> to vector<64x384xf32>
    %9 = arith.addf %6, %8 : vector<64x384xf32>
    %10 = vector.shape_cast %9 : vector<64x384xf32> to vector<8x8x384xf32>
    %c0_7 = arith.constant 0 : index
    %c0_8 = arith.constant 0 : index
    %11 = vector.load %arg4[%c0_7, %c0_8] : memref<128x384xf32, #tpu.memory_space<vmem>>, vector<128x384xf32>
    %c0_9 = arith.constant 0 : index
    %c0_10 = arith.constant 0 : index
    %12 = vector.load %arg5[%c0_9, %c0_10] : memref<1x128xf32, #tpu.memory_space<vmem>>, vector<1x128xf32>
    %c0_11 = arith.constant 0 : index
    %c0_12 = arith.constant 0 : index
    %13 = vector.load %arg7[%c0_11, %c0_12] : memref<8x128xf32, #tpu.memory_space<vmem>>, vector<8x128xf32>
    %cst_13 = arith.constant dense<0.000000e+00> : vector<8x384xf32>
    %14 = tpu.matmul %13, %11, %cst_13 {dimension_numbers = #tpu.dot_dimension_numbers<[1], [0], [0], [1], [0, 0, 1, 1], [], []>} : vector<8x128xf32>, vector<128x384xf32>, vector<8x384xf32> -> vector<8x384xf32>
    %15 = vector.extract_strided_slice %10 {offsets = [0, 0, 0], sizes = [1, 8, 384], strides = [1, 1, 1]} : vector<8x8x384xf32> to vector<1x8x384xf32>
    %16 = vector.shape_cast %15 : vector<1x8x384xf32> to vector<8x384xf32>
    %17 = vector.extract_strided_slice %16 {offsets = [0, 0], sizes = [8, 128], strides = [1, 1]} : vector<8x384xf32> to vector<8x128xf32>
    %18 = vector.extract_strided_slice %14 {offsets = [0, 0], sizes = [8, 128], strides = [1, 1]} : vector<8x384xf32> to vector<8x128xf32>
    %19 = arith.addf %17, %18 : vector<8x128xf32>
    %20 = arith.negf %19 : vector<8x128xf32>
    %21 = math.exp %20 : vector<8x128xf32>
    %cst_14 = arith.constant 1.000000e+00 : f32
    %22 = vector.broadcast %cst_14 : f32 to vector<8x128xf32>
    %23 = arith.addf %22, %21 : vector<8x128xf32>
    %24 = arith.divf %22, %23 : vector<8x128xf32>
    %25 = vector.extract_strided_slice %16 {offsets = [0, 128], sizes = [8, 128], strides = [1, 1]} : vector<8x384xf32> to vector<8x128xf32>
    %26 = vector.extract_strided_slice %14 {offsets = [0, 128], sizes = [8, 128], strides = [1, 1]} : vector<8x384xf32> to vector<8x128xf32>
    %27 = arith.addf %25, %26 : vector<8x128xf32>
    %28 = arith.negf %27 : vector<8x128xf32>
    %29 = math.exp %28 : vector<8x128xf32>
    %cst_15 = arith.constant 1.000000e+00 : f32
    %30 = vector.broadcast %cst_15 : f32 to vector<8x128xf32>
    %31 = arith.addf %30, %29 : vector<8x128xf32>
    %32 = arith.divf %30, %31 : vector<8x128xf32>
    %33 = vector.extract_strided_slice %16 {offsets = [0, 256], sizes = [8, 128], strides = [1, 1]} : vector<8x384xf32> to vector<8x128xf32>
    %34 = vector.extract_strided_slice %14 {offsets = [0, 256], sizes = [8, 128], strides = [1, 1]} : vector<8x384xf32> to vector<8x128xf32>
    %35 = vector.broadcast %12 : vector<1x128xf32> to vector<8x128xf32>
    %36 = arith.addf %34, %35 : vector<8x128xf32>
    %37 = arith.mulf %24, %36 : vector<8x128xf32>
    %38 = arith.addf %33, %37 : vector<8x128xf32>
    %39 = math.tanh %38 : vector<8x128xf32>
    %cst_16 = arith.constant 1.000000e+00 : f32
    %40 = vector.broadcast %cst_16 : f32 to vector<8x128xf32>
    %41 = arith.subf %40, %32 : vector<8x128xf32>
    %42 = arith.mulf %41, %39 : vector<8x128xf32>
    %43 = arith.mulf %32, %13 : vector<8x128xf32>
    %44 = arith.addf %42, %43 : vector<8x128xf32>
    %c0_17 = arith.constant 0 : index
    %c0_18 = arith.constant 0 : index
    %45 = vector.load %arg7[%c0_17, %c0_18] : memref<8x128xf32, #tpu.memory_space<vmem>>, vector<8x128xf32>
    tpu.vector_store %arg7[%c0_17, %c0_18], %44 {strides = array<i32>} : memref<8x128xf32, #tpu.memory_space<vmem>>, vector<8x128xf32>,
    %c0_19 = arith.constant 0 : index
    %c0_20 = arith.constant 0 : index
    %c0_21 = arith.constant 0 : index
    %46 = vector.load %arg6[%c0_19, %c0_20, %c0_21] : memref<8x8x128xf32, #tpu.memory_space<vmem>>, vector<1x8x128xf32>
    %47 = vector.shape_cast %46 : vector<1x8x128xf32> to vector<8x128xf32>
    %48 = vector.shape_cast %44 : vector<8x128xf32> to vector<1x8x128xf32>
    tpu.vector_store %arg6[%c0_19, %c0_20, %c0_21], %48 {strides = array<i32>} : memref<8x8x128xf32, #tpu.memory_space<vmem>>, vector<1x8x128xf32>,
    %c0_22 = arith.constant 0 : index
    %c0_23 = arith.constant 0 : index
    %49 = vector.load %arg7[%c0_22, %c0_23] : memref<8x128xf32, #tpu.memory_space<vmem>>, vector<8x128xf32>
    %cst_24 = arith.constant dense<0.000000e+00> : vector<8x384xf32>
    %50 = tpu.matmul %49, %11, %cst_24 {dimension_numbers = #tpu.dot_dimension_numbers<[1], [0], [0], [1], [0, 0, 1, 1], [], []>} : vector<8x128xf32>, vector<128x384xf32>, vector<8x384xf32> -> vector<8x384xf32>
    %51 = vector.extract_strided_slice %10 {offsets = [1, 0, 0], sizes = [1, 8, 384], strides = [1, 1, 1]} : vector<8x8x384xf32> to vector<1x8x384xf32>
    %52 = vector.shape_cast %51 : vector<1x8x384xf32> to vector<8x384xf32>
    %53 = vector.extract_strided_slice %52 {offsets = [0, 0], sizes = [8, 128], strides = [1, 1]} : vector<8x384xf32> to vector<8x128xf32>
    %54 = vector.extract_strided_slice %50 {offsets = [0, 0], sizes = [8, 128], strides = [1, 1]} : vector<8x384xf32> to vector<8x128xf32>
    %55 = arith.addf %53, %54 : vector<8x128xf32>
    %56 = arith.negf %55 : vector<8x128xf32>
    %57 = math.exp %56 : vector<8x128xf32>
    %cst_25 = arith.constant 1.000000e+00 : f32
    %58 = vector.broadcast %cst_25 : f32 to vector<8x128xf32>
    %59 = arith.addf %58, %57 : vector<8x128xf32>
    %60 = arith.divf %58, %59 : vector<8x128xf32>
    %61 = vector.extract_strided_slice %52 {offsets = [0, 128], sizes = [8, 128], strides = [1, 1]} : vector<8x384xf32> to vector<8x128xf32>
    %62 = vector.extract_strided_slice %50 {offsets = [0, 128], sizes = [8, 128], strides = [1, 1]} : vector<8x384xf32> to vector<8x128xf32>
    %63 = arith.addf %61, %62 : vector<8x128xf32>
    %64 = arith.negf %63 : vector<8x128xf32>
    %65 = math.exp %64 : vector<8x128xf32>
    %cst_26 = arith.constant 1.000000e+00 : f32
    %66 = vector.broadcast %cst_26 : f32 to vector<8x128xf32>
    %67 = arith.addf %66, %65 : vector<8x128xf32>
    %68 = arith.divf %66, %67 : vector<8x128xf32>
    %69 = vector.extract_strided_slice %52 {offsets = [0, 256], sizes = [8, 128], strides = [1, 1]} : vector<8x384xf32> to vector<8x128xf32>
    %70 = vector.extract_strided_slice %50 {offsets = [0, 256], sizes = [8, 128], strides = [1, 1]} : vector<8x384xf32> to vector<8x128xf32>
    %71 = vector.broadcast %12 : vector<1x128xf32> to vector<8x128xf32>
    %72 = arith.addf %70, %71 : vector<8x128xf32>
    %73 = arith.mulf %60, %72 : vector<8x128xf32>
    %74 = arith.addf %69, %73 : vector<8x128xf32>
    %75 = math.tanh %74 : vector<8x128xf32>
    %cst_27 = arith.constant 1.000000e+00 : f32
    %76 = vector.broadcast %cst_27 : f32 to vector<8x128xf32>
    %77 = arith.subf %76, %68 : vector<8x128xf32>
    %78 = arith.mulf %77, %75 : vector<8x128xf32>
    %79 = arith.mulf %68, %49 : vector<8x128xf32>
    %80 = arith.addf %78, %79 : vector<8x128xf32>
    %c0_28 = arith.constant 0 : index
    %c0_29 = arith.constant 0 : index
    %81 = vector.load %arg7[%c0_28, %c0_29] : memref<8x128xf32, #tpu.memory_space<vmem>>, vector<8x128xf32>
    tpu.vector_store %arg7[%c0_28, %c0_29], %80 {strides = array<i32>} : memref<8x128xf32, #tpu.memory_space<vmem>>, vector<8x128xf32>,
    %c1 = arith.constant 1 : index
    %c0_30 = arith.constant 0 : index
    %c0_31 = arith.constant 0 : index
    %82 = vector.load %arg6[%c1, %c0_30, %c0_31] : memref<8x8x128xf32, #tpu.memory_space<vmem>>, vector<1x8x128xf32>
    %83 = vector.shape_cast %82 : vector<1x8x128xf32> to vector<8x128xf32>
    %84 = vector.shape_cast %80 : vector<8x128xf32> to vector<1x8x128xf32>
    tpu.vector_store %arg6[%c1, %c0_30, %c0_31], %84 {strides = array<i32>} : memref<8x8x128xf32, #tpu.memory_space<vmem>>, vector<1x8x128xf32>,
    %c0_32 = arith.constant 0 : index
    %c0_33 = arith.constant 0 : index
    %85 = vector.load %arg7[%c0_32, %c0_33] : memref<8x128xf32, #tpu.memory_space<vmem>>, vector<8x128xf32>
    %cst_34 = arith.constant dense<0.000000e+00> : vector<8x384xf32>
    %86 = tpu.matmul %85, %11, %cst_34 {dimension_numbers = #tpu.dot_dimension_numbers<[1], [0], [0], [1], [0, 0, 1, 1], [], []>} : vector<8x128xf32>, vector<128x384xf32>, vector<8x384xf32> -> vector<8x384xf32>
    %87 = vector.extract_strided_slice %10 {offsets = [2, 0, 0], sizes = [1, 8, 384], strides = [1, 1, 1]} : vector<8x8x384xf32> to vector<1x8x384xf32>
    %88 = vector.shape_cast %87 : vector<1x8x384xf32> to vector<8x384xf32>
    %89 = vector.extract_strided_slice %88 {offsets = [0, 0], sizes = [8, 128], strides = [1, 1]} : vector<8x384xf32> to vector<8x128xf32>
    %90 = vector.extract_strided_slice %86 {offsets = [0, 0], sizes = [8, 128], strides = [1, 1]} : vector<8x384xf32> to vector<8x128xf32>
    %91 = arith.addf %89, %90 : vector<8x128xf32>
    %92 = arith.negf %91 : vector<8x128xf32>
    %93 = math.exp %92 : vector<8x128xf32>
    %cst_35 = arith.constant 1.000000e+00 : f32
    %94 = vector.broadcast %cst_35 : f32 to vector<8x128xf32>
    %95 = arith.addf %94, %93 : vector<8x128xf32>
    %96 = arith.divf %94, %95 : vector<8x128xf32>
    %97 = vector.extract_strided_slice %88 {offsets = [0, 128], sizes = [8, 128], strides = [1, 1]} : vector<8x384xf32> to vector<8x128xf32>
    %98 = vector.extract_strided_slice %86 {offsets = [0, 128], sizes = [8, 128], strides = [1, 1]} : vector<8x384xf32> to vector<8x128xf32>
    %99 = arith.addf %97, %98 : vector<8x128xf32>
    %100 = arith.negf %99 : vector<8x128xf32>
    %101 = math.exp %100 : vector<8x128xf32>
    %cst_36 = arith.constant 1.000000e+00 : f32
    %102 = vector.broadcast %cst_36 : f32 to vector<8x128xf32>
    %103 = arith.addf %102, %101 : vector<8x128xf32>
    %104 = arith.divf %102, %103 : vector<8x128xf32>
    %105 = vector.extract_strided_slice %88 {offsets = [0, 256], sizes = [8, 128], strides = [1, 1]} : vector<8x384xf32> to vector<8x128xf32>
    %106 = vector.extract_strided_slice %86 {offsets = [0, 256], sizes = [8, 128], strides = [1, 1]} : vector<8x384xf32> to vector<8x128xf32>
    %107 = vector.broadcast %12 : vector<1x128xf32> to vector<8x128xf32>
    %108 = arith.addf %106, %107 : vector<8x128xf32>
    %109 = arith.mulf %96, %108 : vector<8x128xf32>
    %110 = arith.addf %105, %109 : vector<8x128xf32>
    %111 = math.tanh %110 : vector<8x128xf32>
    %cst_37 = arith.constant 1.000000e+00 : f32
    %112 = vector.broadcast %cst_37 : f32 to vector<8x128xf32>
    %113 = arith.subf %112, %104 : vector<8x128xf32>
    %114 = arith.mulf %113, %111 : vector<8x128xf32>
    %115 = arith.mulf %104, %85 : vector<8x128xf32>
    %116 = arith.addf %114, %115 : vector<8x128xf32>
    %c0_38 = arith.constant 0 : index
    %c0_39 = arith.constant 0 : index
    %117 = vector.load %arg7[%c0_38, %c0_39] : memref<8x128xf32, #tpu.memory_space<vmem>>, vector<8x128xf32>
    tpu.vector_store %arg7[%c0_38, %c0_39], %116 {strides = array<i32>} : memref<8x128xf32, #tpu.memory_space<vmem>>, vector<8x128xf32>,
    %c2 = arith.constant 2 : index
    %c0_40 = arith.constant 0 : index
    %c0_41 = arith.constant 0 : index
    %118 = vector.load %arg6[%c2, %c0_40, %c0_41] : memref<8x8x128xf32, #tpu.memory_space<vmem>>, vector<1x8x128xf32>
    %119 = vector.shape_cast %118 : vector<1x8x128xf32> to vector<8x128xf32>
    %120 = vector.shape_cast %116 : vector<8x128xf32> to vector<1x8x128xf32>
    tpu.vector_store %arg6[%c2, %c0_40, %c0_41], %120 {strides = array<i32>} : memref<8x8x128xf32, #tpu.memory_space<vmem>>, vector<1x8x128xf32>,
    %c0_42 = arith.constant 0 : index
    %c0_43 = arith.constant 0 : index
    %121 = vector.load %arg7[%c0_42, %c0_43] : memref<8x128xf32, #tpu.memory_space<vmem>>, vector<8x128xf32>
    %cst_44 = arith.constant dense<0.000000e+00> : vector<8x384xf32>
    %122 = tpu.matmul %121, %11, %cst_44 {dimension_numbers = #tpu.dot_dimension_numbers<[1], [0], [0], [1], [0, 0, 1, 1], [], []>} : vector<8x128xf32>, vector<128x384xf32>, vector<8x384xf32> -> vector<8x384xf32>
    %123 = vector.extract_strided_slice %10 {offsets = [3, 0, 0], sizes = [1, 8, 384], strides = [1, 1, 1]} : vector<8x8x384xf32> to vector<1x8x384xf32>
    %124 = vector.shape_cast %123 : vector<1x8x384xf32> to vector<8x384xf32>
    %125 = vector.extract_strided_slice %124 {offsets = [0, 0], sizes = [8, 128], strides = [1, 1]} : vector<8x384xf32> to vector<8x128xf32>
    %126 = vector.extract_strided_slice %122 {offsets = [0, 0], sizes = [8, 128], strides = [1, 1]} : vector<8x384xf32> to vector<8x128xf32>
    %127 = arith.addf %125, %126 : vector<8x128xf32>
    %128 = arith.negf %127 : vector<8x128xf32>
    %129 = math.exp %128 : vector<8x128xf32>
    %cst_45 = arith.constant 1.000000e+00 : f32
    %130 = vector.broadcast %cst_45 : f32 to vector<8x128xf32>
    %131 = arith.addf %130, %129 : vector<8x128xf32>
    %132 = arith.divf %130, %131 : vector<8x128xf32>
    %133 = vector.extract_strided_slice %124 {offsets = [0, 128], sizes = [8, 128], strides = [1, 1]} : vector<8x384xf32> to vector<8x128xf32>
    %134 = vector.extract_strided_slice %122 {offsets = [0, 128], sizes = [8, 128], strides = [1, 1]} : vector<8x384xf32> to vector<8x128xf32>
    %135 = arith.addf %133, %134 : vector<8x128xf32>
    %136 = arith.negf %135 : vector<8x128xf32>
    %137 = math.exp %136 : vector<8x128xf32>
    %cst_46 = arith.constant 1.000000e+00 : f32
    %138 = vector.broadcast %cst_46 : f32 to vector<8x128xf32>
    %139 = arith.addf %138, %137 : vector<8x128xf32>
    %140 = arith.divf %138, %139 : vector<8x128xf32>
    %141 = vector.extract_strided_slice %124 {offsets = [0, 256], sizes = [8, 128], strides = [1, 1]} : vector<8x384xf32> to vector<8x128xf32>
    %142 = vector.extract_strided_slice %122 {offsets = [0, 256], sizes = [8, 128], strides = [1, 1]} : vector<8x384xf32> to vector<8x128xf32>
    %143 = vector.broadcast %12 : vector<1x128xf32> to vector<8x128xf32>
    %144 = arith.addf %142, %143 : vector<8x128xf32>
    %145 = arith.mulf %132, %144 : vector<8x128xf32>
    %146 = arith.addf %141, %145 : vector<8x128xf32>
    %147 = math.tanh %146 : vector<8x128xf32>
    %cst_47 = arith.constant 1.000000e+00 : f32
    %148 = vector.broadcast %cst_47 : f32 to vector<8x128xf32>
    %149 = arith.subf %148, %140 : vector<8x128xf32>
    %150 = arith.mulf %149, %147 : vector<8x128xf32>
    %151 = arith.mulf %140, %121 : vector<8x128xf32>
    %152 = arith.addf %150, %151 : vector<8x128xf32>
    %c0_48 = arith.constant 0 : index
    %c0_49 = arith.constant 0 : index
    %153 = vector.load %arg7[%c0_48, %c0_49] : memref<8x128xf32, #tpu.memory_space<vmem>>, vector<8x128xf32>
    tpu.vector_store %arg7[%c0_48, %c0_49], %152 {strides = array<i32>} : memref<8x128xf32, #tpu.memory_space<vmem>>, vector<8x128xf32>,
    %c3 = arith.constant 3 : index
    %c0_50 = arith.constant 0 : index
    %c0_51 = arith.constant 0 : index
    %154 = vector.load %arg6[%c3, %c0_50, %c0_51] : memref<8x8x128xf32, #tpu.memory_space<vmem>>, vector<1x8x128xf32>
    %155 = vector.shape_cast %154 : vector<1x8x128xf32> to vector<8x128xf32>
    %156 = vector.shape_cast %152 : vector<8x128xf32> to vector<1x8x128xf32>
    tpu.vector_store %arg6[%c3, %c0_50, %c0_51], %156 {strides = array<i32>} : memref<8x8x128xf32, #tpu.memory_space<vmem>>, vector<1x8x128xf32>,
    %c0_52 = arith.constant 0 : index
    %c0_53 = arith.constant 0 : index
    %157 = vector.load %arg7[%c0_52, %c0_53] : memref<8x128xf32, #tpu.memory_space<vmem>>, vector<8x128xf32>
    %cst_54 = arith.constant dense<0.000000e+00> : vector<8x384xf32>
    %158 = tpu.matmul %157, %11, %cst_54 {dimension_numbers = #tpu.dot_dimension_numbers<[1], [0], [0], [1], [0, 0, 1, 1], [], []>} : vector<8x128xf32>, vector<128x384xf32>, vector<8x384xf32> -> vector<8x384xf32>
    %159 = vector.extract_strided_slice %10 {offsets = [4, 0, 0], sizes = [1, 8, 384], strides = [1, 1, 1]} : vector<8x8x384xf32> to vector<1x8x384xf32>
    %160 = vector.shape_cast %159 : vector<1x8x384xf32> to vector<8x384xf32>
    %161 = vector.extract_strided_slice %160 {offsets = [0, 0], sizes = [8, 128], strides = [1, 1]} : vector<8x384xf32> to vector<8x128xf32>
    %162 = vector.extract_strided_slice %158 {offsets = [0, 0], sizes = [8, 128], strides = [1, 1]} : vector<8x384xf32> to vector<8x128xf32>
    %163 = arith.addf %161, %162 : vector<8x128xf32>
    %164 = arith.negf %163 : vector<8x128xf32>
    %165 = math.exp %164 : vector<8x128xf32>
    %cst_55 = arith.constant 1.000000e+00 : f32
    %166 = vector.broadcast %cst_55 : f32 to vector<8x128xf32>
    %167 = arith.addf %166, %165 : vector<8x128xf32>
    %168 = arith.divf %166, %167 : vector<8x128xf32>
    %169 = vector.extract_strided_slice %160 {offsets = [0, 128], sizes = [8, 128], strides = [1, 1]} : vector<8x384xf32> to vector<8x128xf32>
    %170 = vector.extract_strided_slice %158 {offsets = [0, 128], sizes = [8, 128], strides = [1, 1]} : vector<8x384xf32> to vector<8x128xf32>
    %171 = arith.addf %169, %170 : vector<8x128xf32>
    %172 = arith.negf %171 : vector<8x128xf32>
    %173 = math.exp %172 : vector<8x128xf32>
    %cst_56 = arith.constant 1.000000e+00 : f32
    %174 = vector.broadcast %cst_56 : f32 to vector<8x128xf32>
    %175 = arith.addf %174, %173 : vector<8x128xf32>
    %176 = arith.divf %174, %175 : vector<8x128xf32>
    %177 = vector.extract_strided_slice %160 {offsets = [0, 256], sizes = [8, 128], strides = [1, 1]} : vector<8x384xf32> to vector<8x128xf32>
    %178 = vector.extract_strided_slice %158 {offsets = [0, 256], sizes = [8, 128], strides = [1, 1]} : vector<8x384xf32> to vector<8x128xf32>
    %179 = vector.broadcast %12 : vector<1x128xf32> to vector<8x128xf32>
    %180 = arith.addf %178, %179 : vector<8x128xf32>
    %181 = arith.mulf %168, %180 : vector<8x128xf32>
    %182 = arith.addf %177, %181 : vector<8x128xf32>
    %183 = math.tanh %182 : vector<8x128xf32>
    %cst_57 = arith.constant 1.000000e+00 : f32
    %184 = vector.broadcast %cst_57 : f32 to vector<8x128xf32>
    %185 = arith.subf %184, %176 : vector<8x128xf32>
    %186 = arith.mulf %185, %183 : vector<8x128xf32>
    %187 = arith.mulf %176, %157 : vector<8x128xf32>
    %188 = arith.addf %186, %187 : vector<8x128xf32>
    %c0_58 = arith.constant 0 : index
    %c0_59 = arith.constant 0 : index
    %189 = vector.load %arg7[%c0_58, %c0_59] : memref<8x128xf32, #tpu.memory_space<vmem>>, vector<8x128xf32>
    tpu.vector_store %arg7[%c0_58, %c0_59], %188 {strides = array<i32>} : memref<8x128xf32, #tpu.memory_space<vmem>>, vector<8x128xf32>,
    %c4 = arith.constant 4 : index
    %c0_60 = arith.constant 0 : index
    %c0_61 = arith.constant 0 : index
    %190 = vector.load %arg6[%c4, %c0_60, %c0_61] : memref<8x8x128xf32, #tpu.memory_space<vmem>>, vector<1x8x128xf32>
    %191 = vector.shape_cast %190 : vector<1x8x128xf32> to vector<8x128xf32>
    %192 = vector.shape_cast %188 : vector<8x128xf32> to vector<1x8x128xf32>
    tpu.vector_store %arg6[%c4, %c0_60, %c0_61], %192 {strides = array<i32>} : memref<8x8x128xf32, #tpu.memory_space<vmem>>, vector<1x8x128xf32>,
    %c0_62 = arith.constant 0 : index
    %c0_63 = arith.constant 0 : index
    %193 = vector.load %arg7[%c0_62, %c0_63] : memref<8x128xf32, #tpu.memory_space<vmem>>, vector<8x128xf32>
    %cst_64 = arith.constant dense<0.000000e+00> : vector<8x384xf32>
    %194 = tpu.matmul %193, %11, %cst_64 {dimension_numbers = #tpu.dot_dimension_numbers<[1], [0], [0], [1], [0, 0, 1, 1], [], []>} : vector<8x128xf32>, vector<128x384xf32>, vector<8x384xf32> -> vector<8x384xf32>
    %195 = vector.extract_strided_slice %10 {offsets = [5, 0, 0], sizes = [1, 8, 384], strides = [1, 1, 1]} : vector<8x8x384xf32> to vector<1x8x384xf32>
    %196 = vector.shape_cast %195 : vector<1x8x384xf32> to vector<8x384xf32>
    %197 = vector.extract_strided_slice %196 {offsets = [0, 0], sizes = [8, 128], strides = [1, 1]} : vector<8x384xf32> to vector<8x128xf32>
    %198 = vector.extract_strided_slice %194 {offsets = [0, 0], sizes = [8, 128], strides = [1, 1]} : vector<8x384xf32> to vector<8x128xf32>
    %199 = arith.addf %197, %198 : vector<8x128xf32>
    %200 = arith.negf %199 : vector<8x128xf32>
    %201 = math.exp %200 : vector<8x128xf32>
    %cst_65 = arith.constant 1.000000e+00 : f32
    %202 = vector.broadcast %cst_65 : f32 to vector<8x128xf32>
    %203 = arith.addf %202, %201 : vector<8x128xf32>
    %204 = arith.divf %202, %203 : vector<8x128xf32>
    %205 = vector.extract_strided_slice %196 {offsets = [0, 128], sizes = [8, 128], strides = [1, 1]} : vector<8x384xf32> to vector<8x128xf32>
    %206 = vector.extract_strided_slice %194 {offsets = [0, 128], sizes = [8, 128], strides = [1, 1]} : vector<8x384xf32> to vector<8x128xf32>
    %207 = arith.addf %205, %206 : vector<8x128xf32>
    %208 = arith.negf %207 : vector<8x128xf32>
    %209 = math.exp %208 : vector<8x128xf32>
    %cst_66 = arith.constant 1.000000e+00 : f32
    %210 = vector.broadcast %cst_66 : f32 to vector<8x128xf32>
    %211 = arith.addf %210, %209 : vector<8x128xf32>
    %212 = arith.divf %210, %211 : vector<8x128xf32>
    %213 = vector.extract_strided_slice %196 {offsets = [0, 256], sizes = [8, 128], strides = [1, 1]} : vector<8x384xf32> to vector<8x128xf32>
    %214 = vector.extract_strided_slice %194 {offsets = [0, 256], sizes = [8, 128], strides = [1, 1]} : vector<8x384xf32> to vector<8x128xf32>
    %215 = vector.broadcast %12 : vector<1x128xf32> to vector<8x128xf32>
    %216 = arith.addf %214, %215 : vector<8x128xf32>
    %217 = arith.mulf %204, %216 : vector<8x128xf32>
    %218 = arith.addf %213, %217 : vector<8x128xf32>
    %219 = math.tanh %218 : vector<8x128xf32>
    %cst_67 = arith.constant 1.000000e+00 : f32
    %220 = vector.broadcast %cst_67 : f32 to vector<8x128xf32>
    %221 = arith.subf %220, %212 : vector<8x128xf32>
    %222 = arith.mulf %221, %219 : vector<8x128xf32>
    %223 = arith.mulf %212, %193 : vector<8x128xf32>
    %224 = arith.addf %222, %223 : vector<8x128xf32>
    %c0_68 = arith.constant 0 : index
    %c0_69 = arith.constant 0 : index
    %225 = vector.load %arg7[%c0_68, %c0_69] : memref<8x128xf32, #tpu.memory_space<vmem>>, vector<8x128xf32>
    tpu.vector_store %arg7[%c0_68, %c0_69], %224 {strides = array<i32>} : memref<8x128xf32, #tpu.memory_space<vmem>>, vector<8x128xf32>,
    %c5 = arith.constant 5 : index
    %c0_70 = arith.constant 0 : index
    %c0_71 = arith.constant 0 : index
    %226 = vector.load %arg6[%c5, %c0_70, %c0_71] : memref<8x8x128xf32, #tpu.memory_space<vmem>>, vector<1x8x128xf32>
    %227 = vector.shape_cast %226 : vector<1x8x128xf32> to vector<8x128xf32>
    %228 = vector.shape_cast %224 : vector<8x128xf32> to vector<1x8x128xf32>
    tpu.vector_store %arg6[%c5, %c0_70, %c0_71], %228 {strides = array<i32>} : memref<8x8x128xf32, #tpu.memory_space<vmem>>, vector<1x8x128xf32>,
    %c0_72 = arith.constant 0 : index
    %c0_73 = arith.constant 0 : index
    %229 = vector.load %arg7[%c0_72, %c0_73] : memref<8x128xf32, #tpu.memory_space<vmem>>, vector<8x128xf32>
    %cst_74 = arith.constant dense<0.000000e+00> : vector<8x384xf32>
    %230 = tpu.matmul %229, %11, %cst_74 {dimension_numbers = #tpu.dot_dimension_numbers<[1], [0], [0], [1], [0, 0, 1, 1], [], []>} : vector<8x128xf32>, vector<128x384xf32>, vector<8x384xf32> -> vector<8x384xf32>
    %231 = vector.extract_strided_slice %10 {offsets = [6, 0, 0], sizes = [1, 8, 384], strides = [1, 1, 1]} : vector<8x8x384xf32> to vector<1x8x384xf32>
    %232 = vector.shape_cast %231 : vector<1x8x384xf32> to vector<8x384xf32>
    %233 = vector.extract_strided_slice %232 {offsets = [0, 0], sizes = [8, 128], strides = [1, 1]} : vector<8x384xf32> to vector<8x128xf32>
    %234 = vector.extract_strided_slice %230 {offsets = [0, 0], sizes = [8, 128], strides = [1, 1]} : vector<8x384xf32> to vector<8x128xf32>
    %235 = arith.addf %233, %234 : vector<8x128xf32>
    %236 = arith.negf %235 : vector<8x128xf32>
    %237 = math.exp %236 : vector<8x128xf32>
    %cst_75 = arith.constant 1.000000e+00 : f32
    %238 = vector.broadcast %cst_75 : f32 to vector<8x128xf32>
    %239 = arith.addf %238, %237 : vector<8x128xf32>
    %240 = arith.divf %238, %239 : vector<8x128xf32>
    %241 = vector.extract_strided_slice %232 {offsets = [0, 128], sizes = [8, 128], strides = [1, 1]} : vector<8x384xf32> to vector<8x128xf32>
    %242 = vector.extract_strided_slice %230 {offsets = [0, 128], sizes = [8, 128], strides = [1, 1]} : vector<8x384xf32> to vector<8x128xf32>
    %243 = arith.addf %241, %242 : vector<8x128xf32>
    %244 = arith.negf %243 : vector<8x128xf32>
    %245 = math.exp %244 : vector<8x128xf32>
    %cst_76 = arith.constant 1.000000e+00 : f32
    %246 = vector.broadcast %cst_76 : f32 to vector<8x128xf32>
    %247 = arith.addf %246, %245 : vector<8x128xf32>
    %248 = arith.divf %246, %247 : vector<8x128xf32>
    %249 = vector.extract_strided_slice %232 {offsets = [0, 256], sizes = [8, 128], strides = [1, 1]} : vector<8x384xf32> to vector<8x128xf32>
    %250 = vector.extract_strided_slice %230 {offsets = [0, 256], sizes = [8, 128], strides = [1, 1]} : vector<8x384xf32> to vector<8x128xf32>
    %251 = vector.broadcast %12 : vector<1x128xf32> to vector<8x128xf32>
    %252 = arith.addf %250, %251 : vector<8x128xf32>
    %253 = arith.mulf %240, %252 : vector<8x128xf32>
    %254 = arith.addf %249, %253 : vector<8x128xf32>
    %255 = math.tanh %254 : vector<8x128xf32>
    %cst_77 = arith.constant 1.000000e+00 : f32
    %256 = vector.broadcast %cst_77 : f32 to vector<8x128xf32>
    %257 = arith.subf %256, %248 : vector<8x128xf32>
    %258 = arith.mulf %257, %255 : vector<8x128xf32>
    %259 = arith.mulf %248, %229 : vector<8x128xf32>
    %260 = arith.addf %258, %259 : vector<8x128xf32>
    %c0_78 = arith.constant 0 : index
    %c0_79 = arith.constant 0 : index
    %261 = vector.load %arg7[%c0_78, %c0_79] : memref<8x128xf32, #tpu.memory_space<vmem>>, vector<8x128xf32>
    tpu.vector_store %arg7[%c0_78, %c0_79], %260 {strides = array<i32>} : memref<8x128xf32, #tpu.memory_space<vmem>>, vector<8x128xf32>,
    %c6 = arith.constant 6 : index
    %c0_80 = arith.constant 0 : index
    %c0_81 = arith.constant 0 : index
    %262 = vector.load %arg6[%c6, %c0_80, %c0_81] : memref<8x8x128xf32, #tpu.memory_space<vmem>>, vector<1x8x128xf32>
    %263 = vector.shape_cast %262 : vector<1x8x128xf32> to vector<8x128xf32>
    %264 = vector.shape_cast %260 : vector<8x128xf32> to vector<1x8x128xf32>
    tpu.vector_store %arg6[%c6, %c0_80, %c0_81], %264 {strides = array<i32>} : memref<8x8x128xf32, #tpu.memory_space<vmem>>, vector<1x8x128xf32>,
    %c0_82 = arith.constant 0 : index
    %c0_83 = arith.constant 0 : index
    %265 = vector.load %arg7[%c0_82, %c0_83] : memref<8x128xf32, #tpu.memory_space<vmem>>, vector<8x128xf32>
    %cst_84 = arith.constant dense<0.000000e+00> : vector<8x384xf32>
    %266 = tpu.matmul %265, %11, %cst_84 {dimension_numbers = #tpu.dot_dimension_numbers<[1], [0], [0], [1], [0, 0, 1, 1], [], []>} : vector<8x128xf32>, vector<128x384xf32>, vector<8x384xf32> -> vector<8x384xf32>
    %267 = vector.extract_strided_slice %10 {offsets = [7, 0, 0], sizes = [1, 8, 384], strides = [1, 1, 1]} : vector<8x8x384xf32> to vector<1x8x384xf32>
    %268 = vector.shape_cast %267 : vector<1x8x384xf32> to vector<8x384xf32>
    %269 = vector.extract_strided_slice %268 {offsets = [0, 0], sizes = [8, 128], strides = [1, 1]} : vector<8x384xf32> to vector<8x128xf32>
    %270 = vector.extract_strided_slice %266 {offsets = [0, 0], sizes = [8, 128], strides = [1, 1]} : vector<8x384xf32> to vector<8x128xf32>
    %271 = arith.addf %269, %270 : vector<8x128xf32>
    %272 = arith.negf %271 : vector<8x128xf32>
    %273 = math.exp %272 : vector<8x128xf32>
    %cst_85 = arith.constant 1.000000e+00 : f32
    %274 = vector.broadcast %cst_85 : f32 to vector<8x128xf32>
    %275 = arith.addf %274, %273 : vector<8x128xf32>
    %276 = arith.divf %274, %275 : vector<8x128xf32>
    %277 = vector.extract_strided_slice %268 {offsets = [0, 128], sizes = [8, 128], strides = [1, 1]} : vector<8x384xf32> to vector<8x128xf32>
    %278 = vector.extract_strided_slice %266 {offsets = [0, 128], sizes = [8, 128], strides = [1, 1]} : vector<8x384xf32> to vector<8x128xf32>
    %279 = arith.addf %277, %278 : vector<8x128xf32>
    %280 = arith.negf %279 : vector<8x128xf32>
    %281 = math.exp %280 : vector<8x128xf32>
    %cst_86 = arith.constant 1.000000e+00 : f32
    %282 = vector.broadcast %cst_86 : f32 to vector<8x128xf32>
    %283 = arith.addf %282, %281 : vector<8x128xf32>
    %284 = arith.divf %282, %283 : vector<8x128xf32>
    %285 = vector.extract_strided_slice %268 {offsets = [0, 256], sizes = [8, 128], strides = [1, 1]} : vector<8x384xf32> to vector<8x128xf32>
    %286 = vector.extract_strided_slice %266 {offsets = [0, 256], sizes = [8, 128], strides = [1, 1]} : vector<8x384xf32> to vector<8x128xf32>
    %287 = vector.broadcast %12 : vector<1x128xf32> to vector<8x128xf32>
    %288 = arith.addf %286, %287 : vector<8x128xf32>
    %289 = arith.mulf %276, %288 : vector<8x128xf32>
    %290 = arith.addf %285, %289 : vector<8x128xf32>
    %291 = math.tanh %290 : vector<8x128xf32>
    %cst_87 = arith.constant 1.000000e+00 : f32
    %292 = vector.broadcast %cst_87 : f32 to vector<8x128xf32>
    %293 = arith.subf %292, %284 : vector<8x128xf32>
    %294 = arith.mulf %293, %291 : vector<8x128xf32>
    %295 = arith.mulf %284, %265 : vector<8x128xf32>
    %296 = arith.addf %294, %295 : vector<8x128xf32>
    %c0_88 = arith.constant 0 : index
    %c0_89 = arith.constant 0 : index
    %297 = vector.load %arg7[%c0_88, %c0_89] : memref<8x128xf32, #tpu.memory_space<vmem>>, vector<8x128xf32>
    tpu.vector_store %arg7[%c0_88, %c0_89], %296 {strides = array<i32>} : memref<8x128xf32, #tpu.memory_space<vmem>>, vector<8x128xf32>,
    %c7 = arith.constant 7 : index
    %c0_90 = arith.constant 0 : index
    %c0_91 = arith.constant 0 : index
    %298 = vector.load %arg6[%c7, %c0_90, %c0_91] : memref<8x8x128xf32, #tpu.memory_space<vmem>>, vector<1x8x128xf32>
    %299 = vector.shape_cast %298 : vector<1x8x128xf32> to vector<8x128xf32>
    %300 = vector.shape_cast %296 : vector<8x128xf32> to vector<1x8x128xf32>
    tpu.vector_store %arg6[%c7, %c0_90, %c0_91], %300 {strides = array<i32>} : memref<8x8x128xf32, #tpu.memory_space<vmem>>, vector<1x8x128xf32>,
    return
  }
  func.func @transform_0(%arg0: i32) -> (i32, i32, i32) {
    %c0_i32 = arith.constant 0 : i32
    %c0_i32_0 = arith.constant 0 : i32
    %c0_i32_1 = arith.constant 0 : i32
    return %arg0, %c0_i32, %c0_i32_0 : i32, i32, i32
  }
  func.func @transform_1(%arg0: i32) -> (i32, i32) {
    %c0_i32 = arith.constant 0 : i32
    %c0_i32_0 = arith.constant 0 : i32
    %c0_i32_1 = arith.constant 0 : i32
    return %c0_i32, %c0_i32_0 : i32, i32
  }
  func.func @transform_2(%arg0: i32) -> (i32, i32) {
    %c0_i32 = arith.constant 0 : i32
    %c0_i32_0 = arith.constant 0 : i32
    %c0_i32_1 = arith.constant 0 : i32
    return %c0_i32, %c0_i32_0 : i32, i32
  }
  func.func @transform_3(%arg0: i32) -> (i32, i32) {
    %c0_i32 = arith.constant 0 : i32
    %c0_i32_0 = arith.constant 0 : i32
    %c0_i32_1 = arith.constant 0 : i32
    return %c0_i32, %c0_i32_0 : i32, i32
  }
  func.func @transform_4(%arg0: i32) -> (i32, i32) {
    %c0_i32 = arith.constant 0 : i32
    %c0_i32_0 = arith.constant 0 : i32
    %c0_i32_1 = arith.constant 0 : i32
    return %c0_i32, %c0_i32_0 : i32, i32
  }
  func.func @transform_5(%arg0: i32) -> (i32, i32, i32) {
    %c0_i32 = arith.constant 0 : i32
    %c0_i32_0 = arith.constant 0 : i32
    %c0_i32_1 = arith.constant 0 : i32
    return %arg0, %c0_i32, %c0_i32_0 : i32, i32, i32
  }
}

module attributes {stable_mosaic.version = 11 : i64} {
  func.func @_gru_last_fc_kernel(%arg0: i32, %arg1: memref<8x8x128xf32, #tpu.memory_space<vmem>>, %arg2: memref<128x384xf32, #tpu.memory_space<vmem>>, %arg3: memref<1x384xf32, #tpu.memory_space<vmem>>, %arg4: memref<128x384xf32, #tpu.memory_space<vmem>>, %arg5: memref<1x128xf32, #tpu.memory_space<vmem>>, %arg6: memref<128x128xf32, #tpu.memory_space<vmem>>, %arg7: memref<1x128xf32, #tpu.memory_space<vmem>>, %arg8: memref<8x128xf32, #tpu.memory_space<vmem>>, %arg9: memref<8x128xf32, #tpu.memory_space<vmem>>) attributes {dimension_semantics = [#tpu.dimension_semantics<arbitrary>], iteration_bounds = array<i64: 1>, scalar_prefetch = 0 : i64, scratch_operands = 1 : i64, tpu.core_type = #tpu.core_type<tc>, window_params = [{transform_indices = @transform_0, window_bounds = array<i64: 8, 8, 128>}, {pipeline_mode = #tpu.pipeline_mode<synchronous>, transform_indices = @transform_1, window_bounds = array<i64: 128, 384>}, {pipeline_mode = #tpu.pipeline_mode<synchronous>, transform_indices = @transform_2, window_bounds = array<i64: 1, 384>}, {pipeline_mode = #tpu.pipeline_mode<synchronous>, transform_indices = @transform_3, window_bounds = array<i64: 128, 384>}, {pipeline_mode = #tpu.pipeline_mode<synchronous>, transform_indices = @transform_4, window_bounds = array<i64: 1, 128>}, {pipeline_mode = #tpu.pipeline_mode<synchronous>, transform_indices = @transform_5, window_bounds = array<i64: 128, 128>}, {pipeline_mode = #tpu.pipeline_mode<synchronous>, transform_indices = @transform_6, window_bounds = array<i64: 1, 128>}, {pipeline_mode = #tpu.pipeline_mode<synchronous>, transform_indices = @transform_7, window_bounds = array<i64: 8, 128>}]} {
    %c0_i32 = arith.constant 0 : i32
    %0 = arith.cmpi eq, %arg0, %c0_i32 : i32
    %1 = arith.extui %0 : i1 to i32
    %c0_i32_0 = arith.constant 0 : i32
    %2 = arith.cmpi ne, %1, %c0_i32_0 : i32
    scf.if %2 {
      %cst_77 = arith.constant 0.000000e+00 : f32
      %280 = vector.broadcast %cst_77 : f32 to vector<8x128xf32>
      %c0_78 = arith.constant 0 : index
      %c0_79 = arith.constant 0 : index
      %281 = vector.load %arg9[%c0_78, %c0_79] : memref<8x128xf32, #tpu.memory_space<vmem>>, vector<8x128xf32>
      tpu.vector_store %arg9[%c0_78, %c0_79], %280 {strides = array<i32>} : memref<8x128xf32, #tpu.memory_space<vmem>>, vector<8x128xf32>,
    } else {
    }
    %c0 = arith.constant 0 : index
    %c0_1 = arith.constant 0 : index
    %3 = vector.load %arg2[%c0, %c0_1] : memref<128x384xf32, #tpu.memory_space<vmem>>, vector<128x384xf32>
    %c0_2 = arith.constant 0 : index
    %c0_3 = arith.constant 0 : index
    %c0_4 = arith.constant 0 : index
    %4 = vector.load %arg1[%c0_2, %c0_3, %c0_4] : memref<8x8x128xf32, #tpu.memory_space<vmem>>, vector<8x8x128xf32>
    %5 = vector.shape_cast %4 : vector<8x8x128xf32> to vector<64x128xf32>
    %cst = arith.constant dense<0.000000e+00> : vector<64x384xf32>
    %6 = tpu.matmul %5, %3, %cst {dimension_numbers = #tpu.dot_dimension_numbers<[1], [0], [0], [1], [0, 0, 1, 1], [], []>} : vector<64x128xf32>, vector<128x384xf32>, vector<64x384xf32> -> vector<64x384xf32>
    %c0_5 = arith.constant 0 : index
    %c0_6 = arith.constant 0 : index
    %7 = vector.load %arg3[%c0_5, %c0_6] : memref<1x384xf32, #tpu.memory_space<vmem>>, vector<1x384xf32>
    %8 = vector.broadcast %7 : vector<1x384xf32> to vector<64x384xf32>
    %9 = arith.addf %6, %8 : vector<64x384xf32>
    %10 = vector.shape_cast %9 : vector<64x384xf32> to vector<8x8x384xf32>
    %c0_7 = arith.constant 0 : index
    %c0_8 = arith.constant 0 : index
    %11 = vector.load %arg4[%c0_7, %c0_8] : memref<128x384xf32, #tpu.memory_space<vmem>>, vector<128x384xf32>
    %c0_9 = arith.constant 0 : index
    %c0_10 = arith.constant 0 : index
    %12 = vector.load %arg5[%c0_9, %c0_10] : memref<1x128xf32, #tpu.memory_space<vmem>>, vector<1x128xf32>
    %c0_11 = arith.constant 0 : index
    %c0_12 = arith.constant 0 : index
    %13 = vector.load %arg9[%c0_11, %c0_12] : memref<8x128xf32, #tpu.memory_space<vmem>>, vector<8x128xf32>
    %cst_13 = arith.constant dense<0.000000e+00> : vector<8x384xf32>
    %14 = tpu.matmul %13, %11, %cst_13 {dimension_numbers = #tpu.dot_dimension_numbers<[1], [0], [0], [1], [0, 0, 1, 1], [], []>} : vector<8x128xf32>, vector<128x384xf32>, vector<8x384xf32> -> vector<8x384xf32>
    %15 = vector.extract_strided_slice %10 {offsets = [0, 0, 0], sizes = [1, 8, 384], strides = [1, 1, 1]} : vector<8x8x384xf32> to vector<1x8x384xf32>
    %16 = vector.shape_cast %15 : vector<1x8x384xf32> to vector<8x384xf32>
    %17 = vector.extract_strided_slice %16 {offsets = [0, 0], sizes = [8, 128], strides = [1, 1]} : vector<8x384xf32> to vector<8x128xf32>
    %18 = vector.extract_strided_slice %14 {offsets = [0, 0], sizes = [8, 128], strides = [1, 1]} : vector<8x384xf32> to vector<8x128xf32>
    %19 = arith.addf %17, %18 : vector<8x128xf32>
    %20 = arith.negf %19 : vector<8x128xf32>
    %21 = math.exp %20 : vector<8x128xf32>
    %cst_14 = arith.constant 1.000000e+00 : f32
    %22 = vector.broadcast %cst_14 : f32 to vector<8x128xf32>
    %23 = arith.addf %22, %21 : vector<8x128xf32>
    %24 = arith.divf %22, %23 : vector<8x128xf32>
    %25 = vector.extract_strided_slice %16 {offsets = [0, 128], sizes = [8, 128], strides = [1, 1]} : vector<8x384xf32> to vector<8x128xf32>
    %26 = vector.extract_strided_slice %14 {offsets = [0, 128], sizes = [8, 128], strides = [1, 1]} : vector<8x384xf32> to vector<8x128xf32>
    %27 = arith.addf %25, %26 : vector<8x128xf32>
    %28 = arith.negf %27 : vector<8x128xf32>
    %29 = math.exp %28 : vector<8x128xf32>
    %cst_15 = arith.constant 1.000000e+00 : f32
    %30 = vector.broadcast %cst_15 : f32 to vector<8x128xf32>
    %31 = arith.addf %30, %29 : vector<8x128xf32>
    %32 = arith.divf %30, %31 : vector<8x128xf32>
    %33 = vector.extract_strided_slice %16 {offsets = [0, 256], sizes = [8, 128], strides = [1, 1]} : vector<8x384xf32> to vector<8x128xf32>
    %34 = vector.extract_strided_slice %14 {offsets = [0, 256], sizes = [8, 128], strides = [1, 1]} : vector<8x384xf32> to vector<8x128xf32>
    %35 = vector.broadcast %12 : vector<1x128xf32> to vector<8x128xf32>
    %36 = arith.addf %34, %35 : vector<8x128xf32>
    %37 = arith.mulf %24, %36 : vector<8x128xf32>
    %38 = arith.addf %33, %37 : vector<8x128xf32>
    %39 = math.tanh %38 : vector<8x128xf32>
    %cst_16 = arith.constant 1.000000e+00 : f32
    %40 = vector.broadcast %cst_16 : f32 to vector<8x128xf32>
    %41 = arith.subf %40, %32 : vector<8x128xf32>
    %42 = arith.mulf %41, %39 : vector<8x128xf32>
    %43 = arith.mulf %32, %13 : vector<8x128xf32>
    %44 = arith.addf %42, %43 : vector<8x128xf32>
    %c0_17 = arith.constant 0 : index
    %c0_18 = arith.constant 0 : index
    %45 = vector.load %arg9[%c0_17, %c0_18] : memref<8x128xf32, #tpu.memory_space<vmem>>, vector<8x128xf32>
    tpu.vector_store %arg9[%c0_17, %c0_18], %44 {strides = array<i32>} : memref<8x128xf32, #tpu.memory_space<vmem>>, vector<8x128xf32>,
    %c0_19 = arith.constant 0 : index
    %c0_20 = arith.constant 0 : index
    %46 = vector.load %arg9[%c0_19, %c0_20] : memref<8x128xf32, #tpu.memory_space<vmem>>, vector<8x128xf32>
    %cst_21 = arith.constant dense<0.000000e+00> : vector<8x384xf32>
    %47 = tpu.matmul %46, %11, %cst_21 {dimension_numbers = #tpu.dot_dimension_numbers<[1], [0], [0], [1], [0, 0, 1, 1], [], []>} : vector<8x128xf32>, vector<128x384xf32>, vector<8x384xf32> -> vector<8x384xf32>
    %48 = vector.extract_strided_slice %10 {offsets = [1, 0, 0], sizes = [1, 8, 384], strides = [1, 1, 1]} : vector<8x8x384xf32> to vector<1x8x384xf32>
    %49 = vector.shape_cast %48 : vector<1x8x384xf32> to vector<8x384xf32>
    %50 = vector.extract_strided_slice %49 {offsets = [0, 0], sizes = [8, 128], strides = [1, 1]} : vector<8x384xf32> to vector<8x128xf32>
    %51 = vector.extract_strided_slice %47 {offsets = [0, 0], sizes = [8, 128], strides = [1, 1]} : vector<8x384xf32> to vector<8x128xf32>
    %52 = arith.addf %50, %51 : vector<8x128xf32>
    %53 = arith.negf %52 : vector<8x128xf32>
    %54 = math.exp %53 : vector<8x128xf32>
    %cst_22 = arith.constant 1.000000e+00 : f32
    %55 = vector.broadcast %cst_22 : f32 to vector<8x128xf32>
    %56 = arith.addf %55, %54 : vector<8x128xf32>
    %57 = arith.divf %55, %56 : vector<8x128xf32>
    %58 = vector.extract_strided_slice %49 {offsets = [0, 128], sizes = [8, 128], strides = [1, 1]} : vector<8x384xf32> to vector<8x128xf32>
    %59 = vector.extract_strided_slice %47 {offsets = [0, 128], sizes = [8, 128], strides = [1, 1]} : vector<8x384xf32> to vector<8x128xf32>
    %60 = arith.addf %58, %59 : vector<8x128xf32>
    %61 = arith.negf %60 : vector<8x128xf32>
    %62 = math.exp %61 : vector<8x128xf32>
    %cst_23 = arith.constant 1.000000e+00 : f32
    %63 = vector.broadcast %cst_23 : f32 to vector<8x128xf32>
    %64 = arith.addf %63, %62 : vector<8x128xf32>
    %65 = arith.divf %63, %64 : vector<8x128xf32>
    %66 = vector.extract_strided_slice %49 {offsets = [0, 256], sizes = [8, 128], strides = [1, 1]} : vector<8x384xf32> to vector<8x128xf32>
    %67 = vector.extract_strided_slice %47 {offsets = [0, 256], sizes = [8, 128], strides = [1, 1]} : vector<8x384xf32> to vector<8x128xf32>
    %68 = vector.broadcast %12 : vector<1x128xf32> to vector<8x128xf32>
    %69 = arith.addf %67, %68 : vector<8x128xf32>
    %70 = arith.mulf %57, %69 : vector<8x128xf32>
    %71 = arith.addf %66, %70 : vector<8x128xf32>
    %72 = math.tanh %71 : vector<8x128xf32>
    %cst_24 = arith.constant 1.000000e+00 : f32
    %73 = vector.broadcast %cst_24 : f32 to vector<8x128xf32>
    %74 = arith.subf %73, %65 : vector<8x128xf32>
    %75 = arith.mulf %74, %72 : vector<8x128xf32>
    %76 = arith.mulf %65, %46 : vector<8x128xf32>
    %77 = arith.addf %75, %76 : vector<8x128xf32>
    %c0_25 = arith.constant 0 : index
    %c0_26 = arith.constant 0 : index
    %78 = vector.load %arg9[%c0_25, %c0_26] : memref<8x128xf32, #tpu.memory_space<vmem>>, vector<8x128xf32>
    tpu.vector_store %arg9[%c0_25, %c0_26], %77 {strides = array<i32>} : memref<8x128xf32, #tpu.memory_space<vmem>>, vector<8x128xf32>,
    %c0_27 = arith.constant 0 : index
    %c0_28 = arith.constant 0 : index
    %79 = vector.load %arg9[%c0_27, %c0_28] : memref<8x128xf32, #tpu.memory_space<vmem>>, vector<8x128xf32>
    %cst_29 = arith.constant dense<0.000000e+00> : vector<8x384xf32>
    %80 = tpu.matmul %79, %11, %cst_29 {dimension_numbers = #tpu.dot_dimension_numbers<[1], [0], [0], [1], [0, 0, 1, 1], [], []>} : vector<8x128xf32>, vector<128x384xf32>, vector<8x384xf32> -> vector<8x384xf32>
    %81 = vector.extract_strided_slice %10 {offsets = [2, 0, 0], sizes = [1, 8, 384], strides = [1, 1, 1]} : vector<8x8x384xf32> to vector<1x8x384xf32>
    %82 = vector.shape_cast %81 : vector<1x8x384xf32> to vector<8x384xf32>
    %83 = vector.extract_strided_slice %82 {offsets = [0, 0], sizes = [8, 128], strides = [1, 1]} : vector<8x384xf32> to vector<8x128xf32>
    %84 = vector.extract_strided_slice %80 {offsets = [0, 0], sizes = [8, 128], strides = [1, 1]} : vector<8x384xf32> to vector<8x128xf32>
    %85 = arith.addf %83, %84 : vector<8x128xf32>
    %86 = arith.negf %85 : vector<8x128xf32>
    %87 = math.exp %86 : vector<8x128xf32>
    %cst_30 = arith.constant 1.000000e+00 : f32
    %88 = vector.broadcast %cst_30 : f32 to vector<8x128xf32>
    %89 = arith.addf %88, %87 : vector<8x128xf32>
    %90 = arith.divf %88, %89 : vector<8x128xf32>
    %91 = vector.extract_strided_slice %82 {offsets = [0, 128], sizes = [8, 128], strides = [1, 1]} : vector<8x384xf32> to vector<8x128xf32>
    %92 = vector.extract_strided_slice %80 {offsets = [0, 128], sizes = [8, 128], strides = [1, 1]} : vector<8x384xf32> to vector<8x128xf32>
    %93 = arith.addf %91, %92 : vector<8x128xf32>
    %94 = arith.negf %93 : vector<8x128xf32>
    %95 = math.exp %94 : vector<8x128xf32>
    %cst_31 = arith.constant 1.000000e+00 : f32
    %96 = vector.broadcast %cst_31 : f32 to vector<8x128xf32>
    %97 = arith.addf %96, %95 : vector<8x128xf32>
    %98 = arith.divf %96, %97 : vector<8x128xf32>
    %99 = vector.extract_strided_slice %82 {offsets = [0, 256], sizes = [8, 128], strides = [1, 1]} : vector<8x384xf32> to vector<8x128xf32>
    %100 = vector.extract_strided_slice %80 {offsets = [0, 256], sizes = [8, 128], strides = [1, 1]} : vector<8x384xf32> to vector<8x128xf32>
    %101 = vector.broadcast %12 : vector<1x128xf32> to vector<8x128xf32>
    %102 = arith.addf %100, %101 : vector<8x128xf32>
    %103 = arith.mulf %90, %102 : vector<8x128xf32>
    %104 = arith.addf %99, %103 : vector<8x128xf32>
    %105 = math.tanh %104 : vector<8x128xf32>
    %cst_32 = arith.constant 1.000000e+00 : f32
    %106 = vector.broadcast %cst_32 : f32 to vector<8x128xf32>
    %107 = arith.subf %106, %98 : vector<8x128xf32>
    %108 = arith.mulf %107, %105 : vector<8x128xf32>
    %109 = arith.mulf %98, %79 : vector<8x128xf32>
    %110 = arith.addf %108, %109 : vector<8x128xf32>
    %c0_33 = arith.constant 0 : index
    %c0_34 = arith.constant 0 : index
    %111 = vector.load %arg9[%c0_33, %c0_34] : memref<8x128xf32, #tpu.memory_space<vmem>>, vector<8x128xf32>
    tpu.vector_store %arg9[%c0_33, %c0_34], %110 {strides = array<i32>} : memref<8x128xf32, #tpu.memory_space<vmem>>, vector<8x128xf32>,
    %c0_35 = arith.constant 0 : index
    %c0_36 = arith.constant 0 : index
    %112 = vector.load %arg9[%c0_35, %c0_36] : memref<8x128xf32, #tpu.memory_space<vmem>>, vector<8x128xf32>
    %cst_37 = arith.constant dense<0.000000e+00> : vector<8x384xf32>
    %113 = tpu.matmul %112, %11, %cst_37 {dimension_numbers = #tpu.dot_dimension_numbers<[1], [0], [0], [1], [0, 0, 1, 1], [], []>} : vector<8x128xf32>, vector<128x384xf32>, vector<8x384xf32> -> vector<8x384xf32>
    %114 = vector.extract_strided_slice %10 {offsets = [3, 0, 0], sizes = [1, 8, 384], strides = [1, 1, 1]} : vector<8x8x384xf32> to vector<1x8x384xf32>
    %115 = vector.shape_cast %114 : vector<1x8x384xf32> to vector<8x384xf32>
    %116 = vector.extract_strided_slice %115 {offsets = [0, 0], sizes = [8, 128], strides = [1, 1]} : vector<8x384xf32> to vector<8x128xf32>
    %117 = vector.extract_strided_slice %113 {offsets = [0, 0], sizes = [8, 128], strides = [1, 1]} : vector<8x384xf32> to vector<8x128xf32>
    %118 = arith.addf %116, %117 : vector<8x128xf32>
    %119 = arith.negf %118 : vector<8x128xf32>
    %120 = math.exp %119 : vector<8x128xf32>
    %cst_38 = arith.constant 1.000000e+00 : f32
    %121 = vector.broadcast %cst_38 : f32 to vector<8x128xf32>
    %122 = arith.addf %121, %120 : vector<8x128xf32>
    %123 = arith.divf %121, %122 : vector<8x128xf32>
    %124 = vector.extract_strided_slice %115 {offsets = [0, 128], sizes = [8, 128], strides = [1, 1]} : vector<8x384xf32> to vector<8x128xf32>
    %125 = vector.extract_strided_slice %113 {offsets = [0, 128], sizes = [8, 128], strides = [1, 1]} : vector<8x384xf32> to vector<8x128xf32>
    %126 = arith.addf %124, %125 : vector<8x128xf32>
    %127 = arith.negf %126 : vector<8x128xf32>
    %128 = math.exp %127 : vector<8x128xf32>
    %cst_39 = arith.constant 1.000000e+00 : f32
    %129 = vector.broadcast %cst_39 : f32 to vector<8x128xf32>
    %130 = arith.addf %129, %128 : vector<8x128xf32>
    %131 = arith.divf %129, %130 : vector<8x128xf32>
    %132 = vector.extract_strided_slice %115 {offsets = [0, 256], sizes = [8, 128], strides = [1, 1]} : vector<8x384xf32> to vector<8x128xf32>
    %133 = vector.extract_strided_slice %113 {offsets = [0, 256], sizes = [8, 128], strides = [1, 1]} : vector<8x384xf32> to vector<8x128xf32>
    %134 = vector.broadcast %12 : vector<1x128xf32> to vector<8x128xf32>
    %135 = arith.addf %133, %134 : vector<8x128xf32>
    %136 = arith.mulf %123, %135 : vector<8x128xf32>
    %137 = arith.addf %132, %136 : vector<8x128xf32>
    %138 = math.tanh %137 : vector<8x128xf32>
    %cst_40 = arith.constant 1.000000e+00 : f32
    %139 = vector.broadcast %cst_40 : f32 to vector<8x128xf32>
    %140 = arith.subf %139, %131 : vector<8x128xf32>
    %141 = arith.mulf %140, %138 : vector<8x128xf32>
    %142 = arith.mulf %131, %112 : vector<8x128xf32>
    %143 = arith.addf %141, %142 : vector<8x128xf32>
    %c0_41 = arith.constant 0 : index
    %c0_42 = arith.constant 0 : index
    %144 = vector.load %arg9[%c0_41, %c0_42] : memref<8x128xf32, #tpu.memory_space<vmem>>, vector<8x128xf32>
    tpu.vector_store %arg9[%c0_41, %c0_42], %143 {strides = array<i32>} : memref<8x128xf32, #tpu.memory_space<vmem>>, vector<8x128xf32>,
    %c0_43 = arith.constant 0 : index
    %c0_44 = arith.constant 0 : index
    %145 = vector.load %arg9[%c0_43, %c0_44] : memref<8x128xf32, #tpu.memory_space<vmem>>, vector<8x128xf32>
    %cst_45 = arith.constant dense<0.000000e+00> : vector<8x384xf32>
    %146 = tpu.matmul %145, %11, %cst_45 {dimension_numbers = #tpu.dot_dimension_numbers<[1], [0], [0], [1], [0, 0, 1, 1], [], []>} : vector<8x128xf32>, vector<128x384xf32>, vector<8x384xf32> -> vector<8x384xf32>
    %147 = vector.extract_strided_slice %10 {offsets = [4, 0, 0], sizes = [1, 8, 384], strides = [1, 1, 1]} : vector<8x8x384xf32> to vector<1x8x384xf32>
    %148 = vector.shape_cast %147 : vector<1x8x384xf32> to vector<8x384xf32>
    %149 = vector.extract_strided_slice %148 {offsets = [0, 0], sizes = [8, 128], strides = [1, 1]} : vector<8x384xf32> to vector<8x128xf32>
    %150 = vector.extract_strided_slice %146 {offsets = [0, 0], sizes = [8, 128], strides = [1, 1]} : vector<8x384xf32> to vector<8x128xf32>
    %151 = arith.addf %149, %150 : vector<8x128xf32>
    %152 = arith.negf %151 : vector<8x128xf32>
    %153 = math.exp %152 : vector<8x128xf32>
    %cst_46 = arith.constant 1.000000e+00 : f32
    %154 = vector.broadcast %cst_46 : f32 to vector<8x128xf32>
    %155 = arith.addf %154, %153 : vector<8x128xf32>
    %156 = arith.divf %154, %155 : vector<8x128xf32>
    %157 = vector.extract_strided_slice %148 {offsets = [0, 128], sizes = [8, 128], strides = [1, 1]} : vector<8x384xf32> to vector<8x128xf32>
    %158 = vector.extract_strided_slice %146 {offsets = [0, 128], sizes = [8, 128], strides = [1, 1]} : vector<8x384xf32> to vector<8x128xf32>
    %159 = arith.addf %157, %158 : vector<8x128xf32>
    %160 = arith.negf %159 : vector<8x128xf32>
    %161 = math.exp %160 : vector<8x128xf32>
    %cst_47 = arith.constant 1.000000e+00 : f32
    %162 = vector.broadcast %cst_47 : f32 to vector<8x128xf32>
    %163 = arith.addf %162, %161 : vector<8x128xf32>
    %164 = arith.divf %162, %163 : vector<8x128xf32>
    %165 = vector.extract_strided_slice %148 {offsets = [0, 256], sizes = [8, 128], strides = [1, 1]} : vector<8x384xf32> to vector<8x128xf32>
    %166 = vector.extract_strided_slice %146 {offsets = [0, 256], sizes = [8, 128], strides = [1, 1]} : vector<8x384xf32> to vector<8x128xf32>
    %167 = vector.broadcast %12 : vector<1x128xf32> to vector<8x128xf32>
    %168 = arith.addf %166, %167 : vector<8x128xf32>
    %169 = arith.mulf %156, %168 : vector<8x128xf32>
    %170 = arith.addf %165, %169 : vector<8x128xf32>
    %171 = math.tanh %170 : vector<8x128xf32>
    %cst_48 = arith.constant 1.000000e+00 : f32
    %172 = vector.broadcast %cst_48 : f32 to vector<8x128xf32>
    %173 = arith.subf %172, %164 : vector<8x128xf32>
    %174 = arith.mulf %173, %171 : vector<8x128xf32>
    %175 = arith.mulf %164, %145 : vector<8x128xf32>
    %176 = arith.addf %174, %175 : vector<8x128xf32>
    %c0_49 = arith.constant 0 : index
    %c0_50 = arith.constant 0 : index
    %177 = vector.load %arg9[%c0_49, %c0_50] : memref<8x128xf32, #tpu.memory_space<vmem>>, vector<8x128xf32>
    tpu.vector_store %arg9[%c0_49, %c0_50], %176 {strides = array<i32>} : memref<8x128xf32, #tpu.memory_space<vmem>>, vector<8x128xf32>,
    %c0_51 = arith.constant 0 : index
    %c0_52 = arith.constant 0 : index
    %178 = vector.load %arg9[%c0_51, %c0_52] : memref<8x128xf32, #tpu.memory_space<vmem>>, vector<8x128xf32>
    %cst_53 = arith.constant dense<0.000000e+00> : vector<8x384xf32>
    %179 = tpu.matmul %178, %11, %cst_53 {dimension_numbers = #tpu.dot_dimension_numbers<[1], [0], [0], [1], [0, 0, 1, 1], [], []>} : vector<8x128xf32>, vector<128x384xf32>, vector<8x384xf32> -> vector<8x384xf32>
    %180 = vector.extract_strided_slice %10 {offsets = [5, 0, 0], sizes = [1, 8, 384], strides = [1, 1, 1]} : vector<8x8x384xf32> to vector<1x8x384xf32>
    %181 = vector.shape_cast %180 : vector<1x8x384xf32> to vector<8x384xf32>
    %182 = vector.extract_strided_slice %181 {offsets = [0, 0], sizes = [8, 128], strides = [1, 1]} : vector<8x384xf32> to vector<8x128xf32>
    %183 = vector.extract_strided_slice %179 {offsets = [0, 0], sizes = [8, 128], strides = [1, 1]} : vector<8x384xf32> to vector<8x128xf32>
    %184 = arith.addf %182, %183 : vector<8x128xf32>
    %185 = arith.negf %184 : vector<8x128xf32>
    %186 = math.exp %185 : vector<8x128xf32>
    %cst_54 = arith.constant 1.000000e+00 : f32
    %187 = vector.broadcast %cst_54 : f32 to vector<8x128xf32>
    %188 = arith.addf %187, %186 : vector<8x128xf32>
    %189 = arith.divf %187, %188 : vector<8x128xf32>
    %190 = vector.extract_strided_slice %181 {offsets = [0, 128], sizes = [8, 128], strides = [1, 1]} : vector<8x384xf32> to vector<8x128xf32>
    %191 = vector.extract_strided_slice %179 {offsets = [0, 128], sizes = [8, 128], strides = [1, 1]} : vector<8x384xf32> to vector<8x128xf32>
    %192 = arith.addf %190, %191 : vector<8x128xf32>
    %193 = arith.negf %192 : vector<8x128xf32>
    %194 = math.exp %193 : vector<8x128xf32>
    %cst_55 = arith.constant 1.000000e+00 : f32
    %195 = vector.broadcast %cst_55 : f32 to vector<8x128xf32>
    %196 = arith.addf %195, %194 : vector<8x128xf32>
    %197 = arith.divf %195, %196 : vector<8x128xf32>
    %198 = vector.extract_strided_slice %181 {offsets = [0, 256], sizes = [8, 128], strides = [1, 1]} : vector<8x384xf32> to vector<8x128xf32>
    %199 = vector.extract_strided_slice %179 {offsets = [0, 256], sizes = [8, 128], strides = [1, 1]} : vector<8x384xf32> to vector<8x128xf32>
    %200 = vector.broadcast %12 : vector<1x128xf32> to vector<8x128xf32>
    %201 = arith.addf %199, %200 : vector<8x128xf32>
    %202 = arith.mulf %189, %201 : vector<8x128xf32>
    %203 = arith.addf %198, %202 : vector<8x128xf32>
    %204 = math.tanh %203 : vector<8x128xf32>
    %cst_56 = arith.constant 1.000000e+00 : f32
    %205 = vector.broadcast %cst_56 : f32 to vector<8x128xf32>
    %206 = arith.subf %205, %197 : vector<8x128xf32>
    %207 = arith.mulf %206, %204 : vector<8x128xf32>
    %208 = arith.mulf %197, %178 : vector<8x128xf32>
    %209 = arith.addf %207, %208 : vector<8x128xf32>
    %c0_57 = arith.constant 0 : index
    %c0_58 = arith.constant 0 : index
    %210 = vector.load %arg9[%c0_57, %c0_58] : memref<8x128xf32, #tpu.memory_space<vmem>>, vector<8x128xf32>
    tpu.vector_store %arg9[%c0_57, %c0_58], %209 {strides = array<i32>} : memref<8x128xf32, #tpu.memory_space<vmem>>, vector<8x128xf32>,
    %c0_59 = arith.constant 0 : index
    %c0_60 = arith.constant 0 : index
    %211 = vector.load %arg9[%c0_59, %c0_60] : memref<8x128xf32, #tpu.memory_space<vmem>>, vector<8x128xf32>
    %cst_61 = arith.constant dense<0.000000e+00> : vector<8x384xf32>
    %212 = tpu.matmul %211, %11, %cst_61 {dimension_numbers = #tpu.dot_dimension_numbers<[1], [0], [0], [1], [0, 0, 1, 1], [], []>} : vector<8x128xf32>, vector<128x384xf32>, vector<8x384xf32> -> vector<8x384xf32>
    %213 = vector.extract_strided_slice %10 {offsets = [6, 0, 0], sizes = [1, 8, 384], strides = [1, 1, 1]} : vector<8x8x384xf32> to vector<1x8x384xf32>
    %214 = vector.shape_cast %213 : vector<1x8x384xf32> to vector<8x384xf32>
    %215 = vector.extract_strided_slice %214 {offsets = [0, 0], sizes = [8, 128], strides = [1, 1]} : vector<8x384xf32> to vector<8x128xf32>
    %216 = vector.extract_strided_slice %212 {offsets = [0, 0], sizes = [8, 128], strides = [1, 1]} : vector<8x384xf32> to vector<8x128xf32>
    %217 = arith.addf %215, %216 : vector<8x128xf32>
    %218 = arith.negf %217 : vector<8x128xf32>
    %219 = math.exp %218 : vector<8x128xf32>
    %cst_62 = arith.constant 1.000000e+00 : f32
    %220 = vector.broadcast %cst_62 : f32 to vector<8x128xf32>
    %221 = arith.addf %220, %219 : vector<8x128xf32>
    %222 = arith.divf %220, %221 : vector<8x128xf32>
    %223 = vector.extract_strided_slice %214 {offsets = [0, 128], sizes = [8, 128], strides = [1, 1]} : vector<8x384xf32> to vector<8x128xf32>
    %224 = vector.extract_strided_slice %212 {offsets = [0, 128], sizes = [8, 128], strides = [1, 1]} : vector<8x384xf32> to vector<8x128xf32>
    %225 = arith.addf %223, %224 : vector<8x128xf32>
    %226 = arith.negf %225 : vector<8x128xf32>
    %227 = math.exp %226 : vector<8x128xf32>
    %cst_63 = arith.constant 1.000000e+00 : f32
    %228 = vector.broadcast %cst_63 : f32 to vector<8x128xf32>
    %229 = arith.addf %228, %227 : vector<8x128xf32>
    %230 = arith.divf %228, %229 : vector<8x128xf32>
    %231 = vector.extract_strided_slice %214 {offsets = [0, 256], sizes = [8, 128], strides = [1, 1]} : vector<8x384xf32> to vector<8x128xf32>
    %232 = vector.extract_strided_slice %212 {offsets = [0, 256], sizes = [8, 128], strides = [1, 1]} : vector<8x384xf32> to vector<8x128xf32>
    %233 = vector.broadcast %12 : vector<1x128xf32> to vector<8x128xf32>
    %234 = arith.addf %232, %233 : vector<8x128xf32>
    %235 = arith.mulf %222, %234 : vector<8x128xf32>
    %236 = arith.addf %231, %235 : vector<8x128xf32>
    %237 = math.tanh %236 : vector<8x128xf32>
    %cst_64 = arith.constant 1.000000e+00 : f32
    %238 = vector.broadcast %cst_64 : f32 to vector<8x128xf32>
    %239 = arith.subf %238, %230 : vector<8x128xf32>
    %240 = arith.mulf %239, %237 : vector<8x128xf32>
    %241 = arith.mulf %230, %211 : vector<8x128xf32>
    %242 = arith.addf %240, %241 : vector<8x128xf32>
    %c0_65 = arith.constant 0 : index
    %c0_66 = arith.constant 0 : index
    %243 = vector.load %arg9[%c0_65, %c0_66] : memref<8x128xf32, #tpu.memory_space<vmem>>, vector<8x128xf32>
    tpu.vector_store %arg9[%c0_65, %c0_66], %242 {strides = array<i32>} : memref<8x128xf32, #tpu.memory_space<vmem>>, vector<8x128xf32>,
    %c0_67 = arith.constant 0 : index
    %c0_68 = arith.constant 0 : index
    %244 = vector.load %arg9[%c0_67, %c0_68] : memref<8x128xf32, #tpu.memory_space<vmem>>, vector<8x128xf32>
    %cst_69 = arith.constant dense<0.000000e+00> : vector<8x384xf32>
    %245 = tpu.matmul %244, %11, %cst_69 {dimension_numbers = #tpu.dot_dimension_numbers<[1], [0], [0], [1], [0, 0, 1, 1], [], []>} : vector<8x128xf32>, vector<128x384xf32>, vector<8x384xf32> -> vector<8x384xf32>
    %246 = vector.extract_strided_slice %10 {offsets = [7, 0, 0], sizes = [1, 8, 384], strides = [1, 1, 1]} : vector<8x8x384xf32> to vector<1x8x384xf32>
    %247 = vector.shape_cast %246 : vector<1x8x384xf32> to vector<8x384xf32>
    %248 = vector.extract_strided_slice %247 {offsets = [0, 0], sizes = [8, 128], strides = [1, 1]} : vector<8x384xf32> to vector<8x128xf32>
    %249 = vector.extract_strided_slice %245 {offsets = [0, 0], sizes = [8, 128], strides = [1, 1]} : vector<8x384xf32> to vector<8x128xf32>
    %250 = arith.addf %248, %249 : vector<8x128xf32>
    %251 = arith.negf %250 : vector<8x128xf32>
    %252 = math.exp %251 : vector<8x128xf32>
    %cst_70 = arith.constant 1.000000e+00 : f32
    %253 = vector.broadcast %cst_70 : f32 to vector<8x128xf32>
    %254 = arith.addf %253, %252 : vector<8x128xf32>
    %255 = arith.divf %253, %254 : vector<8x128xf32>
    %256 = vector.extract_strided_slice %247 {offsets = [0, 128], sizes = [8, 128], strides = [1, 1]} : vector<8x384xf32> to vector<8x128xf32>
    %257 = vector.extract_strided_slice %245 {offsets = [0, 128], sizes = [8, 128], strides = [1, 1]} : vector<8x384xf32> to vector<8x128xf32>
    %258 = arith.addf %256, %257 : vector<8x128xf32>
    %259 = arith.negf %258 : vector<8x128xf32>
    %260 = math.exp %259 : vector<8x128xf32>
    %cst_71 = arith.constant 1.000000e+00 : f32
    %261 = vector.broadcast %cst_71 : f32 to vector<8x128xf32>
    %262 = arith.addf %261, %260 : vector<8x128xf32>
    %263 = arith.divf %261, %262 : vector<8x128xf32>
    %264 = vector.extract_strided_slice %247 {offsets = [0, 256], sizes = [8, 128], strides = [1, 1]} : vector<8x384xf32> to vector<8x128xf32>
    %265 = vector.extract_strided_slice %245 {offsets = [0, 256], sizes = [8, 128], strides = [1, 1]} : vector<8x384xf32> to vector<8x128xf32>
    %266 = vector.broadcast %12 : vector<1x128xf32> to vector<8x128xf32>
    %267 = arith.addf %265, %266 : vector<8x128xf32>
    %268 = arith.mulf %255, %267 : vector<8x128xf32>
    %269 = arith.addf %264, %268 : vector<8x128xf32>
    %270 = math.tanh %269 : vector<8x128xf32>
    %cst_72 = arith.constant 1.000000e+00 : f32
    %271 = vector.broadcast %cst_72 : f32 to vector<8x128xf32>
    %272 = arith.subf %271, %263 : vector<8x128xf32>
    %273 = arith.mulf %272, %270 : vector<8x128xf32>
    %274 = arith.mulf %263, %244 : vector<8x128xf32>
    %275 = arith.addf %273, %274 : vector<8x128xf32>
    %c0_73 = arith.constant 0 : index
    %c0_74 = arith.constant 0 : index
    %276 = vector.load %arg9[%c0_73, %c0_74] : memref<8x128xf32, #tpu.memory_space<vmem>>, vector<8x128xf32>
    tpu.vector_store %arg9[%c0_73, %c0_74], %275 {strides = array<i32>} : memref<8x128xf32, #tpu.memory_space<vmem>>, vector<8x128xf32>,
    %c0_i32_75 = arith.constant 0 : i32
    %277 = arith.cmpi eq, %arg0, %c0_i32_75 : i32
    %278 = arith.extui %277 : i1 to i32
    %c0_i32_76 = arith.constant 0 : i32
    %279 = arith.cmpi ne, %278, %c0_i32_76 : i32
    scf.if %279 {
      %c0_77 = arith.constant 0 : index
      %c0_78 = arith.constant 0 : index
      %280 = vector.load %arg9[%c0_77, %c0_78] : memref<8x128xf32, #tpu.memory_space<vmem>>, vector<8x128xf32>
      %c0_79 = arith.constant 0 : index
      %c0_80 = arith.constant 0 : index
      %281 = vector.load %arg6[%c0_79, %c0_80] : memref<128x128xf32, #tpu.memory_space<vmem>>, vector<128x128xf32>
      %cst_81 = arith.constant dense<0.000000e+00> : vector<8x128xf32>
      %282 = tpu.matmul %280, %281, %cst_81 {dimension_numbers = #tpu.dot_dimension_numbers<[1], [0], [0], [1], [0, 0, 1, 1], [], []>} : vector<8x128xf32>, vector<128x128xf32>, vector<8x128xf32> -> vector<8x128xf32>
      %c0_82 = arith.constant 0 : index
      %c0_83 = arith.constant 0 : index
      %283 = vector.load %arg7[%c0_82, %c0_83] : memref<1x128xf32, #tpu.memory_space<vmem>>, vector<1x128xf32>
      %284 = vector.broadcast %283 : vector<1x128xf32> to vector<8x128xf32>
      %285 = arith.addf %282, %284 : vector<8x128xf32>
      %c0_84 = arith.constant 0 : index
      %c0_85 = arith.constant 0 : index
      %286 = vector.load %arg8[%c0_84, %c0_85] : memref<8x128xf32, #tpu.memory_space<vmem>>, vector<8x128xf32>
      tpu.vector_store %arg8[%c0_84, %c0_85], %285 {strides = array<i32>} : memref<8x128xf32, #tpu.memory_space<vmem>>, vector<8x128xf32>,
    } else {
    }
    return
  }
  func.func @transform_0(%arg0: i32) -> (i32, i32, i32) {
    %c0_i32 = arith.constant 0 : i32
    %c0_i32_0 = arith.constant 0 : i32
    %c0_i32_1 = arith.constant 0 : i32
    return %arg0, %c0_i32, %c0_i32_0 : i32, i32, i32
  }
  func.func @transform_1(%arg0: i32) -> (i32, i32) {
    %c0_i32 = arith.constant 0 : i32
    %c0_i32_0 = arith.constant 0 : i32
    %c0_i32_1 = arith.constant 0 : i32
    return %c0_i32, %c0_i32_0 : i32, i32
  }
  func.func @transform_2(%arg0: i32) -> (i32, i32) {
    %c0_i32 = arith.constant 0 : i32
    %c0_i32_0 = arith.constant 0 : i32
    %c0_i32_1 = arith.constant 0 : i32
    return %c0_i32, %c0_i32_0 : i32, i32
  }
  func.func @transform_3(%arg0: i32) -> (i32, i32) {
    %c0_i32 = arith.constant 0 : i32
    %c0_i32_0 = arith.constant 0 : i32
    %c0_i32_1 = arith.constant 0 : i32
    return %c0_i32, %c0_i32_0 : i32, i32
  }
  func.func @transform_4(%arg0: i32) -> (i32, i32) {
    %c0_i32 = arith.constant 0 : i32
    %c0_i32_0 = arith.constant 0 : i32
    %c0_i32_1 = arith.constant 0 : i32
    return %c0_i32, %c0_i32_0 : i32, i32
  }
  func.func @transform_5(%arg0: i32) -> (i32, i32) {
    %c0_i32 = arith.constant 0 : i32
    %c0_i32_0 = arith.constant 0 : i32
    %c0_i32_1 = arith.constant 0 : i32
    return %c0_i32, %c0_i32_0 : i32, i32
  }
  func.func @transform_6(%arg0: i32) -> (i32, i32) {
    %c0_i32 = arith.constant 0 : i32
    %c0_i32_0 = arith.constant 0 : i32
    %c0_i32_1 = arith.constant 0 : i32
    return %c0_i32, %c0_i32_0 : i32, i32
  }
  func.func @transform_7(%arg0: i32) -> (i32, i32) {
    %c0_i32 = arith.constant 0 : i32
    %c0_i32_0 = arith.constant 0 : i32
    %c0_i32_1 = arith.constant 0 : i32
    return %c0_i32, %c0_i32_0 : i32, i32
  }
}

</mosaic_0001>

<bundles_post_ra>
// kernel: gru_model_forward.2
= control target key start
LH: loop header
LB: loop body
LE: loop exit
PB: predicated region body
PF: predicated region fallthrough
CT: control target
= control target key end

     0   :  { %10 = vsyncpa [#allocation4], 0  ;;  %s1386_s21 = smov [#allocation3]   ;;  %s1387_s23 = smov 384   ;;  %s2200_s0 = inlined_call_operand.vmem [shape: f32[8,8,4], index: 0, kind: input, shape index: {}]   ;;  %s2201_s1 = inlined_call_operand.vmem [shape: f32[4,384], index: 1, kind: input, shape index: {}]   ;;  %s2202_s2 = inlined_call_operand.vmem [shape: f32[1,384], index: 2, kind: input, shape index: {}]   ;;  %s2203_s3 = inlined_call_operand.hbm [shape: f32[128,384], index: 3, kind: input, shape index: {}]   ;;  %s2204_s4 = inlined_call_operand.vmem [shape: f32[1,128], index: 4, kind: input, shape index: {}]   ;;  %s2205_s5 = inlined_call_operand.vmem [shape: f32[8,8,128], index: 5, kind: output, shape index: {}]  }
   0x1   :  { %s21_s20 = sshll.u32 %s2203_s3, 4  ;;  %s23_s22 = sshll.u32 %s1386_s21, 4  ;;  %s22_s20 = int_to_ptr.hbm [resolvable:$true] %s21_s20  ;;  %s24_s22 = int_to_ptr.vmem [resolvable:$true] %s23_s22 }
   0x2   :  { %s1388_s24 = smov 24  }
   0x3   :  { %29 = dma.hbm_to_vmem [thread:$0]  %s22_s20, 6144, %s24_s22, [#allocation4], %s1387_s23, %s1387_s23, %s1388_s24  }
   0x4   :  { %1384 = dma.done.wait [#allocation4], 6144  }
   0x5   :  { %1385 = vsyncadd [#allocation4], 4294961152  ;;  %v1423_v0 = vld [vmem:[#allocation3 + $0x168] sm:$0xff]  ;;  %v1425_v1 = vld [vmem:[#allocation3 + $0x150] sm:$0xff]  ;;  %vm92_vm0 = vcmask 1043456   ;;  %vm67_vm1 = vcmask 31744  }
   0x6   :  { %272 = vmatpush.msra.mxu3 %v1423_v0  ;;  %v41_v2 = vld [vmem:[%s2201_s1] sm:$0xff]  ;;  %v1434_v4 = vld [vmem:[#allocation3 + $0x120] sm:$0xff]  ;;  %v1437_v5 = vld [vmem:[#allocation3 + $0x108] sm:$0xff]  ;;  %v1389_v38 = vmov 0.0  }
   0x7   :  { %v1431_v3 = vld [vmem:[#allocation3 + $0x138] sm:$0xff]  ;;  %61 = vst [vmem:[#allocation1] ss:$2 sm:$0xff] %v41_v2  ;;  %v1445_v7 = vld [vmem:[#allocation3 + $0xf0] sm:$0xff]  ;;  %v1457_v11 = vld [vmem:[#allocation3 + $0x160] sm:$0xff] }
   0x8   :  { %273 = vmatpush.msra.mxu3 %v1425_v1  ;;  %v1443_v6 = vld [vmem:[%s2200_s0] sm:$0xff]  ;;  %v1459_v12 = vld [vmem:[#allocation3 + $0xc0] sm:$0xff]  ;;  %v1463_v13 = vld [vmem:[#allocation3 + $0x148] sm:$0xff] }
   0x9   :  { %v1448_v9 = vld [vmem:[#allocation3 + $0x178] sm:$0xff]  ;;  %v1468_v14 = vld [vmem:[%s2200_s0 + $0x38] sm:$0xff]  ;;  %v1470_v15 = vld [vmem:[#allocation3 + $0xa8] sm:$0xff] }
   0xa   :  { %274 = vmatpush.msra.mxu3 %v1431_v3  ;;  %v1451_v10 = vld [vmem:[#allocation3 + $0xd8] sm:$0xff]  ;;  %v1476_v16 = vld [vmem:[#allocation3 + $0x130] sm:$0xff]  ;;  %v1481_v17 = vld [vmem:[%s2200_s0 + $0x8] sm:$0xff] }
   0xb   :  { %v1483_v18 = vld [vmem:[#allocation3 + $0x90] sm:$0xff]  ;;  %v1487_v19 = vld [vmem:[#allocation3 + $0x118] sm:$0xff]  ;;  %v1495_v21 = vld [vmem:[#allocation3 + $0x100] sm:$0xff] }
   0xc   :  { %275 = vmatpush.msra.mxu3 %v1434_v4  ;;  %v1489_v20 = vld [vmem:[#allocation3 + $0x78] sm:$0xff]  ;;  %v1497_v22 = vld [vmem:[#allocation3 + $0x60] sm:$0xff]  ;;  %v1501_v23 = vld [vmem:[#allocation3 + $0xe8] sm:$0xff] }
   0xd   :  { %v1503_v25 = vld [vmem:[#allocation3 + $0x48] sm:$0xff]  ;;  %v42_v26 = vld [vmem:[%s2201_s1 + $0x8] sm:$0xf]  ;;  %v1511_v27 = vld [vmem:[#allocation3 + $0xd0] sm:$0xff] }
   0xe   :  { %v64_v8 = vld.sshfl [vmem:[#allocation1] sm:$0xff pattern:$0x75316420]  ;;  %276 = vmatpush.msra.mxu3 %v1437_v5  ;;  %v65_v24 = vld.sshfl [vmem:[#allocation1 + $0x8] sm:$0xff pattern:$0x75316420] }
   0xf   :  { %1174 = vmatpush.msk.msra.mxu0 %vm92_vm0, %v64_v8  ;;  %1224 = vmatpush.msk.msra.mxu2 %vm92_vm0, %v64_v8  ;;  %63 = vst [vmem:[#allocation1 + $0x10] ss:$2 sm:$0xff] %v42_v26  ;;  %v1518_v28 = vld [vmem:[%s2200_s0 + $0x10] sm:$0xff]  ;;  %v1520_v29 = vld [vmem:[#allocation3 + $0x30] sm:$0xff]  ;;  %v1525_v30 = vld [vmem:[#allocation3 + $0xb8] sm:$0xff] }
  0x10   :  { %1175 = vmatmul.msk.f32.vlgmr.msra.gmra.mxu0 %vm67_vm1, %v1443_v6  ;;  %277 = vmatpush.msra.mxu3 %v1445_v7  ;;  %2226 = vst [vmem:[#allocation6_spill] sm:$0xff] %v1520_v29  ;;  %v1529_v31 = vld [vmem:[#allocation3 + $0x18] sm:$0xff]  ;;  %v1536_v32 = vld [vmem:[#allocation3 + $0xa0] sm:$0xff]  ;;  %v1543_v34 = vld [vmem:[#allocation3 + $0x88] sm:$0xff] }
  0x11   :  { %312 = vmatpush.msrb.mxu0 %v1448_v9  ;;  %1182 = vmatmul.msk.f32.vlgmr.msra.gmra.mxu2 %vm67_vm1, %v1468_v14  ;;  %2227 = vst [vmem:[#allocation7_spill] sm:$0xff] %v1529_v31  ;;  %v1538_v33 = vld [vmem:[#allocation3] sm:$0xff]  ;;  %v1545_v35 = vld [vmem:[#allocation3 + $0x170] sm:$0xff]  ;;  %v1559_v40 = vld [vmem:[#allocation3 + $0x158] sm:$0xff] }
  0x12   :  { %278 = vmatpush.msra.mxu3 %v1451_v10  ;;  %1225 = vmatpush.msk.msrb.mxu2 %vm92_vm0, %v65_v24  ;;  %2228 = vst [vmem:[#allocation8_spill] sm:$0xff] %v1538_v33  ;;  %v1550_v37 = vld [vmem:[#allocation3 + $0x70] sm:$0xff]  ;;  %v1563_v41 = vld [vmem:[#allocation3 + $0x58] sm:$0xff]  ;;  %v1567_v42 = vld [vmem:[#allocation3 + $0x140] sm:$0xff] }
  0x13   :  { %313 = vmatpush.msrb.mxu0 %v1457_v11  ;;  %1183 = vmatpush.msk.msra.mxu1 %vm92_vm0, %v65_v24  ;;  %v1557_v39 = vld [vmem:[%s2200_s0 + $0x18] sm:$0xff]  ;;  %v1574_v43 = vld [vmem:[#allocation3 + $0x40] sm:$0xff]  ;;  %v1576_v44 = vld [vmem:[#allocation3 + $0x128] sm:$0xff] }
  0x14   :  { %279 = vmatpush.msra.mxu3 %v1459_v12  ;;  %1184 = vmatmul.msk.f32.vlgmr.msra.gmra.mxu1 %vm67_vm1, %v1443_v6  ;;  %2229 = vst [vmem:[#allocation9_spill] sm:$0xff] %v1574_v43  ;;  %v1581_v45 = vld [vmem:[#allocation3 + $0x28] sm:$0xff]  ;;  %v1585_v46 = vld [vmem:[#allocation3 + $0x110] sm:$0xff]  ;;  %v1596_v48 = vld [vmem:[%s2200_s0 + $0x20] sm:$0xff] }
  0x15   :  { %314 = vmatpush.msrb.mxu0 %v1463_v13  ;;  %386 = vmatpush.msrb.mxu1 %v1423_v0  ;;  %2230 = vst [vmem:[#allocation10_spill] sm:$0xff] %v1581_v45  ;;  %v1590_v47 = vld [vmem:[#allocation3 + $0x10] sm:$0xff]  ;;  %v1598_v49 = vld [vmem:[#allocation3 + $0xf8] sm:$0xff]  ;;  %v1605_v50 = vld [vmem:[#allocation3 + $0xe0] sm:$0xff] }
  0x16   :  { %280 = vmatpush.msra.mxu3 %v1470_v15  ;;  %v66_v36 = vld.sshfl [vmem:[#allocation1 + $0x10] sm:$0xff pattern:$0x75316420]  ;;  %2231 = vst [vmem:[#allocation11_spill] sm:$0xff] %v1590_v47  ;;  %v1619_v52 = vld [vmem:[#allocation3 + $0xb0] sm:$0xff]  ;;  %v48_v53 = vld [vmem:[%s2200_s0 + $0x28] sm:$0xff] }
  0x17   :  { %315 = vmatpush.msrb.mxu0 %v1476_v16  ;;  %387 = vmatpush.msrb.mxu1 %v1425_v1  ;;  %v1612_v51 = vld [vmem:[#allocation3 + $0xc8] sm:$0xff]  ;;  %v1628_v54 = vld [vmem:[#allocation3 + $0x98] sm:$0xff]  ;;  %v1635_v55 = vld [vmem:[#allocation3 + $0x80] sm:$0xff] }
  0x18   :  { %1176 = vmatmul.msk.f32.gmra.mxu0 %vm67_vm1, %v1481_v17  ;;  %281 = vmatpush.msra.mxu3 %v1483_v18  ;;  %v1641_v56 = vld [vmem:[#allocation3 + $0x68] sm:$0xff]  ;;  %v1648_v57 = vld [vmem:[#allocation3 + $0x50] sm:$0xff]  ;;  %v1657_v59 = vld [vmem:[#allocation3 + $0x38] sm:$0xff] }
  0x19   :  { %316 = vmatpush.msrb.mxu0 %v1487_v19  ;;  %1191 = vmatmul.msk.f32.vlgmr.msrb.gmra.mxu2 %vm67_vm1, %v1468_v14  ;;  %2232 = vst [vmem:[#allocation12_spill] sm:$0xff] %v1648_v57  ;;  %v49_v58 = vld [vmem:[%s2200_s0 + $0x30] sm:$0xff]  ;;  %v1664_v60 = vld [vmem:[#allocation3 + $0x20] sm:$0xff]  ;;  %v51_v63 = vld [vmem:[%s2202_s2] sm:$0x7] }
  0x1a   :  { %282 = vmatpush.msra.mxu3 %v1489_v20  ;;  %388 = vmatpush.msrb.mxu1 %v1431_v3  ;;  %2233 = vst [vmem:[#allocation13_spill] sm:$0xff] %v1657_v59  ;;  %v1670_v61 = vld [vmem:[#allocation3 + $0x8] sm:$0xff]  ;;  %v53_v2 = vperm.slane %v51_v63, 0 }
  0x1b   :  { %317 = vmatpush.msrb.mxu0 %v1495_v21  ;;  %1192 = vmatpush.msk.msra.mxu2 %vm92_vm0, %v66_v36  ;;  %2234 = vst [vmem:[#allocation14_spill] sm:$0xff] %v1664_v60 }
  0x1c   :  { %283 = vmatpush.msra.mxu3 %v1497_v22  ;;  %1185 = vmatmul.msk.f32.gmra.mxu1 %vm67_vm1, %v1481_v17  ;;  %2235 = vst [vmem:[#allocation15_spill] sm:$0xff] %v1670_v61 }
  0x1d   :  { %318 = vmatpush.msrb.mxu0 %v1501_v23  ;;  %406 = vmatpush.msrb.mxu2 %v1545_v35 }
  0x1e   :  { %284 = vmatpush.msra.mxu3 %v1503_v25  ;;  %389 = vmatpush.msrb.mxu1 %v1434_v4 }
  0x1f   :  { %319 = vmatpush.msrb.mxu0 %v1511_v27  ;;  %407 = vmatpush.msrb.mxu2 %v1559_v40 }
  0x20   :  { %1177 = vmatmul.msk.f32.gmra.mxu0 %vm67_vm1, %v1518_v28  ;;  %285 = vmatpush.msra.mxu3 %v1520_v29 }
  0x21   :  { %320 = vmatpush.msrb.mxu0 %v1525_v30  ;;  %1193 = vmatmul.msk.f32.vlgmr.msra.gmra.mxu2 %vm67_vm1, %v1443_v6 }
  0x22   :  { %286 = vmatpush.msra.mxu3 %v1529_v31  ;;  %408 = vmatpush.msrb.mxu2 %v1567_v42 }
  0x23   :  { %321 = vmatpush.msrb.mxu0 %v1536_v32  ;;  %390 = vmatpush.msrb.mxu1 %v1437_v5 }
  0x24   :  { %287 = vmatpush.msra.mxu3 %v1538_v33  ;;  %409 = vmatpush.msrb.mxu2 %v1576_v44 }
  0x25   :  { %288 = vmatmul.f32.vlgmr.msra.gmra.mxu3 %v1389_v38  ;;  %322 = vmatpush.msrb.mxu0 %v1543_v34 }
  0x26   :  { %292 = vmatpush.msrb.mxu3 %v1545_v35  ;;  %410 = vmatpush.msrb.mxu2 %v1585_v46 }
  0x27   :  { %323 = vmatpush.msrb.mxu0 %v1550_v37  ;;  %1186 = vmatmul.msk.f32.gmra.mxu1 %vm67_vm1, %v1518_v28 }
  0x28   :  { %1178 = vmatmul.msk.f32.gmra.mxu0 %vm67_vm1, %v1557_v39  ;;  %293 = vmatpush.msrb.mxu3 %v1559_v40 }
  0x29   :  { %324 = vmatpush.msrb.mxu0 %v1563_v41  ;;  %1194 = vmatmul.msk.f32.gmra.mxu2 %vm67_vm1, %v1481_v17 }
  0x2a   :  { %294 = vmatpush.msrb.mxu3 %v1567_v42  ;;  %411 = vmatpush.msrb.mxu2 %v1598_v49 }
  0x2b   :  { %325 = vmatpush.msrb.mxu0 %v1574_v43  ;;  %391 = vmatpush.msrb.mxu1 %v1445_v7 }
  0x2c   :  { %295 = vmatpush.msrb.mxu3 %v1576_v44  ;;  %412 = vmatpush.msrb.mxu2 %v1605_v50 }
  0x2d   :  { %326 = vmatpush.msrb.mxu0 %v1581_v45  ;;  %392 = vmatpush.msrb.mxu1 %v1451_v10 }
  0x2e   :  { %296 = vmatpush.msrb.mxu3 %v1585_v46  ;;  %413 = vmatpush.msrb.mxu2 %v1612_v51 }
  0x2f   :  { %327 = vmatpush.msrb.mxu0 %v1590_v47  ;;  %393 = vmatpush.msrb.mxu1 %v1459_v12 }
  0x30   :  { %1179 = vmatmul.msk.f32.gmra.mxu0 %vm67_vm1, %v1596_v48  ;;  %297 = vmatpush.msrb.mxu3 %v1598_v49 }
  0x31   :  { %498 = vmatpush.msra.mxu0 %v1423_v0  ;;  %1195 = vmatmul.msk.f32.gmra.mxu2 %vm67_vm1, %v1518_v28 }
  0x32   :  { %298 = vmatpush.msrb.mxu3 %v1605_v50  ;;  %414 = vmatpush.msrb.mxu2 %v1619_v52 }
  0x33   :  { %394 = vmatpush.msrb.mxu1 %v1470_v15  ;;  %499 = vmatpush.msra.mxu0 %v1425_v1 }
  0x34   :  { %299 = vmatpush.msrb.mxu3 %v1612_v51  ;;  %415 = vmatpush.msrb.mxu2 %v1628_v54 }
  0x35   :  { %1187 = vmatmul.msk.f32.gmra.mxu1 %vm67_vm1, %v1557_v39  ;;  %500 = vmatpush.msra.mxu0 %v1431_v3 }
  0x36   :  { %300 = vmatpush.msrb.mxu3 %v1619_v52  ;;  %395 = vmatpush.msrb.mxu1 %v1483_v18 }
  0x37   :  { %416 = vmatpush.msrb.mxu2 %v1635_v55  ;;  %501 = vmatpush.msra.mxu0 %v1434_v4 }
  0x38   :  { %1180 = vmatmul.msk.f32.gmra.mxu0 %vm67_vm1, %v48_v53  ;;  %301 = vmatpush.msrb.mxu3 %v1628_v54 }
  0x39   :  { %396 = vmatpush.msrb.mxu1 %v1489_v20  ;;  %417 = vmatpush.msrb.mxu2 %v1641_v56 }
  0x3a   :  { %302 = vmatpush.msrb.mxu3 %v1635_v55  ;;  %1196 = vmatmul.msk.f32.gmra.mxu2 %vm67_vm1, %v1557_v39 }
  0x3b   :  { %397 = vmatpush.msrb.mxu1 %v1497_v22  ;;  %418 = vmatpush.msrb.mxu2 %v1648_v57 }
  0x3c   :  { %303 = vmatpush.msrb.mxu3 %v1641_v56  ;;  %502 = vmatpush.msra.mxu0 %v1437_v5 }
  0x3d   :  { %398 = vmatpush.msrb.mxu1 %v1503_v25  ;;  %419 = vmatpush.msrb.mxu2 %v1657_v59 }
  0x3e   :  { %304 = vmatpush.msrb.mxu3 %v1648_v57  ;;  %1188 = vmatmul.msk.f32.gmra.mxu1 %vm67_vm1, %v1596_v48 }
  0x3f   :  { %399 = vmatpush.msrb.mxu1 %v1520_v29  ;;  %420 = vmatpush.msrb.mxu2 %v1664_v60 }
  0x40   :  { %1181 = vmatmul.msk.f32.gmra.mxu0 %vm67_vm1, %v49_v58  ;;  %305 = vmatpush.msrb.mxu3 %v1657_v59 }
  0x41   :  { %400 = vmatpush.msrb.mxu1 %v1529_v31  ;;  %421 = vmatpush.msrb.mxu2 %v1670_v61 }
  0x42   :  { %306 = vmatpush.msrb.mxu3 %v1664_v60  ;;  %1197 = vmatmul.msk.f32.gmra.mxu2 %vm67_vm1, %v1596_v48 }
  0x43   :  { %401 = vmatpush.msrb.mxu1 %v1538_v33  ;;  %538 = vmatpush.msra.mxu2 %v1448_v9 }
  0x44   :  { %307 = vmatpush.msrb.mxu3 %v1670_v61  ;;  %503 = vmatpush.msra.mxu0 %v1445_v7 }
  0x45   :  { %308 = vmatmul.f32.vlgmr.msrb.gmra.mxu3 %v1389_v38  ;;  %518 = vmatpush.msra.mxu1 %v1545_v35 }
  0x46   :  { %426 = vmatpush.msra.mxu3 %v1448_v9  ;;  %1189 = vmatmul.msk.f32.gmra.mxu1 %vm67_vm1, %v48_v53 }
  0x47   :  { %519 = vmatpush.msra.mxu1 %v1559_v40  ;;  %539 = vmatpush.msra.mxu2 %v1457_v11 }
  0x48   :  { %328 = vmatmul.f32.vlgmr.msrb.gmra.mxu0 %v1389_v38  ;;  %427 = vmatpush.msra.mxu3 %v1457_v11 }
  0x49   :  { %520 = vmatpush.msra.mxu1 %v1567_v42  ;;  %540 = vmatpush.msra.mxu2 %v1463_v13 }
  0x4a   :  { %428 = vmatpush.msra.mxu3 %v1463_v13  ;;  %1198 = vmatmul.msk.f32.gmra.mxu2 %vm67_vm1, %v48_v53 }
  0x4b   :  { %521 = vmatpush.msra.mxu1 %v1576_v44  ;;  %541 = vmatpush.msra.mxu2 %v1476_v16 }
  0x4c   :  { %429 = vmatpush.msra.mxu3 %v1476_v16  ;;  %504 = vmatpush.msra.mxu0 %v1451_v10 }
  0x4d   :  { %522 = vmatpush.msra.mxu1 %v1585_v46  ;;  %542 = vmatpush.msra.mxu2 %v1487_v19 }
  0x4e   :  { %430 = vmatpush.msra.mxu3 %v1487_v19  ;;  %1190 = vmatmul.msk.f32.gmra.mxu1 %vm67_vm1, %v49_v58 }
  0x4f   :  { %523 = vmatpush.msra.mxu1 %v1598_v49  ;;  %543 = vmatpush.msra.mxu2 %v1495_v21 }
  0x50   :  { %431 = vmatpush.msra.mxu3 %v1495_v21  ;;  %505 = vmatpush.msra.mxu0 %v1459_v12 }
  0x51   :  { %524 = vmatpush.msra.mxu1 %v1605_v50  ;;  %544 = vmatpush.msra.mxu2 %v1501_v23 }
  0x52   :  { %432 = vmatpush.msra.mxu3 %v1501_v23  ;;  %1199 = vmatmul.msk.f32.gmra.mxu2 %vm67_vm1, %v49_v58 }
  0x53   :  { %525 = vmatpush.msra.mxu1 %v1612_v51  ;;  %545 = vmatpush.msra.mxu2 %v1511_v27 }
  0x54   :  { %433 = vmatpush.msra.mxu3 %v1511_v27  ;;  %506 = vmatpush.msra.mxu0 %v1470_v15 }
  0x55   :  { %526 = vmatpush.msra.mxu1 %v1619_v52  ;;  %546 = vmatpush.msra.mxu2 %v1525_v30 }
  0x56   :  { %434 = vmatpush.msra.mxu3 %v1525_v30  ;;  %507 = vmatpush.msra.mxu0 %v1483_v18 }
  0x57   :  { %527 = vmatpush.msra.mxu1 %v1628_v54  ;;  %547 = vmatpush.msra.mxu2 %v1536_v32 }
  0x58   :  { %435 = vmatpush.msra.mxu3 %v1536_v32  ;;  %508 = vmatpush.msra.mxu0 %v1489_v20 }
  0x59   :  { %528 = vmatpush.msra.mxu1 %v1635_v55  ;;  %548 = vmatpush.msra.mxu2 %v1543_v34 }
  0x5a   :  { %436 = vmatpush.msra.mxu3 %v1543_v34  ;;  %1200 = vmatmul.msk.f32.gmra.mxu2 %vm67_vm1, %v1468_v14 }
  0x5b   :  { %509 = vmatpush.msra.mxu0 %v1497_v22  ;;  %529 = vmatpush.msra.mxu1 %v1641_v56 }
  0x5c   :  { %437 = vmatpush.msra.mxu3 %v1550_v37  ;;  %549 = vmatpush.msra.mxu2 %v1550_v37 }
  0x5d   :  { %510 = vmatpush.msra.mxu0 %v1503_v25  ;;  %530 = vmatpush.msra.mxu1 %v1648_v57 }
  0x5e   :  { %438 = vmatpush.msra.mxu3 %v1563_v41  ;;  %550 = vmatpush.msra.mxu2 %v1563_v41 }
  0x5f   :  { %511 = vmatpush.msra.mxu0 %v1520_v29  ;;  %531 = vmatpush.msra.mxu1 %v1657_v59 }
  0x60   :  { %439 = vmatpush.msra.mxu3 %v1574_v43  ;;  %551 = vmatpush.msra.mxu2 %v1574_v43 }
  0x61   :  { %512 = vmatpush.msra.mxu0 %v1529_v31  ;;  %532 = vmatpush.msra.mxu1 %v1664_v60 }
  0x62   :  { %440 = vmatpush.msra.mxu3 %v1581_v45  ;;  %552 = vmatpush.msra.mxu2 %v1581_v45 }
  0x63   :  { %513 = vmatpush.msra.mxu0 %v1538_v33  ;;  %533 = vmatpush.msra.mxu1 %v1670_v61 }
  0x64   :  { %441 = vmatpush.msra.mxu3 %v1590_v47  ;;  %553 = vmatpush.msra.mxu2 %v1590_v47 }
  0x65   :  { %630 = vmatpush.msrb.mxu0 %v1545_v35 }
  0x66   :  { %610 = vmatpush.msrb.mxu3 %v1423_v0 }
  0x67   :  { %631 = vmatpush.msrb.mxu0 %v1559_v40 }
  0x68   :  { %611 = vmatpush.msrb.mxu3 %v1425_v1 }
  0x69   :  { %632 = vmatpush.msrb.mxu0 %v1567_v42 }
  0x6a   :  { %612 = vmatpush.msrb.mxu3 %v1431_v3 }
  0x6b   :  { %633 = vmatpush.msrb.mxu0 %v1576_v44 }
  0x6c   :  { %613 = vmatpush.msrb.mxu3 %v1434_v4 }
  0x6d   :  { %634 = vmatpush.msrb.mxu0 %v1585_v46 }
  0x6e   :  { %614 = vmatpush.msrb.mxu3 %v1437_v5 }
  0x6f   :  { %635 = vmatpush.msrb.mxu0 %v1598_v49 }
  0x70   :  { %615 = vmatpush.msrb.mxu3 %v1445_v7 }
  0x71   :  { %636 = vmatpush.msrb.mxu0 %v1605_v50 }
  0x72   :  { %616 = vmatpush.msrb.mxu3 %v1451_v10 }
  0x73   :  { %637 = vmatpush.msrb.mxu0 %v1612_v51 }
  0x74   :  { %617 = vmatpush.msrb.mxu3 %v1459_v12 }
  0x75   :  { %638 = vmatpush.msrb.mxu0 %v1619_v52 }
  0x76   :  { %618 = vmatpush.msrb.mxu3 %v1470_v15 }
  0x77   :  { %639 = vmatpush.msrb.mxu0 %v1628_v54 }
  0x78   :  { %619 = vmatpush.msrb.mxu3 %v1483_v18 }
  0x79   :  { %640 = vmatpush.msrb.mxu0 %v1635_v55 }
  0x7a   :  { %620 = vmatpush.msrb.mxu3 %v1489_v20 }
  0x7b   :  { %641 = vmatpush.msrb.mxu0 %v1641_v56 }
  0x7c   :  { %621 = vmatpush.msrb.mxu3 %v1497_v22 }
  0x7d   :  { %642 = vmatpush.msrb.mxu0 %v1648_v57 }
  0x7e   :  { %622 = vmatpush.msrb.mxu3 %v1503_v25 }
  0x7f   :  { %643 = vmatpush.msrb.mxu0 %v1657_v59 }
  0x80   :  { %623 = vmatpush.msrb.mxu3 %v1520_v29 }
  0x81   :  { %644 = vmatpush.msrb.mxu0 %v1664_v60 }
  0x82   :  { %624 = vmatpush.msrb.mxu3 %v1529_v31 }
  0x83   :  { %645 = vmatpush.msrb.mxu0 %v1670_v61 }
  0x84   :  { %625 = vmatpush.msrb.mxu3 %v1538_v33 }
  0x8d   :  { %v116_v62 = vpop.f32.mrf.mxu0 }
  0x8e   :  { %v117_v38 = vadd.f32 %v116_v62, %v53_v2 }
  0x91   :  { %v157_v62 = vpop.f32.mrf.mxu1 }
  0x94   :  { %v137_v14 = vpop.f32.mrf.mxu2 }
  0x95   :  { %v119_v6 = vpop.f32.mrf.mxu0  ;;  %v1792_v17 = vadd.f32 %v137_v14, %v53_v2 }
  0x96   :  { %v1790_v8 = vadd.f32 %v119_v6, %v53_v2 }
  0x97   :  { %2237 = vst [vmem:[#allocation17_spill] sm:$0xff] %v1792_v17 }
  0x98   :  { %2236 = vst [vmem:[#allocation16_spill] sm:$0xff] %v1790_v8 }
  0x9c   :  { %v1807_v47 = vpop.f32.mrf.mxu2 }
  0x9d   :  { %v122_v24 = vpop.f32.mrf.mxu0  ;;  %2244 = vst [vmem:[#allocation24_spill] sm:$0xff] %v1807_v47 }
  0x9e   :  { %v1794_v26 = vadd.f32 %v122_v24, %v53_v2 }
  0xa0   :  { %2238 = vst [vmem:[#allocation18_spill] sm:$0xff] %v1794_v26 }
  0xa5   :  { %v125_v28 = vpop.f32.mrf.mxu0 }
  0xa6   :  { %v1796_v36 = vadd.f32 %v125_v28, %v53_v2  ;;  %v1804_v28 = vperm.slane %v51_v63, 1 }
  0xa8   :  { %2239 = vst [vmem:[#allocation19_spill] sm:$0xff] %v1796_v36  ;;  %v289_v39 = vpop.f32.mrf.mxu3 }
  0xa9   :  { %v332_v48 = vadd.f32 %v289_v39, %v117_v38  ;;  %2243 = vst [vmem:[#allocation23_spill] sm:$0xff] %v1804_v28  ;;  %v158_v38 = vadd.f32 %v157_v62, %v1804_v28 }
  0xab   :  { %v1201_v53 = vmul.f32 -1.442695, %v332_v48 }
  0xad   :  { %v128_v58 = vpop.f32.mrf.mxu0  ;;  %1231 = vpow2.f32 %v1201_v53 }
  0xae   :  { %v1798_v61 = vadd.f32 %v128_v58, %v53_v2 }
  0xb0   :  { %2240 = vst [vmem:[#allocation20_spill] sm:$0xff] %v1798_v61 }
  0xb3   :  { %v1232_v33 = vpop.eup %1231 }
  0xb4   :  { %v336_v14 = vadd.f32 1.0, %v1232_v33 }
  0xb5   :  { %v131_v6 = vpop.f32.mrf.mxu0 }
  0xb6   :  { %v1800_v8 = vadd.f32 %v131_v6, %v53_v2  ;;  %1233 = vrcp.f32 %v336_v14  ;;  %v348_v6 = vand.u32 2147483648, %v336_v14  ;;  %vm342_vm3 = vweird.f32 %v336_v14 }
  0xb8   :  { %2241 = vst [vmem:[#allocation21_spill] sm:$0xff] %v1800_v8 }
  0xbc   :  { %v1234_v26 = vpop.eup %1233 }
  0xbd   :  { %v134_v17 = vpop.f32.mrf.mxu0  ;;  %v338_v36 = vmul.f32 %v1234_v26, %v336_v14  ;;  %vm343_vm2 = vweird.f32 %v1234_v26 }
  0xbe   :  { %v1802_v24 = vadd.f32 %v134_v17, %v53_v2  ;;  %v346_v2 = vand.u32 2147483647, %v336_v14  ;;  %v1812_v17 = vld [vmem:[%s2204_s4] ss:$0 sm:$0xff]  ;;  %vm344_vm4 = vmor %vm342_vm3, %vm343_vm2 }
  0xbf   :  { %v339_v39 = vsub.f32 1.0, %v338_v36 }
  0xc0   :  { %2242 = vst [vmem:[#allocation22_spill] sm:$0xff] %v1802_v24  ;;  %vm347_vm5 = vcmp.eq.f32.partialorder %v346_v2, 8.507059e+37 }
  0xc1   :  { %v340_v61 = vmul.f32 %v1234_v26, %v339_v39 }
  0xc3   :  { %v341_v33 = vadd.f32 %v1234_v26, %v340_v61 }
  0xc5   :  { %v329_v62 = vpop.f32.mrf.mxu0  ;;  %v345_v36 = vsel %vm344_vm4, %v1234_v26, %v341_v33 }
  0xc6   :  { %v375_v39 = vadd.f32 %v1812_v17, %v329_v62 }
  0xc8   :  { %v309_v48 = vpop.f32.mrf.mxu3 }
  0xc9   :  { %v352_v53 = vadd.f32 %v309_v48, %v158_v38  ;;  %v349_v48 = vor.u32 1.1754944e-38, %v348_v6 }
  0xcb   :  { %v1202_v58 = vmul.f32 -1.442695, %v352_v53  ;;  %v1815_v53 = vperm.slane %v51_v63, 2  ;;  %v350_v61 = vsel %vm347_vm5, %v349_v48, %v345_v36 }
  0xcc   :  { %v376_v14 = vmul.f32 %v375_v39, %v350_v61  ;;  %v160_v61 = vpop.f32.mrf.mxu1 }
  0xcd   :  { %1235 = vpow2.f32 %v1202_v58  ;;  %v198_v58 = vpop.f32.mrf.mxu2 }
  0xce   :  { %v199_v47 = vadd.f32 %v198_v58, %v1815_v53 }
  0xd0   :  { %v377_v60 = vadd.f32 %v376_v14, %v199_v47  ;;  %v2247_v47 = vld [vmem:[#allocation7_spill] sm:$0xff] }
  0xd3   :  { %v1236_v24 = vpop.eup %1235 }
  0xd4   :  { %v356_v38 = vadd.f32 1.0, %v1236_v24  ;;  %v1877_v14 = vpop.f32.mrf.mxu1 }
  0xd5   :  { %2253 = vst [vmem:[#allocation26_spill] sm:$0xff] %v1877_v14  ;;  %v2263_v14 = vld [vmem:[#allocation16_spill] sm:$0xff] }
  0xd6   :  { %1237 = vrcp.f32 %v356_v38  ;;  %v368_v45 = vand.u32 2147483648, %v356_v38  ;;  %v366_v26 = vand.u32 2147483647, %v356_v38  ;;  %vm362_vm7 = vweird.f32 %v356_v38 }
  0xd7   :  { %1239 = vtanh.f32 %v377_v60  ;;  %v2249_v60 = vld [vmem:[#allocation11_spill] sm:$0xff] }
  0xd8   :  { %v369_v63 = vor.u32 1.1754944e-38, %v368_v45  ;;  %vm367_vm9 = vcmp.eq.f32.partialorder %v366_v26, 8.507059e+37  ;;  %v2246_v45 = vld [vmem:[#allocation10_spill] sm:$0xff] }
  0xdc   :  { %v1238_v8 = vpop.eup %1237 }
  0xdd   :  { %v358_v28 = vmul.f32 %v1238_v8, %v356_v38  ;;  %vm363_vm6 = vweird.f32 %v1238_v8  ;;  %v1240_v62 = vpop.eup %1239  ;;  %v201_v38 = vpop.f32.mrf.mxu2 }
  0xde   :  { %vm364_vm8 = vmor %vm362_vm7, %vm363_vm6 }
  0xdf   :  { %v359_v31 = vsub.f32 1.0, %v358_v28  ;;  %v2251_v28 = vld [vmem:[#allocation15_spill] sm:$0xff] }
  0xe1   :  { %v360_v59 = vmul.f32 %v1238_v8, %v359_v31  ;;  %v2245_v31 = vld [vmem:[#allocation13_spill] sm:$0xff] }
  0xe3   :  { %v361_v24 = vadd.f32 %v1238_v8, %v360_v59  ;;  %v2248_v59 = vld [vmem:[#allocation14_spill] sm:$0xff] }
  0xe5   :  { %v365_v33 = vsel %vm364_vm8, %v1238_v8, %v361_v24  ;;  %v2250_v8 = vld [vmem:[#allocation8_spill] sm:$0xff]  ;;  %v1875_v58 = vpop.f32.mrf.mxu2  ;;  %v1881_v24 = vpop.f32.mrf.mxu1 }
  0xe6   :  { %v370_v6 = vsel %vm367_vm9, %v369_v63, %v365_v33  ;;  %2252 = vst [vmem:[#allocation25_spill] sm:$0xff] %v1875_v58 }
  0xe7   :  { %v379_v2 = vsub.f32 1.0, %v370_v6  ;;  %v381_v48 = vmul.f32 0.0, %v370_v6  ;;  %2255 = vst [vmem:[#allocation28_spill] sm:$0xff] %v1881_v24 }
  0xe9   :  { %v380_v36 = vmul.f32 %v1240_v62, %v379_v2 }
  0xeb   :  { %v1818_v39 = vadd.f32 %v381_v48, %v380_v36 }
  0xed   :  { %384 = vst [vmem:[%s2205_s5] sm:$0xff] %v1818_v39  ;;  %402 = vmatmul.f32.vlgmr.msrb.gmra.mxu1 %v1818_v39  ;;  %422 = vmatmul.f32.vlgmr.msrb.gmra.mxu2 %v1818_v39  ;;  %v1879_v26 = vpop.f32.mrf.mxu2  ;;  %v1885_v33 = vpop.f32.mrf.mxu1 }
  0xee   :  { %442 = vmatmul.f32.vlgmr.msra.gmra.mxu3 %v1818_v39  ;;  %650 = vmatpush.msrb.mxu1 %v1448_v9  ;;  %2254 = vst [vmem:[#allocation27_spill] sm:$0xff] %v1879_v26 }
  0xef   :  { %722 = vmatpush.msrb.mxu2 %v1423_v0  ;;  %742 = vmatpush.msra.mxu3 %v1545_v35  ;;  %2257 = vst [vmem:[#allocation30_spill] sm:$0xff] %v1885_v33 }
  0xf0   :  { %651 = vmatpush.msrb.mxu1 %v1457_v11 }
  0xf1   :  { %723 = vmatpush.msrb.mxu2 %v1425_v1  ;;  %743 = vmatpush.msra.mxu3 %v1559_v40 }
  0xf2   :  { %652 = vmatpush.msrb.mxu1 %v1463_v13 }
  0xf3   :  { %724 = vmatpush.msrb.mxu2 %v1431_v3  ;;  %744 = vmatpush.msra.mxu3 %v1567_v42 }
  0xf4   :  { %653 = vmatpush.msrb.mxu1 %v1476_v16 }
  0xf5   :  { %725 = vmatpush.msrb.mxu2 %v1434_v4  ;;  %745 = vmatpush.msra.mxu3 %v1576_v44  ;;  %v1883_v63 = vpop.f32.mrf.mxu2  ;;  %v1889_v2 = vpop.f32.mrf.mxu1 }
  0xf6   :  { %654 = vmatpush.msrb.mxu1 %v1487_v19  ;;  %2256 = vst [vmem:[#allocation29_spill] sm:$0xff] %v1883_v63 }
  0xf7   :  { %726 = vmatpush.msrb.mxu2 %v1437_v5  ;;  %746 = vmatpush.msra.mxu3 %v1585_v46  ;;  %2259 = vst [vmem:[#allocation32_spill] sm:$0xff] %v1889_v2 }
  0xf8   :  { %655 = vmatpush.msrb.mxu1 %v1495_v21 }
  0xf9   :  { %727 = vmatpush.msrb.mxu2 %v1445_v7  ;;  %747 = vmatpush.msra.mxu3 %v1598_v49 }
  0xfa   :  { %656 = vmatpush.msrb.mxu1 %v1501_v23 }
  0xfb   :  { %728 = vmatpush.msrb.mxu2 %v1451_v10  ;;  %748 = vmatpush.msra.mxu3 %v1605_v50 }
  0xfc   :  { %657 = vmatpush.msrb.mxu1 %v1511_v27 }
  0xfd   :  { %729 = vmatpush.msrb.mxu2 %v1459_v12  ;;  %749 = vmatpush.msra.mxu3 %v1612_v51  ;;  %v1887_v6 = vpop.f32.mrf.mxu2  ;;  %v1893_v36 = vpop.f32.mrf.mxu1 }
  0xfe   :  { %658 = vmatpush.msrb.mxu1 %v1525_v30  ;;  %2258 = vst [vmem:[#allocation31_spill] sm:$0xff] %v1887_v6 }
  0xff   :  { %730 = vmatpush.msrb.mxu2 %v1470_v15  ;;  %750 = vmatpush.msra.mxu3 %v1619_v52  ;;  %2261 = vst [vmem:[#allocation34_spill] sm:$0xff] %v1893_v36 }
 0x100   :  { %659 = vmatpush.msrb.mxu1 %v1536_v32 }
 0x101   :  { %731 = vmatpush.msrb.mxu2 %v1483_v18  ;;  %751 = vmatpush.msra.mxu3 %v1628_v54 }
 0x102   :  { %660 = vmatpush.msrb.mxu1 %v1543_v34 }
 0x103   :  { %732 = vmatpush.msrb.mxu2 %v1489_v20  ;;  %752 = vmatpush.msra.mxu3 %v1635_v55 }
 0x104   :  { %661 = vmatpush.msrb.mxu1 %v1550_v37 }
 0x105   :  { %733 = vmatpush.msrb.mxu2 %v1497_v22  ;;  %753 = vmatpush.msra.mxu3 %v1641_v56  ;;  %v1891_v62 = vpop.f32.mrf.mxu2 }
 0x106   :  { %662 = vmatpush.msrb.mxu1 %v1563_v41  ;;  %2260 = vst [vmem:[#allocation33_spill] sm:$0xff] %v1891_v62 }
 0x107   :  { %734 = vmatpush.msrb.mxu2 %v1503_v25  ;;  %754 = vmatpush.msra.mxu3 %v1648_v57 }
 0x108   :  { %663 = vmatpush.msrb.mxu1 %v1574_v43 }
 0x109   :  { %735 = vmatpush.msrb.mxu2 %v1520_v29  ;;  %755 = vmatpush.msra.mxu3 %v2245_v31 }
 0x10a   :  { %664 = vmatpush.msrb.mxu1 %v2246_v45 }
 0x10b   :  { %736 = vmatpush.msrb.mxu2 %v2247_v47  ;;  %756 = vmatpush.msra.mxu3 %v2248_v59 }
 0x10c   :  { %665 = vmatpush.msrb.mxu1 %v2249_v60 }
 0x10d   :  { %737 = vmatpush.msrb.mxu2 %v2250_v8  ;;  %757 = vmatpush.msra.mxu3 %v2251_v28  ;;  %v1895_v48 = vpop.f32.mrf.mxu2  ;;  %v2264_v8 = vld [vmem:[#allocation23_spill] sm:$0xff] }
 0x10e   :  { %2262 = vst [vmem:[#allocation35_spill] sm:$0xff] %v1895_v48  ;;  %v161_v24 = vadd.f32 %v160_v61, %v2264_v8 }
 0x16a   :  { %v403_v58 = vpop.f32.mrf.mxu1 }
 0x16b   :  { %v446_v28 = vadd.f32 %v403_v58, %v2263_v14 }
 0x16d   :  { %v1203_v26 = vmul.f32 -1.442695, %v446_v28 }
 0x16f   :  { %1241 = vpow2.f32 %v1203_v26 }
 0x170   :  { %v423_v63 = vpop.f32.mrf.mxu2 }
 0x171   :  { %v466_v60 = vadd.f32 %v423_v63, %v161_v24  ;;  %v443_v61 = vpop.f32.mrf.mxu3 }
 0x172   :  { %v486_v63 = vadd.f32 %v1812_v17, %v443_v61 }
 0x173   :  { %v1204_v33 = vmul.f32 -1.442695, %v466_v60 }
 0x175   :  { %v1242_v59 = vpop.eup %1241  ;;  %1243 = vpow2.f32 %v1204_v33  ;;  %v202_v33 = vadd.f32 %v201_v38, %v1815_v53 }
 0x176   :  { %v450_v6 = vadd.f32 1.0, %v1242_v59 }
 0x178   :  { %1245 = vrcp.f32 %v450_v6  ;;  %v462_v45 = vand.u32 2147483648, %v450_v6  ;;  %v460_v28 = vand.u32 2147483647, %v450_v6  ;;  %vm456_vm11 = vweird.f32 %v450_v6 }
 0x17a   :  { %v463_v60 = vor.u32 1.1754944e-38, %v462_v45  ;;  %vm461_vm13 = vcmp.eq.f32.partialorder %v460_v28, 8.507059e+37 }
 0x17b   :  { %v1244_v2 = vpop.eup %1243 }
 0x17c   :  { %v470_v62 = vadd.f32 1.0, %v1244_v2 }
 0x17e   :  { %v1246_v47 = vpop.eup %1245  ;;  %1247 = vrcp.f32 %v470_v62  ;;  %v480_v29 = vand.u32 2147483647, %v470_v62  ;;  %vm476_vm15 = vweird.f32 %v470_v62 }
 0x17f   :  { %v452_v36 = vmul.f32 %v1246_v47, %v450_v6  ;;  %vm457_vm10 = vweird.f32 %v1246_v47 }
 0x180   :  { %vm458_vm12 = vmor %vm456_vm11, %vm457_vm10  ;;  %vm481_vm1 = vcmp.eq.f32.partialorder %v480_v29, 8.507059e+37 }
 0x181   :  { %v453_v48 = vsub.f32 1.0, %v452_v36 }
 0x183   :  { %v454_v31 = vmul.f32 %v1246_v47, %v453_v48  ;;  %v482_v48 = vand.u32 2147483648, %v470_v62 }
 0x184   :  { %v1248_v58 = vpop.eup %1247 }
 0x185   :  { %v472_v14 = vmul.f32 %v1248_v58, %v470_v62  ;;  %v455_v26 = vadd.f32 %v1246_v47, %v454_v31  ;;  %vm477_vm14 = vweird.f32 %v1248_v58  ;;  %v483_v31 = vor.u32 1.1754944e-38, %v482_v48  ;;  %v2278_v48 = vld [vmem:[#allocation25_spill] sm:$0xff] }
 0x186   :  { %vm478_vm0 = vmor %vm476_vm15, %vm477_vm14 }
 0x187   :  { %v473_v24 = vsub.f32 1.0, %v472_v14  ;;  %v459_v59 = vsel %vm458_vm12, %v1246_v47, %v455_v26 }
 0x188   :  { %v464_v2 = vsel %vm461_vm13, %v463_v60, %v459_v59 }
 0x189   :  { %v474_v36 = vmul.f32 %v1248_v58, %v473_v24  ;;  %v487_v8 = vmul.f32 %v486_v63, %v464_v2 }
 0x18b   :  { %v475_v43 = vadd.f32 %v1248_v58, %v474_v36  ;;  %v488_v57 = vadd.f32 %v487_v8, %v202_v33 }
 0x18d   :  { %v479_v6 = vsel %vm478_vm0, %v1248_v58, %v475_v43  ;;  %1249 = vtanh.f32 %v488_v57 }
 0x18e   :  { %v484_v45 = vsel %vm481_vm1, %v483_v31, %v479_v6  ;;  %v205_v31 = vadd.f32 %v2278_v48, %v1815_v53 }
 0x18f   :  { %v490_v47 = vsub.f32 1.0, %v484_v45  ;;  %v492_v38 = vmul.f32 %v484_v45, %v1818_v39 }
 0x193   :  { %v1250_v28 = vpop.eup %1249 }
 0x194   :  { %v491_v61 = vmul.f32 %v1250_v28, %v490_v47 }
 0x196   :  { %v1902_v14 = vadd.f32 %v492_v38, %v491_v61 }
 0x198   :  { %1205 = vst [vmem:[%s2205_s5 + $0x8] sm:$0xff] %v1902_v14  ;;  %514 = vmatmul.f32.vlgmr.msra.gmra.mxu0 %v1902_v14  ;;  %534 = vmatmul.f32.vlgmr.msra.gmra.mxu1 %v1902_v14 }
 0x199   :  { %554 = vmatmul.f32.vlgmr.msra.gmra.mxu2 %v1902_v14  ;;  %762 = vmatpush.msra.mxu0 %v1448_v9  ;;  %v2271_v9 = vld [vmem:[#allocation14_spill] sm:$0xff] }
 0x19a   :  { %834 = vmatpush.msra.mxu1 %v1423_v0  ;;  %854 = vmatpush.msra.mxu2 %v1545_v35  ;;  %v2265_v0 = vld [vmem:[#allocation12_spill] sm:$0xff] }
 0x19b   :  { %763 = vmatpush.msra.mxu0 %v1457_v11  ;;  %v2273_v11 = vld [vmem:[#allocation8_spill] sm:$0xff] }
 0x19c   :  { %835 = vmatpush.msra.mxu1 %v1425_v1  ;;  %855 = vmatpush.msra.mxu2 %v1559_v40  ;;  %v2266_v1 = vld [vmem:[#allocation9_spill] sm:$0xff] }
 0x19d   :  { %764 = vmatpush.msra.mxu0 %v1463_v13  ;;  %v2275_v13 = vld [vmem:[#allocation23_spill] sm:$0xff] }
 0x19e   :  { %836 = vmatpush.msra.mxu1 %v1431_v3  ;;  %856 = vmatpush.msra.mxu2 %v1567_v42  ;;  %v2267_v3 = vld [vmem:[#allocation6_spill] sm:$0xff] }
 0x19f   :  { %765 = vmatpush.msra.mxu0 %v1476_v16 }
 0x1a0   :  { %837 = vmatpush.msra.mxu1 %v1434_v4  ;;  %857 = vmatpush.msra.mxu2 %v1576_v44  ;;  %v2268_v4 = vld [vmem:[#allocation13_spill] sm:$0xff] }
 0x1a1   :  { %766 = vmatpush.msra.mxu0 %v1487_v19 }
 0x1a2   :  { %838 = vmatpush.msra.mxu1 %v1437_v5  ;;  %858 = vmatpush.msra.mxu2 %v1585_v46  ;;  %v2269_v5 = vld [vmem:[#allocation10_spill] sm:$0xff] }
 0x1a3   :  { %767 = vmatpush.msra.mxu0 %v1495_v21 }
 0x1a4   :  { %839 = vmatpush.msra.mxu1 %v1445_v7  ;;  %859 = vmatpush.msra.mxu2 %v1598_v49  ;;  %v2270_v7 = vld [vmem:[#allocation7_spill] sm:$0xff] }
 0x1a5   :  { %768 = vmatpush.msra.mxu0 %v1501_v23 }
 0x1a6   :  { %840 = vmatpush.msra.mxu1 %v1451_v10  ;;  %860 = vmatpush.msra.mxu2 %v1605_v50  ;;  %v2272_v10 = vld [vmem:[#allocation11_spill] sm:$0xff] }
 0x1a7   :  { %769 = vmatpush.msra.mxu0 %v1511_v27 }
 0x1a8   :  { %841 = vmatpush.msra.mxu1 %v1459_v12  ;;  %861 = vmatpush.msra.mxu2 %v1612_v51  ;;  %v2274_v12 = vld [vmem:[#allocation15_spill] sm:$0xff] }
 0x1a9   :  { %770 = vmatpush.msra.mxu0 %v1525_v30 }
 0x1aa   :  { %842 = vmatpush.msra.mxu1 %v1470_v15  ;;  %862 = vmatpush.msra.mxu2 %v1619_v52  ;;  %v2276_v15 = vld [vmem:[#allocation26_spill] sm:$0xff] }
 0x1ab   :  { %771 = vmatpush.msra.mxu0 %v1536_v32  ;;  %v164_v16 = vadd.f32 %v2276_v15, %v2275_v13  ;;  %v1975_v15 = vld [vmem:[#allocation3 + $0x178] sm:$0xff] }
 0x1ac   :  { %843 = vmatpush.msra.mxu1 %v1483_v18  ;;  %863 = vmatpush.msra.mxu2 %v1628_v54 }
 0x1ad   :  { %772 = vmatpush.msra.mxu0 %v1543_v34 }
 0x1ae   :  { %844 = vmatpush.msra.mxu1 %v1489_v20  ;;  %864 = vmatpush.msra.mxu2 %v1635_v55  ;;  %v2277_v20 = vld [vmem:[#allocation18_spill] sm:$0xff] }
 0x1af   :  { %773 = vmatpush.msra.mxu0 %v1550_v37 }
 0x1b0   :  { %845 = vmatpush.msra.mxu1 %v1497_v22  ;;  %865 = vmatpush.msra.mxu2 %v1641_v56 }
 0x1b1   :  { %774 = vmatpush.msra.mxu0 %v1563_v41 }
 0x1b2   :  { %846 = vmatpush.msra.mxu1 %v1503_v25  ;;  %866 = vmatpush.msra.mxu2 %v2265_v0 }
 0x1b3   :  { %775 = vmatpush.msra.mxu0 %v2266_v1 }
 0x1b4   :  { %847 = vmatpush.msra.mxu1 %v2267_v3  ;;  %867 = vmatpush.msra.mxu2 %v2268_v4 }
 0x1b5   :  { %776 = vmatpush.msra.mxu0 %v2269_v5 }
 0x1b6   :  { %848 = vmatpush.msra.mxu1 %v2270_v7  ;;  %868 = vmatpush.msra.mxu2 %v2271_v9 }
 0x1b7   :  { %777 = vmatpush.msra.mxu0 %v2272_v10 }
 0x1b8   :  { %849 = vmatpush.msra.mxu1 %v2273_v11  ;;  %869 = vmatpush.msra.mxu2 %v2274_v12 }
 0x215   :  { %v515_v18 = vpop.f32.mrf.mxu0  ;;  %v535_v19 = vpop.f32.mrf.mxu1 }
 0x216   :  { %v558_v21 = vadd.f32 %v515_v18, %v2277_v20  ;;  %v578_v22 = vadd.f32 %v535_v19, %v164_v16  ;;  %v1978_v16 = vld [vmem:[#allocation3 + $0x168] sm:$0xff]  ;;  %v1985_v18 = vld [vmem:[#allocation3 + $0x150] sm:$0xff]  ;;  %v1992_v20 = vld [vmem:[#allocation3 + $0x138] sm:$0xff] }
 0x217   :  { %v1989_v19 = vld [vmem:[#allocation3 + $0x148] sm:$0xff] }
 0x218   :  { %v1206_v23 = vmul.f32 -1.442695, %v558_v21  ;;  %v1207_v25 = vmul.f32 -1.442695, %v578_v22  ;;  %v1999_v21 = vld [vmem:[#allocation3 + $0x120] sm:$0xff]  ;;  %v2006_v22 = vld [vmem:[#allocation3 + $0x108] sm:$0xff] }
 0x21a   :  { %1251 = vpow2.f32 %v1206_v23  ;;  %v2013_v23 = vld [vmem:[#allocation3 + $0xf0] sm:$0xff] }
 0x21b   :  { %1253 = vpow2.f32 %v1207_v25  ;;  %v2020_v25 = vld [vmem:[#allocation3 + $0xd8] sm:$0xff] }
 0x21c   :  { %v555_v60 = vpop.f32.mrf.mxu2 }
 0x21d   :  { %v598_v33 = vadd.f32 %v1812_v17, %v555_v60  ;;  %v2280_v60 = vld [vmem:[#allocation19_spill] sm:$0xff] }
 0x220   :  { %v1252_v27 = vpop.eup %1251 }
 0x221   :  { %v1254_v29 = vpop.eup %1253  ;;  %v562_v30 = vadd.f32 1.0, %v1252_v27  ;;  %v2027_v27 = vld [vmem:[#allocation3 + $0xc0] sm:$0xff] }
 0x222   :  { %v582_v32 = vadd.f32 1.0, %v1254_v29  ;;  %v2034_v29 = vld [vmem:[#allocation3 + $0xa8] sm:$0xff] }
 0x223   :  { %1255 = vrcp.f32 %v562_v30  ;;  %v574_v8 = vand.u32 2147483648, %v562_v30  ;;  %v572_v58 = vand.u32 2147483647, %v562_v30  ;;  %vm568_vm3 = vweird.f32 %v562_v30 }
 0x224   :  { %1257 = vrcp.f32 %v582_v32  ;;  %v594_v6 = vand.u32 2147483648, %v582_v32  ;;  %vm588_vm7 = vweird.f32 %v582_v32  ;;  %v592_v47 = vand.u32 2147483647, %v582_v32 }
 0x225   :  { %v575_v59 = vor.u32 1.1754944e-38, %v574_v8  ;;  %vm573_vm5 = vcmp.eq.f32.partialorder %v572_v58, 8.507059e+37 }
 0x226   :  { %v595_v38 = vor.u32 1.1754944e-38, %v594_v6  ;;  %vm593_vm9 = vcmp.eq.f32.partialorder %v592_v47, 8.507059e+37 }
 0x229   :  { %v1256_v34 = vpop.eup %1255 }
 0x22a   :  { %v1258_v37 = vpop.eup %1257  ;;  %v564_v41 = vmul.f32 %v1256_v34, %v562_v30  ;;  %vm569_vm2 = vweird.f32 %v1256_v34  ;;  %v2041_v30 = vld [vmem:[#allocation3 + $0x90] sm:$0xff] }
 0x22b   :  { %v584_v43 = vmul.f32 %v1258_v37, %v582_v32  ;;  %vm570_vm4 = vmor %vm568_vm3, %vm569_vm2  ;;  %vm589_vm6 = vweird.f32 %v1258_v37  ;;  %v2048_v32 = vld [vmem:[#allocation3 + $0x78] sm:$0xff] }
 0x22c   :  { %v565_v57 = vsub.f32 1.0, %v564_v41  ;;  %vm590_vm8 = vmor %vm588_vm7, %vm589_vm6  ;;  %v2069_v41 = vld [vmem:[#allocation3 + $0x30] sm:$0xff] }
 0x22d   :  { %v585_v39 = vsub.f32 1.0, %v584_v43  ;;  %v2076_v43 = vld [vmem:[#allocation3 + $0x18] sm:$0xff] }
 0x22e   :  { %v566_v62 = vmul.f32 %v1256_v34, %v565_v57  ;;  %v2083_v57 = vld [vmem:[#allocation3] sm:$0xff] }
 0x22f   :  { %v586_v26 = vmul.f32 %v1258_v37, %v585_v39 }
 0x230   :  { %v567_v24 = vadd.f32 %v1256_v34, %v566_v62 }
 0x231   :  { %v587_v2 = vadd.f32 %v1258_v37, %v586_v26 }
 0x232   :  { %v571_v63 = vsel %vm570_vm4, %v1256_v34, %v567_v24  ;;  %v2055_v34 = vld [vmem:[#allocation3 + $0x60] sm:$0xff] }
 0x233   :  { %v576_v36 = vsel %vm573_vm5, %v575_v59, %v571_v63  ;;  %v591_v61 = vsel %vm590_vm8, %v1258_v37, %v587_v2  ;;  %v2062_v37 = vld [vmem:[#allocation3 + $0x48] sm:$0xff] }
 0x234   :  { %v599_v45 = vmul.f32 %v598_v33, %v576_v36  ;;  %v596_v1 = vsel %vm593_vm9, %v595_v38, %v591_v61 }
 0x235   :  { %v602_v3 = vsub.f32 1.0, %v596_v1  ;;  %v604_v10 = vmul.f32 %v596_v1, %v1902_v14  ;;  %v1982_v14 = vld [vmem:[#allocation3 + $0x160] sm:$0xff] }
 0x236   :  { %v600_v28 = vadd.f32 %v599_v45, %v205_v31 }
 0x238   :  { %1259 = vtanh.f32 %v600_v28 }
 0x23e   :  { %v1260_v5 = vpop.eup %1259 }
 0x23f   :  { %v603_v7 = vmul.f32 %v1260_v5, %v602_v3 }
 0x241   :  { %v1966_v11 = vadd.f32 %v604_v10, %v603_v7 }
 0x243   :  { %1208 = vst [vmem:[%s2205_s5 + $0x10] sm:$0xff] %v1966_v11  ;;  %626 = vmatmul.f32.vlgmr.msrb.gmra.mxu3 %v1966_v11  ;;  %646 = vmatmul.f32.vlgmr.msrb.gmra.mxu0 %v1966_v11 }
 0x244   :  { %666 = vmatmul.f32.vlgmr.msrb.gmra.mxu1 %v1966_v11  ;;  %874 = vmatpush.msrb.mxu3 %v1975_v15 }
 0x245   :  { %946 = vmatpush.msrb.mxu0 %v1978_v16  ;;  %966 = vmatpush.msrb.mxu1 %v1545_v35  ;;  %v1996_v35 = vld [vmem:[#allocation3 + $0x130] sm:$0xff] }
 0x246   :  { %875 = vmatpush.msrb.mxu3 %v1982_v14 }
 0x247   :  { %947 = vmatpush.msrb.mxu0 %v1985_v18  ;;  %967 = vmatpush.msrb.mxu1 %v1559_v40  ;;  %v2003_v40 = vld [vmem:[#allocation3 + $0x118] sm:$0xff] }
 0x248   :  { %876 = vmatpush.msrb.mxu3 %v1989_v19 }
 0x249   :  { %948 = vmatpush.msrb.mxu0 %v1992_v20  ;;  %968 = vmatpush.msrb.mxu1 %v1567_v42  ;;  %v2010_v42 = vld [vmem:[#allocation3 + $0x100] sm:$0xff] }
 0x24a   :  { %877 = vmatpush.msrb.mxu3 %v1996_v35 }
 0x24b   :  { %949 = vmatpush.msrb.mxu0 %v1999_v21  ;;  %969 = vmatpush.msrb.mxu1 %v1576_v44  ;;  %v2017_v44 = vld [vmem:[#allocation3 + $0xe8] sm:$0xff] }
 0x24c   :  { %878 = vmatpush.msrb.mxu3 %v2003_v40 }
 0x24d   :  { %950 = vmatpush.msrb.mxu0 %v2006_v22  ;;  %970 = vmatpush.msrb.mxu1 %v1585_v46  ;;  %v2024_v46 = vld [vmem:[#allocation3 + $0xd0] sm:$0xff] }
 0x24e   :  { %879 = vmatpush.msrb.mxu3 %v2010_v42 }
 0x24f   :  { %951 = vmatpush.msrb.mxu0 %v2013_v23  ;;  %971 = vmatpush.msrb.mxu1 %v1598_v49  ;;  %v2031_v49 = vld [vmem:[#allocation3 + $0xb8] sm:$0xff] }
 0x250   :  { %880 = vmatpush.msrb.mxu3 %v2017_v44 }
 0x251   :  { %952 = vmatpush.msrb.mxu0 %v2020_v25  ;;  %972 = vmatpush.msrb.mxu1 %v1605_v50  ;;  %v2038_v50 = vld [vmem:[#allocation3 + $0xa0] sm:$0xff] }
 0x252   :  { %881 = vmatpush.msrb.mxu3 %v2024_v46 }
 0x253   :  { %953 = vmatpush.msrb.mxu0 %v2027_v27  ;;  %973 = vmatpush.msrb.mxu1 %v1612_v51  ;;  %v2045_v51 = vld [vmem:[#allocation3 + $0x88] sm:$0xff] }
 0x254   :  { %882 = vmatpush.msrb.mxu3 %v2031_v49 }
 0x255   :  { %954 = vmatpush.msrb.mxu0 %v2034_v29  ;;  %974 = vmatpush.msrb.mxu1 %v1619_v52  ;;  %v2052_v52 = vld [vmem:[#allocation3 + $0x70] sm:$0xff] }
 0x256   :  { %883 = vmatpush.msrb.mxu3 %v2038_v50 }
 0x257   :  { %955 = vmatpush.msrb.mxu0 %v2041_v30  ;;  %975 = vmatpush.msrb.mxu1 %v1628_v54  ;;  %v2059_v54 = vld [vmem:[#allocation3 + $0x58] sm:$0xff] }
 0x258   :  { %884 = vmatpush.msrb.mxu3 %v2045_v51 }
 0x259   :  { %956 = vmatpush.msrb.mxu0 %v2048_v32  ;;  %976 = vmatpush.msrb.mxu1 %v1635_v55  ;;  %v2066_v55 = vld [vmem:[#allocation3 + $0x40] sm:$0xff] }
 0x25a   :  { %885 = vmatpush.msrb.mxu3 %v2052_v52 }
 0x25b   :  { %957 = vmatpush.msrb.mxu0 %v2055_v34  ;;  %977 = vmatpush.msrb.mxu1 %v1641_v56  ;;  %v2073_v56 = vld [vmem:[#allocation3 + $0x28] sm:$0xff] }
 0x25c   :  { %886 = vmatpush.msrb.mxu3 %v2059_v54 }
 0x25d   :  { %958 = vmatpush.msrb.mxu0 %v2062_v37  ;;  %978 = vmatpush.msrb.mxu1 %v2265_v0  ;;  %v2080_v0 = vld [vmem:[#allocation3 + $0x10] sm:$0xff] }
 0x25e   :  { %887 = vmatpush.msrb.mxu3 %v2066_v55 }
 0x25f   :  { %959 = vmatpush.msrb.mxu0 %v2069_v41  ;;  %979 = vmatpush.msrb.mxu1 %v2268_v4  ;;  %v2279_v4 = vld [vmem:[#allocation28_spill] sm:$0xff] }
 0x260   :  { %888 = vmatpush.msrb.mxu3 %v2073_v56  ;;  %v167_v39 = vadd.f32 %v2279_v4, %v2275_v13 }
 0x261   :  { %960 = vmatpush.msrb.mxu0 %v2076_v43  ;;  %980 = vmatpush.msrb.mxu1 %v2271_v9 }
 0x262   :  { %889 = vmatpush.msrb.mxu3 %v2080_v0 }
 0x263   :  { %961 = vmatpush.msrb.mxu0 %v2083_v57  ;;  %981 = vmatpush.msrb.mxu1 %v2274_v12 }
 0x2c0   :  { %v647_v8 = vpop.f32.mrf.mxu0 }
 0x2c1   :  { %v690_v62 = vadd.f32 %v647_v8, %v167_v39  ;;  %v667_v1 = vpop.f32.mrf.mxu1  ;;  %v2281_v8 = vld [vmem:[#allocation27_spill] sm:$0xff] }
 0x2c2   :  { %v710_v7 = vadd.f32 %v1812_v17, %v667_v1 }
 0x2c3   :  { %v1210_v58 = vmul.f32 -1.442695, %v690_v62  ;;  %v208_v62 = vadd.f32 %v2281_v8, %v1815_v53 }
 0x2c5   :  { %1261 = vpow2.f32 %v1210_v58 }
 0x2c6   :  { %v627_v26 = vpop.f32.mrf.mxu3 }
 0x2c7   :  { %v670_v9 = vadd.f32 %v627_v26, %v2280_v60 }
 0x2c9   :  { %v1209_v24 = vmul.f32 -1.442695, %v670_v9 }
 0x2cb   :  { %v1262_v59 = vpop.eup %1261  ;;  %1263 = vpow2.f32 %v1209_v24 }
 0x2cc   :  { %v694_v63 = vadd.f32 1.0, %v1262_v59 }
 0x2ce   :  { %1265 = vrcp.f32 %v694_v63  ;;  %v706_v58 = vand.u32 2147483648, %v694_v63  ;;  %vm700_vm15 = vweird.f32 %v694_v63  ;;  %v704_v60 = vand.u32 2147483647, %v694_v63 }
 0x2d0   :  { %v707_v59 = vor.u32 1.1754944e-38, %v706_v58  ;;  %vm705_vm1 = vcmp.eq.f32.partialorder %v704_v60, 8.507059e+37 }
 0x2d1   :  { %v1264_v33 = vpop.eup %1263 }
 0x2d2   :  { %v674_v2 = vadd.f32 1.0, %v1264_v33 }
 0x2d4   :  { %1267 = vrcp.f32 %v674_v2  ;;  %v1266_v36 = vpop.eup %1265  ;;  %v686_v47 = vand.u32 2147483648, %v674_v2  ;;  %v684_v61 = vand.u32 2147483647, %v674_v2  ;;  %vm680_vm11 = vweird.f32 %v674_v2 }
 0x2d5   :  { %v696_v12 = vmul.f32 %v1266_v36, %v694_v63  ;;  %vm701_vm14 = vweird.f32 %v1266_v36  ;;  %v1343_v63 = vld [vmem:[#allocation3 + $0x170] sm:$0xff] }
 0x2d6   :  { %v687_v5 = vor.u32 1.1754944e-38, %v686_v47  ;;  %vm685_vm13 = vcmp.eq.f32.partialorder %v684_v61, 8.507059e+37  ;;  %vm702_vm0 = vmor %vm700_vm15, %vm701_vm14 }
 0x2d7   :  { %v697_v6 = vsub.f32 1.0, %v696_v12 }
 0x2d9   :  { %v698_v38 = vmul.f32 %v1266_v36, %v697_v6 }
 0x2da   :  { %v1268_v48 = vpop.eup %1267 }
 0x2db   :  { %v676_v31 = vmul.f32 %v1268_v48, %v674_v2  ;;  %vm681_vm10 = vweird.f32 %v1268_v48  ;;  %v699_v4 = vadd.f32 %v1266_v36, %v698_v38 }
 0x2dc   :  { %vm682_vm12 = vmor %vm680_vm11, %vm681_vm10 }
 0x2dd   :  { %v677_v45 = vsub.f32 1.0, %v676_v31  ;;  %v703_v24 = vsel %vm702_vm0, %v1266_v36, %v699_v4  ;;  %v1345_v36 = vld [vmem:[#allocation3 + $0x140] sm:$0xff] }
 0x2de   :  { %v708_v33 = vsel %vm705_vm1, %v707_v59, %v703_v24 }
 0x2df   :  { %v678_v28 = vmul.f32 %v1268_v48, %v677_v45  ;;  %v714_v2 = vsub.f32 1.0, %v708_v33  ;;  %v716_v31 = vmul.f32 %v708_v33, %v1966_v11  ;;  %v1344_v11 = vld [vmem:[#allocation3 + $0x158] sm:$0xff]  ;;  %v1346_v45 = vld [vmem:[#allocation3 + $0x128] sm:$0xff] }
 0x2e1   :  { %v679_v3 = vadd.f32 %v1268_v48, %v678_v28 }
 0x2e3   :  { %v683_v10 = vsel %vm682_vm12, %v1268_v48, %v679_v3 }
 0x2e4   :  { %v688_v39 = vsel %vm685_vm13, %v687_v5, %v683_v10 }
 0x2e5   :  { %v711_v26 = vmul.f32 %v710_v7, %v688_v39 }
 0x2e7   :  { %v712_v9 = vadd.f32 %v711_v26, %v208_v62 }
 0x2e9   :  { %1269 = vtanh.f32 %v712_v9 }
 0x2ef   :  { %v1270_v12 = vpop.eup %1269 }
 0x2f0   :  { %v715_v48 = vmul.f32 %v1270_v12, %v714_v2 }
 0x2f2   :  { %v2094_v6 = vadd.f32 %v716_v31, %v715_v48 }
 0x2f4   :  { %1211 = vst [vmem:[%s2205_s5 + $0x18] sm:$0xff] %v2094_v6  ;;  %738 = vmatmul.f32.vlgmr.msrb.gmra.mxu2 %v2094_v6  ;;  %758 = vmatmul.f32.vlgmr.msra.gmra.mxu3 %v2094_v6 }
 0x2f5   :  { %778 = vmatmul.f32.vlgmr.msra.gmra.mxu0 %v2094_v6  ;;  %986 = vmatpush.msrb.mxu2 %v1975_v15 }
 0x2f6   :  { %1058 = vmatpush.msra.mxu3 %v1978_v16  ;;  %1078 = vmatpush.msra.mxu0 %v1343_v63  ;;  %v1347_v16 = vld [vmem:[#allocation3 + $0x110] sm:$0xff] }
 0x2f7   :  { %987 = vmatpush.msrb.mxu2 %v1982_v14 }
 0x2f8   :  { %1059 = vmatpush.msra.mxu3 %v1985_v18  ;;  %1079 = vmatpush.msra.mxu0 %v1344_v11  ;;  %v1348_v18 = vld [vmem:[#allocation3 + $0xf8] sm:$0xff] }
 0x2f9   :  { %988 = vmatpush.msrb.mxu2 %v1989_v19 }
 0x2fa   :  { %1060 = vmatpush.msra.mxu3 %v1992_v20  ;;  %1080 = vmatpush.msra.mxu0 %v1345_v36  ;;  %v1349_v20 = vld [vmem:[#allocation3 + $0xe0] sm:$0xff]  ;;  %v2284_v36 = vld [vmem:[#allocation29_spill] sm:$0xff] }
 0x2fb   :  { %989 = vmatpush.msrb.mxu2 %v1996_v35 }
 0x2fc   :  { %1061 = vmatpush.msra.mxu3 %v1999_v21  ;;  %1081 = vmatpush.msra.mxu0 %v1346_v45  ;;  %v1350_v21 = vld [vmem:[#allocation3 + $0xc8] sm:$0xff]  ;;  %v211_v45 = vadd.f32 %v2284_v36, %v1815_v53 }
 0x2fd   :  { %990 = vmatpush.msrb.mxu2 %v2003_v40 }
 0x2fe   :  { %1062 = vmatpush.msra.mxu3 %v2006_v22  ;;  %1082 = vmatpush.msra.mxu0 %v1347_v16  ;;  %v1351_v22 = vld [vmem:[#allocation3 + $0xb0] sm:$0xff] }
 0x2ff   :  { %991 = vmatpush.msrb.mxu2 %v2010_v42 }
 0x300   :  { %1063 = vmatpush.msra.mxu3 %v2013_v23  ;;  %1083 = vmatpush.msra.mxu0 %v1348_v18  ;;  %v1352_v23 = vld [vmem:[#allocation3 + $0x98] sm:$0xff] }
 0x301   :  { %992 = vmatpush.msrb.mxu2 %v2017_v44 }
 0x302   :  { %1064 = vmatpush.msra.mxu3 %v2020_v25  ;;  %1084 = vmatpush.msra.mxu0 %v1349_v20  ;;  %v1353_v25 = vld [vmem:[#allocation3 + $0x80] sm:$0xff] }
 0x303   :  { %993 = vmatpush.msrb.mxu2 %v2024_v46 }
 0x304   :  { %1065 = vmatpush.msra.mxu3 %v2027_v27  ;;  %1085 = vmatpush.msra.mxu0 %v1350_v21  ;;  %v1354_v27 = vld [vmem:[#allocation3 + $0x68] sm:$0xff] }
 0x305   :  { %994 = vmatpush.msrb.mxu2 %v2031_v49 }
 0x306   :  { %1066 = vmatpush.msra.mxu3 %v2034_v29  ;;  %1086 = vmatpush.msra.mxu0 %v1351_v22  ;;  %v1355_v29 = vld [vmem:[#allocation3 + $0x50] sm:$0xff] }
 0x307   :  { %995 = vmatpush.msrb.mxu2 %v2038_v50 }
 0x308   :  { %1067 = vmatpush.msra.mxu3 %v2041_v30  ;;  %1087 = vmatpush.msra.mxu0 %v1352_v23  ;;  %v1356_v30 = vld [vmem:[#allocation3 + $0x38] sm:$0xff] }
 0x309   :  { %996 = vmatpush.msrb.mxu2 %v2045_v51 }
 0x30a   :  { %1068 = vmatpush.msra.mxu3 %v2048_v32  ;;  %1088 = vmatpush.msra.mxu0 %v1353_v25  ;;  %v1357_v32 = vld [vmem:[#allocation3 + $0x20] sm:$0xff] }
 0x30b   :  { %997 = vmatpush.msrb.mxu2 %v2052_v52 }
 0x30c   :  { %1069 = vmatpush.msra.mxu3 %v2055_v34  ;;  %1089 = vmatpush.msra.mxu0 %v1354_v27  ;;  %v1358_v34 = vld [vmem:[#allocation3 + $0x8] sm:$0xff] }
 0x30d   :  { %998 = vmatpush.msrb.mxu2 %v2059_v54 }
 0x30e   :  { %1070 = vmatpush.msra.mxu3 %v2062_v37  ;;  %1090 = vmatpush.msra.mxu0 %v1355_v29  ;;  %v2282_v37 = vld [vmem:[#allocation30_spill] sm:$0xff] }
 0x30f   :  { %999 = vmatpush.msrb.mxu2 %v2066_v55  ;;  %v170_v47 = vadd.f32 %v2282_v37, %v2275_v13 }
 0x310   :  { %1071 = vmatpush.msra.mxu3 %v2069_v41  ;;  %1091 = vmatpush.msra.mxu0 %v1356_v30  ;;  %v2283_v41 = vld [vmem:[#allocation20_spill] sm:$0xff] }
 0x311   :  { %1000 = vmatpush.msrb.mxu2 %v2073_v56 }
 0x312   :  { %1072 = vmatpush.msra.mxu3 %v2076_v43  ;;  %1092 = vmatpush.msra.mxu0 %v1357_v32 }
 0x313   :  { %1001 = vmatpush.msrb.mxu2 %v2080_v0 }
 0x314   :  { %1073 = vmatpush.msra.mxu3 %v2083_v57  ;;  %1093 = vmatpush.msra.mxu0 %v1358_v34 }
 0x372   :  { %v779_v59 = vpop.f32.mrf.mxu0 }
 0x373   :  { %v822_v48 = vadd.f32 %v1812_v17, %v779_v59 }
 0x377   :  { %v739_v28 = vpop.f32.mrf.mxu2  ;;  %v759_v61 = vpop.f32.mrf.mxu3 }
 0x378   :  { %v782_v38 = vadd.f32 %v739_v28, %v2283_v41  ;;  %v802_v1 = vadd.f32 %v759_v61, %v170_v47 }
 0x37a   :  { %v1212_v3 = vmul.f32 -1.442695, %v782_v38  ;;  %v1213_v5 = vmul.f32 -1.442695, %v802_v1 }
 0x37c   :  { %1271 = vpow2.f32 %v1212_v3 }
 0x37d   :  { %1273 = vpow2.f32 %v1213_v5  ;;  %v2173_v5 = vld [vmem:[%s2204_s4] ss:$0 sm:$0xff] }
 0x382   :  { %v1272_v43 = vpop.eup %1271 }
 0x383   :  { %v1274_v7 = vpop.eup %1273  ;;  %v786_v10 = vadd.f32 1.0, %v1272_v43 }
 0x384   :  { %v806_v4 = vadd.f32 1.0, %v1274_v7  ;;  %v2287_v7 = vld [vmem:[#allocation31_spill] sm:$0xff] }
 0x385   :  { %1275 = vrcp.f32 %v786_v10  ;;  %v798_v26 = vand.u32 2147483648, %v786_v10  ;;  %v796_v24 = vand.u32 2147483647, %v786_v10  ;;  %vm792_vm3 = vweird.f32 %v786_v10 }
 0x386   :  { %1277 = vrcp.f32 %v806_v4  ;;  %v818_v18 = vand.u32 2147483648, %v806_v4  ;;  %vm812_vm7 = vweird.f32 %v806_v4  ;;  %v816_v20 = vand.u32 2147483647, %v806_v4 }
 0x387   :  { %v799_v12 = vor.u32 1.1754944e-38, %v798_v26  ;;  %vm797_vm5 = vcmp.eq.f32.partialorder %v796_v24, 8.507059e+37 }
 0x388   :  { %v819_v23 = vor.u32 1.1754944e-38, %v818_v18  ;;  %vm817_vm9 = vcmp.eq.f32.partialorder %v816_v20, 8.507059e+37 }
 0x38b   :  { %v1276_v57 = vpop.eup %1275 }
 0x38c   :  { %v1278_v39 = vpop.eup %1277  ;;  %v788_v8 = vmul.f32 %v1276_v57, %v786_v10  ;;  %vm793_vm2 = vweird.f32 %v1276_v57  ;;  %v214_v10 = vadd.f32 %v2287_v7, %v1815_v53  ;;  %v2291_v7 = vld [vmem:[#allocation24_spill] sm:$0xff] }
 0x38d   :  { %v808_v62 = vmul.f32 %v1278_v39, %v806_v4  ;;  %vm794_vm4 = vmor %vm792_vm3, %vm793_vm2  ;;  %vm813_vm6 = vweird.f32 %v1278_v39 }
 0x38e   :  { %v789_v58 = vsub.f32 1.0, %v788_v8  ;;  %vm814_vm8 = vmor %vm812_vm7, %vm813_vm6 }
 0x38f   :  { %v809_v60 = vsub.f32 1.0, %v808_v62 }
 0x390   :  { %v790_v9 = vmul.f32 %v1276_v57, %v789_v58 }
 0x391   :  { %v810_v33 = vmul.f32 %v1278_v39, %v809_v60 }
 0x392   :  { %v791_v2 = vadd.f32 %v1276_v57, %v790_v9 }
 0x393   :  { %v811_v11 = vadd.f32 %v1278_v39, %v810_v33 }
 0x394   :  { %v795_v31 = vsel %vm794_vm4, %v1276_v57, %v791_v2 }
 0x395   :  { %v800_v63 = vsel %vm797_vm5, %v799_v12, %v795_v31  ;;  %v815_v22 = vsel %vm814_vm8, %v1278_v39, %v811_v11  ;;  %v2288_v31 = vld [vmem:[#allocation34_spill] sm:$0xff] }
 0x396   :  { %v823_v16 = vmul.f32 %v822_v48, %v800_v63  ;;  %v820_v25 = vsel %vm817_vm9, %v819_v23, %v815_v22  ;;  %v176_v63 = vadd.f32 %v2288_v31, %v2275_v13 }
 0x397   :  { %v826_v17 = vsub.f32 1.0, %v820_v25  ;;  %v828_v30 = vmul.f32 %v820_v25, %v2094_v6 }
 0x398   :  { %v824_v21 = vadd.f32 %v823_v16, %v211_v45  ;;  %v2289_v45 = vld [vmem:[#allocation22_spill] sm:$0xff] }
 0x39a   :  { %1279 = vtanh.f32 %v824_v21 }
 0x3a0   :  { %v1280_v27 = vpop.eup %1279 }
 0x3a1   :  { %v827_v29 = vmul.f32 %v1280_v27, %v826_v17 }
 0x3a3   :  { %v2142_v32 = vadd.f32 %v828_v30, %v827_v29 }
 0x3a5   :  { %1214 = vst [vmem:[%s2205_s5 + $0x20] sm:$0xff] %v2142_v32  ;;  %850 = vmatmul.f32.vlgmr.msra.gmra.mxu1 %v2142_v32  ;;  %870 = vmatmul.f32.vlgmr.msra.gmra.mxu2 %v2142_v32 }
 0x3a6   :  { %890 = vmatmul.f32.vlgmr.msrb.gmra.mxu3 %v2142_v32  ;;  %1098 = vmatpush.msra.mxu1 %v1975_v15 }
 0x3a8   :  { %1099 = vmatpush.msra.mxu1 %v1982_v14  ;;  %v2285_v14 = vld [vmem:[#allocation21_spill] sm:$0xff] }
 0x3aa   :  { %1100 = vmatpush.msra.mxu1 %v1989_v19 }
 0x3ac   :  { %1101 = vmatpush.msra.mxu1 %v1996_v35 }
 0x3ae   :  { %1102 = vmatpush.msra.mxu1 %v2003_v40  ;;  %v2286_v40 = vld [vmem:[#allocation32_spill] sm:$0xff] }
 0x3b0   :  { %1103 = vmatpush.msra.mxu1 %v2010_v42  ;;  %v173_v42 = vadd.f32 %v2286_v40, %v2275_v13 }
 0x3b2   :  { %1104 = vmatpush.msra.mxu1 %v2017_v44 }
 0x3b4   :  { %1105 = vmatpush.msra.mxu1 %v2024_v46 }
 0x3b6   :  { %1106 = vmatpush.msra.mxu1 %v2031_v49 }
 0x3b8   :  { %1107 = vmatpush.msra.mxu1 %v2038_v50 }
 0x3ba   :  { %1108 = vmatpush.msra.mxu1 %v2045_v51 }
 0x3bc   :  { %1109 = vmatpush.msra.mxu1 %v2052_v52 }
 0x3be   :  { %1110 = vmatpush.msra.mxu1 %v2059_v54 }
 0x3c0   :  { %1111 = vmatpush.msra.mxu1 %v2066_v55 }
 0x3c2   :  { %1112 = vmatpush.msra.mxu1 %v2073_v56 }
 0x3c4   :  { %1113 = vmatpush.msra.mxu1 %v2080_v0 }
 0x422   :  { %v851_v15 = vpop.f32.mrf.mxu1 }
 0x423   :  { %v894_v19 = vadd.f32 %v851_v15, %v2285_v14 }
 0x425   :  { %v1215_v35 = vmul.f32 -1.442695, %v894_v19 }
 0x427   :  { %1281 = vpow2.f32 %v1215_v35 }
 0x428   :  { %v871_v44 = vpop.f32.mrf.mxu2 }
 0x429   :  { %v914_v46 = vadd.f32 %v871_v44, %v173_v42  ;;  %v891_v28 = vpop.f32.mrf.mxu3 }
 0x42a   :  { %v934_v43 = vadd.f32 %v2173_v5, %v891_v28 }
 0x42b   :  { %v1216_v49 = vmul.f32 -1.442695, %v914_v46 }
 0x42d   :  { %v1282_v50 = vpop.eup %1281  ;;  %1283 = vpow2.f32 %v1216_v49 }
 0x42e   :  { %v898_v51 = vadd.f32 1.0, %v1282_v50 }
 0x430   :  { %1285 = vrcp.f32 %v898_v51  ;;  %v910_v6 = vand.u32 2147483648, %v898_v51  ;;  %v908_v37 = vand.u32 2147483647, %v898_v51  ;;  %vm904_vm11 = vweird.f32 %v898_v51 }
 0x432   :  { %v911_v38 = vor.u32 1.1754944e-38, %v910_v6  ;;  %vm909_vm13 = vcmp.eq.f32.partialorder %v908_v37, 8.507059e+37 }
 0x433   :  { %v1284_v52 = vpop.eup %1283 }
 0x434   :  { %v918_v54 = vadd.f32 1.0, %v1284_v52 }
 0x436   :  { %v1286_v55 = vpop.eup %1285  ;;  %1287 = vrcp.f32 %v918_v54  ;;  %v930_v39 = vand.u32 2147483648, %v918_v54  ;;  %v928_v62 = vand.u32 2147483647, %v918_v54  ;;  %vm924_vm15 = vweird.f32 %v918_v54 }
 0x437   :  { %v900_v56 = vmul.f32 %v1286_v55, %v898_v51  ;;  %vm905_vm10 = vweird.f32 %v1286_v55 }
 0x438   :  { %vm906_vm12 = vmor %vm904_vm11, %vm905_vm10  ;;  %v931_v60 = vor.u32 1.1754944e-38, %v930_v39  ;;  %vm929_vm1 = vcmp.eq.f32.partialorder %v928_v62, 8.507059e+37  ;;  %v2292_v62 = vld [vmem:[#allocation17_spill] sm:$0xff] }
 0x439   :  { %v901_v0 = vsub.f32 1.0, %v900_v56 }
 0x43b   :  { %v902_v34 = vmul.f32 %v1286_v55, %v901_v0 }
 0x43c   :  { %v1288_v47 = vpop.eup %1287 }
 0x43d   :  { %v920_v61 = vmul.f32 %v1288_v47, %v918_v54  ;;  %v903_v41 = vadd.f32 %v1286_v55, %v902_v34  ;;  %vm925_vm14 = vweird.f32 %v1288_v47 }
 0x43e   :  { %vm926_vm0 = vmor %vm924_vm15, %vm925_vm14 }
 0x43f   :  { %v921_v1 = vsub.f32 1.0, %v920_v61  ;;  %v907_v3 = vsel %vm906_vm12, %v1286_v55, %v903_v41  ;;  %v2290_v55 = vld [vmem:[#allocation33_spill] sm:$0xff] }
 0x440   :  { %v912_v4 = vsel %vm909_vm13, %v911_v38, %v907_v3  ;;  %v217_v56 = vadd.f32 %v2290_v55, %v1815_v53 }
 0x441   :  { %v922_v57 = vmul.f32 %v1288_v47, %v921_v1  ;;  %v935_v8 = vmul.f32 %v934_v43, %v912_v4 }
 0x443   :  { %v923_v58 = vadd.f32 %v1288_v47, %v922_v57  ;;  %v936_v26 = vadd.f32 %v935_v8, %v214_v10  ;;  %v179_v10 = vadd.f32 %v2291_v7, %v2275_v13 }
 0x445   :  { %v927_v9 = vsel %vm926_vm0, %v1288_v47, %v923_v58  ;;  %1289 = vtanh.f32 %v936_v26 }
 0x446   :  { %v932_v24 = vsel %vm929_vm1, %v931_v60, %v927_v9 }
 0x447   :  { %v938_v59 = vsub.f32 1.0, %v932_v24  ;;  %v940_v12 = vmul.f32 %v932_v24, %v2142_v32 }
 0x44b   :  { %v1290_v33 = vpop.eup %1289 }
 0x44c   :  { %v939_v2 = vmul.f32 %v1290_v33, %v938_v59 }
 0x44e   :  { %v941_v48 = vadd.f32 %v940_v12, %v939_v2 }
 0x450   :  { %1217 = vst [vmem:[%s2205_s5 + $0x28] sm:$0xff] %v941_v48  ;;  %962 = vmatmul.f32.vlgmr.msrb.gmra.mxu0 %v941_v48  ;;  %982 = vmatmul.f32.vlgmr.msrb.gmra.mxu1 %v941_v48 }
 0x451   :  { %1002 = vmatmul.f32.vlgmr.msrb.gmra.mxu2 %v941_v48 }
 0x4cd   :  { %v963_v11 = vpop.f32.mrf.mxu0  ;;  %v983_v36 = vpop.f32.mrf.mxu1 }
 0x4ce   :  { %v1006_v16 = vadd.f32 %v963_v11, %v2289_v45  ;;  %v1026_v18 = vadd.f32 %v983_v36, %v176_v63 }
 0x4d0   :  { %v1218_v20 = vmul.f32 -1.442695, %v1006_v16  ;;  %v1219_v21 = vmul.f32 -1.442695, %v1026_v18 }
 0x4d2   :  { %1291 = vpow2.f32 %v1218_v20 }
 0x4d3   :  { %1293 = vpow2.f32 %v1219_v21 }
 0x4d4   :  { %v1003_v44 = vpop.f32.mrf.mxu2 }
 0x4d5   :  { %v1046_v51 = vadd.f32 %v2173_v5, %v1003_v44 }
 0x4d8   :  { %v1292_v22 = vpop.eup %1291 }
 0x4d9   :  { %v1294_v23 = vpop.eup %1293  ;;  %v1010_v25 = vadd.f32 1.0, %v1292_v22 }
 0x4da   :  { %v1030_v17 = vadd.f32 1.0, %v1294_v23 }
 0x4db   :  { %1295 = vrcp.f32 %v1010_v25  ;;  %v1022_v19 = vand.u32 2147483648, %v1010_v25  ;;  %v1020_v40 = vand.u32 2147483647, %v1010_v25  ;;  %vm1016_vm3 = vweird.f32 %v1010_v25 }
 0x4dc   :  { %1297 = vrcp.f32 %v1030_v17  ;;  %v1042_v0 = vand.u32 2147483648, %v1030_v17  ;;  %vm1036_vm7 = vweird.f32 %v1030_v17  ;;  %v1040_v34 = vand.u32 2147483647, %v1030_v17 }
 0x4dd   :  { %v1023_v49 = vor.u32 1.1754944e-38, %v1022_v19  ;;  %vm1021_vm5 = vcmp.eq.f32.partialorder %v1020_v40, 8.507059e+37 }
 0x4de   :  { %v1043_v28 = vor.u32 1.1754944e-38, %v1042_v0  ;;  %vm1041_vm9 = vcmp.eq.f32.partialorder %v1040_v34, 8.507059e+37 }
 0x4e1   :  { %v1296_v27 = vpop.eup %1295 }
 0x4e2   :  { %v1298_v29 = vpop.eup %1297  ;;  %v1012_v30 = vmul.f32 %v1296_v27, %v1010_v25  ;;  %vm1017_vm2 = vweird.f32 %v1296_v27 }
 0x4e3   :  { %v1032_v32 = vmul.f32 %v1298_v29, %v1030_v17  ;;  %vm1018_vm4 = vmor %vm1016_vm3, %vm1017_vm2  ;;  %vm1037_vm6 = vweird.f32 %v1298_v29  ;;  %v2293_v17 = vld [vmem:[#allocation35_spill] sm:$0xff] }
 0x4e4   :  { %v1013_v15 = vsub.f32 1.0, %v1012_v30  ;;  %vm1038_vm8 = vmor %vm1036_vm7, %vm1037_vm6 }
 0x4e5   :  { %v1033_v14 = vsub.f32 1.0, %v1032_v32 }
 0x4e6   :  { %v1014_v35 = vmul.f32 %v1296_v27, %v1013_v15 }
 0x4e7   :  { %v1034_v42 = vmul.f32 %v1298_v29, %v1033_v14 }
 0x4e8   :  { %v1015_v46 = vadd.f32 %v1296_v27, %v1014_v35 }
 0x4e9   :  { %v1035_v52 = vadd.f32 %v1298_v29, %v1034_v42 }
 0x4ea   :  { %v1019_v50 = vsel %vm1018_vm4, %v1296_v27, %v1015_v46  ;;  %v220_v27 = vadd.f32 %v2293_v17, %v1815_v53 }
 0x4eb   :  { %v1024_v54 = vsel %vm1021_vm5, %v1023_v49, %v1019_v50  ;;  %v1039_v47 = vsel %vm1038_vm8, %v1298_v29, %v1035_v52 }
 0x4ec   :  { %v1047_v6 = vmul.f32 %v1046_v51, %v1024_v54  ;;  %v1044_v61 = vsel %vm1041_vm9, %v1043_v28, %v1039_v47 }
 0x4ed   :  { %v1050_v41 = vsub.f32 1.0, %v1044_v61  ;;  %v1052_v3 = vmul.f32 %v1044_v61, %v941_v48 }
 0x4ee   :  { %v1048_v37 = vadd.f32 %v1047_v6, %v217_v56 }
 0x4f0   :  { %1299 = vtanh.f32 %v1048_v37 }
 0x4f6   :  { %v1300_v38 = vpop.eup %1299 }
 0x4f7   :  { %v1051_v1 = vmul.f32 %v1300_v38, %v1050_v41 }
 0x4f9   :  { %v1053_v43 = vadd.f32 %v1052_v3, %v1051_v1 }
 0x4fb   :  { %1220 = vst [vmem:[%s2205_s5 + $0x30] sm:$0xff] %v1053_v43  ;;  %1074 = vmatmul.f32.vlgmr.msra.gmra.mxu3 %v1053_v43  ;;  %1094 = vmatmul.f32.vlgmr.msra.gmra.mxu0 %v1053_v43 }
 0x4fc   :  { %1114 = vmatmul.f32.vlgmr.msra.gmra.mxu1 %v1053_v43 }
 0x578   :  { %v1095_v4 = vpop.f32.mrf.mxu0 }
 0x579   :  { %v1138_v57 = vadd.f32 %v1095_v4, %v179_v10  ;;  %v1115_v16 = vpop.f32.mrf.mxu1 }
 0x57a   :  { %v1158_v21 = vadd.f32 %v2173_v5, %v1115_v16 }
 0x57b   :  { %v1222_v39 = vmul.f32 -1.442695, %v1138_v57 }
 0x57d   :  { %1301 = vpow2.f32 %v1222_v39 }
 0x57e   :  { %v1075_v8 = vpop.f32.mrf.mxu3 }
 0x57f   :  { %v1118_v58 = vadd.f32 %v1075_v8, %v2292_v62 }
 0x581   :  { %v1221_v26 = vmul.f32 -1.442695, %v1118_v58 }
 0x583   :  { %v1302_v60 = vpop.eup %1301  ;;  %1303 = vpow2.f32 %v1221_v26 }
 0x584   :  { %v1142_v9 = vadd.f32 1.0, %v1302_v60 }
 0x586   :  { %1305 = vrcp.f32 %v1142_v9  ;;  %v1154_v29 = vand.u32 2147483648, %v1142_v9  ;;  %vm1148_vm15 = vweird.f32 %v1142_v9  ;;  %v1152_v32 = vand.u32 2147483647, %v1142_v9 }
 0x588   :  { %v1155_v19 = vor.u32 1.1754944e-38, %v1154_v29  ;;  %vm1153_vm1 = vcmp.eq.f32.partialorder %v1152_v32, 8.507059e+37 }
 0x589   :  { %v1304_v24 = vpop.eup %1303 }
 0x58a   :  { %v1122_v59 = vadd.f32 1.0, %v1304_v24 }
 0x58c   :  { %1307 = vrcp.f32 %v1122_v59  ;;  %v1306_v33 = vpop.eup %1305  ;;  %v1134_v63 = vand.u32 2147483648, %v1122_v59  ;;  %v1132_v36 = vand.u32 2147483647, %v1122_v59  ;;  %vm1128_vm11 = vweird.f32 %v1122_v59 }
 0x58d   :  { %v1144_v2 = vmul.f32 %v1306_v33, %v1142_v9  ;;  %vm1149_vm14 = vweird.f32 %v1306_v33 }
 0x58e   :  { %v1135_v20 = vor.u32 1.1754944e-38, %v1134_v63  ;;  %vm1133_vm13 = vcmp.eq.f32.partialorder %v1132_v36, 8.507059e+37  ;;  %vm1150_vm0 = vmor %vm1148_vm15, %vm1149_vm14 }
 0x58f   :  { %v1145_v13 = vsub.f32 1.0, %v1144_v2 }
 0x591   :  { %v1146_v45 = vmul.f32 %v1306_v33, %v1145_v13 }
 0x592   :  { %v1308_v12 = vpop.eup %1307 }
 0x593   :  { %v1124_v48 = vmul.f32 %v1308_v12, %v1122_v59  ;;  %vm1129_vm10 = vweird.f32 %v1308_v12  ;;  %v1147_v23 = vadd.f32 %v1306_v33, %v1146_v45 }
 0x594   :  { %vm1130_vm12 = vmor %vm1128_vm11, %vm1129_vm10 }
 0x595   :  { %v1125_v31 = vsub.f32 1.0, %v1124_v48  ;;  %v1151_v14 = vsel %vm1150_vm0, %v1306_v33, %v1147_v23 }
 0x596   :  { %v1156_v35 = vsel %vm1153_vm1, %v1155_v19, %v1151_v14 }
 0x597   :  { %v1126_v11 = vmul.f32 %v1308_v12, %v1125_v31  ;;  %v1162_v5 = vsub.f32 1.0, %v1156_v35  ;;  %v1164_v42 = vmul.f32 %v1156_v35, %v1053_v43 }
 0x599   :  { %v1127_v18 = vadd.f32 %v1308_v12, %v1126_v11 }
 0x59b   :  { %v1131_v22 = vsel %vm1130_vm12, %v1308_v12, %v1127_v18 }
 0x59c   :  { %v1136_v25 = vsel %vm1133_vm13, %v1135_v20, %v1131_v22 }
 0x59d   :  { %v1159_v30 = vmul.f32 %v1158_v21, %v1136_v25 }
 0x59f   :  { %v1160_v15 = vadd.f32 %v1159_v30, %v220_v27 }
 0x5a1   :  { %1309 = vtanh.f32 %v1160_v15 }
 0x5a7   :  { %v1310_v40 = vpop.eup %1309 }
 0x5a8   :  { %v1163_v44 = vmul.f32 %v1310_v40, %v1162_v5 }
 0x5aa   :  { %v1165_v46 = vadd.f32 %v1164_v42, %v1163_v44 }
 0x5ac   :  { %1223 = vst [vmem:[%s2205_s5 + $0x38] sm:$0xff] %v1165_v46 }
 0x5ad   :  { %1173 = vsyncpa [#allocation4], 1 }

// kernel: gru_model_forward.3
= control target key start
LH: loop header
LB: loop body
LE: loop exit
PB: predicated region body
PF: predicated region fallthrough
CT: control target
= control target key end

     0   :  { %12 = vsyncpa [#allocation4], 0  ;;  %s2322_s0 = inlined_call_operand.vmem [shape: f32[8,8,128], index: 0, kind: input, shape index: {}]   ;;  %s2323_s1 = inlined_call_operand.hbm [shape: f32[128,384], index: 1, kind: input, shape index: {}]   ;;  %s2324_s2 = inlined_call_operand.vmem [shape: f32[1,384], index: 2, kind: input, shape index: {}]   ;;  %s2325_s3 = inlined_call_operand.hbm [shape: f32[128,384], index: 3, kind: input, shape index: {}]   ;;  %s2326_s4 = inlined_call_operand.vmem [shape: f32[1,128], index: 4, kind: input, shape index: {}]   ;;  %s2327_s5 = inlined_call_operand.hbm [shape: f32[128,128], index: 5, kind: input, shape index: {}]   ;;  %s2328_s6 = inlined_call_operand.vmem [shape: f32[1,128], index: 6, kind: input, shape index: {}]   ;;  %s2329_s7 = inlined_call_operand.vmem [shape: f32[8,128], index: 7, kind: output, shape index: {}]  }
   0x1   :  { %13 = vsyncpa [#allocation6], 0  ;;  %s35_s26 = sshll.u32 %s2325_s3, 4  ;;  %s1479_s27 = smov [#allocation5]   ;;  %s36_s26 = int_to_ptr.hbm [resolvable:$true] %s35_s26 }
   0x2   :  { %s37_s28 = sshll.u32 %s1479_s27, 4  ;;  %s20_s8 = sshll.u32 %s2323_s1, 4  ;;  %s38_s28 = int_to_ptr.vmem [resolvable:$true] %s37_s28  ;;  %s21_s8 = int_to_ptr.hbm [resolvable:$true] %s20_s8 }
   0x3   :  { %s1480_s9 = smov 384   ;;  %s1481_s10 = smov 24  }
   0x4   :  { %43 = dma.hbm_to_vmem [thread:$0]  %s36_s26, 6144, %s38_s28, [#allocation6], %s1480_s9, %s1480_s9, %s1481_s10  }
   0x5   :  { %s1482_s11 = smov [#allocation3]   ;;  %s50_s15 = sshll.u32 %s2327_s5, 4  ;;  %s51_s15 = int_to_ptr.hbm [resolvable:$true] %s50_s15 }
   0x6   :  { %s22_s12 = sshll.u32 %s1482_s11, 4  ;;  %s1483_s3 = smov [#allocation7]   ;;  %s23_s12 = int_to_ptr.vmem [resolvable:$true] %s22_s12 }
   0x7   :  { %28 = dma.hbm_to_vmem [thread:$0]  %s21_s8, 6144, %s23_s12, [#allocation4], %s1480_s9, %s1480_s9, %s1481_s10  }
   0x8   :  { %s52_s16 = sshll.u32 %s1483_s3, 4  ;;  %s1484_s17 = smov 128   ;;  %s53_s16 = int_to_ptr.vmem [resolvable:$true] %s52_s16 }
   0x9   :  { %s1485_s18 = smov 8  }
   0xa   :  { %58 = dma.hbm_to_vmem [thread:$0]  %s51_s15, 2048, %s53_s16, [#allocation6], %s1484_s17, %s1484_s17, %s1485_s18  }
   0xb   :  { %1475 = dma.done.wait [#allocation4], 6144  }
   0xc   :  { %1476 = vsyncadd [#allocation4], 4294961152 }
   0xd   :  { %1477 = dma.done.wait [#allocation6], 8192  }
   0xe   :  { %1478 = vsyncadd [#allocation6], 4294959104  ;;  %v123_v0 = vld [vmem:[#allocation3 + $0x168] sm:$0xff]  ;;  %v120_v2 = vld [vmem:[#allocation3 + $0x150] sm:$0xff]  ;;  %v1486_v47 = vmov 0.0  }
   0xf   :  { %v1536_v1 = vld [vmem:[#allocation5 + $0x168] sm:$0xff]  ;;  %142 = vmatpush.msra.mxu0 %v123_v0  ;;  %v1539_v3 = vld [vmem:[#allocation5 + $0x150] sm:$0xff]  ;;  %v117_v4 = vld [vmem:[#allocation3 + $0x138] sm:$0xff] }
  0x10   :  { %315 = vmatpush.msra.mxu3 %v1536_v1  ;;  %v1541_v5 = vld [vmem:[#allocation5 + $0x138] sm:$0xff]  ;;  %v114_v6 = vld [vmem:[#allocation3 + $0x120] sm:$0xff]  ;;  %v111_v8 = vld [vmem:[#allocation3 + $0x108] sm:$0xff] }
  0x11   :  { %143 = vmatpush.msra.mxu0 %v120_v2  ;;  %v1544_v7 = vld [vmem:[#allocation5 + $0x120] sm:$0xff]  ;;  %v1547_v9 = vld [vmem:[#allocation5 + $0x108] sm:$0xff]  ;;  %v108_v10 = vld [vmem:[#allocation3 + $0xf0] sm:$0xff] }
  0x12   :  { %316 = vmatpush.msra.mxu3 %v1539_v3  ;;  %v1550_v11 = vld [vmem:[#allocation5 + $0xf0] sm:$0xff]  ;;  %v105_v12 = vld [vmem:[#allocation3 + $0xd8] sm:$0xff]  ;;  %v102_v14 = vld [vmem:[#allocation3 + $0xc0] sm:$0xff] }
  0x13   :  { %144 = vmatpush.msra.mxu0 %v117_v4  ;;  %v1553_v13 = vld [vmem:[#allocation5 + $0xd8] sm:$0xff]  ;;  %v1556_v15 = vld [vmem:[#allocation5 + $0xc0] sm:$0xff]  ;;  %v124_v16 = vld [vmem:[#allocation3 + $0x170] sm:$0xff] }
  0x14   :  { %317 = vmatpush.msra.mxu3 %v1541_v5  ;;  %v121_v17 = vld [vmem:[#allocation3 + $0x158] sm:$0xff]  ;;  %v99_v18 = vld [vmem:[#allocation3 + $0xa8] sm:$0xff]  ;;  %183 = vmatpush.msra.mxu1 %v124_v16  ;;  %v118_v20 = vld [vmem:[#allocation3 + $0x140] sm:$0xff] }
  0x15   :  { %145 = vmatpush.msra.mxu0 %v114_v6  ;;  %v1559_v19 = vld [vmem:[#allocation5 + $0xa8] sm:$0xff]  ;;  %v96_v21 = vld [vmem:[#allocation3 + $0x90] sm:$0xff]  ;;  %v93_v24 = vld [vmem:[#allocation3 + $0x78] sm:$0xff] }
  0x16   :  { %318 = vmatpush.msra.mxu3 %v1544_v7  ;;  %v1562_v22 = vld [vmem:[#allocation5 + $0x90] sm:$0xff]  ;;  %184 = vmatpush.msra.mxu1 %v121_v17  ;;  %v115_v23 = vld [vmem:[#allocation3 + $0x128] sm:$0xff]  ;;  %v1565_v25 = vld [vmem:[#allocation5 + $0x78] sm:$0xff] }
  0x17   :  { %146 = vmatpush.msra.mxu0 %v111_v8  ;;  %v90_v26 = vld [vmem:[#allocation3 + $0x60] sm:$0xff]  ;;  %v112_v27 = vld [vmem:[#allocation3 + $0x110] sm:$0xff]  ;;  %v109_v29 = vld [vmem:[#allocation3 + $0xf8] sm:$0xff] }
  0x18   :  { %319 = vmatpush.msra.mxu3 %v1547_v9  ;;  %185 = vmatpush.msra.mxu1 %v118_v20  ;;  %v1568_v28 = vld [vmem:[#allocation5 + $0x60] sm:$0xff]  ;;  %v87_v30 = vld [vmem:[#allocation3 + $0x48] sm:$0xff]  ;;  %v84_v33 = vld [vmem:[#allocation3 + $0x30] sm:$0xff] }
  0x19   :  { %147 = vmatpush.msra.mxu0 %v108_v10  ;;  %v1571_v31 = vld [vmem:[#allocation5 + $0x48] sm:$0xff]  ;;  %v106_v32 = vld [vmem:[#allocation3 + $0xe0] sm:$0xff]  ;;  %v1574_v34 = vld [vmem:[#allocation5 + $0x30] sm:$0xff] }
  0x1a   :  { %320 = vmatpush.msra.mxu3 %v1550_v11  ;;  %186 = vmatpush.msra.mxu1 %v115_v23  ;;  %v103_v35 = vld [vmem:[#allocation3 + $0xc8] sm:$0xff]  ;;  %v81_v36 = vld [vmem:[#allocation3 + $0x18] sm:$0xff]  ;;  %v100_v38 = vld [vmem:[#allocation3 + $0xb0] sm:$0xff] }
  0x1b   :  { %148 = vmatpush.msra.mxu0 %v105_v12  ;;  %v1577_v37 = vld [vmem:[#allocation5 + $0x18] sm:$0xff]  ;;  %v78_v39 = vld [vmem:[#allocation3] sm:$0xff]  ;;  %v1588_v43 = vld [vmem:[#allocation5 + $0x170] sm:$0xff] }
  0x1c   :  { %321 = vmatpush.msra.mxu3 %v1553_v13  ;;  %187 = vmatpush.msra.mxu1 %v112_v27  ;;  %2356 = vst [vmem:[#allocation10_spill] sm:$0xff] %v1577_v37  ;;  %v1580_v40 = vld [vmem:[#allocation5] sm:$0xff]  ;;  %v125_v42 = vld [vmem:[#allocation3 + $0x178] sm:$0xff]  ;;  %v119_v51 = vld [vmem:[#allocation3 + $0x148] sm:$0xff] }
  0x1d   :  { %149 = vmatpush.msra.mxu0 %v102_v14  ;;  %2357 = vst [vmem:[#allocation11_spill] sm:$0xff] %v1580_v40  ;;  %v1586_v41 = vld [vmem:[%s2322_s0] sm:$0xff]  ;;  %v1590_v44 = vld [vmem:[#allocation5 + $0x178] sm:$0xff]  ;;  %224 = vmatpush.msra.mxu2 %v125_v42  ;;  %v1603_v53 = vld [vmem:[#allocation5 + $0x148] sm:$0xff] }
  0x1e   :  { %322 = vmatpush.msra.mxu3 %v1556_v15  ;;  %188 = vmatpush.msra.mxu1 %v109_v29  ;;  %v97_v45 = vld [vmem:[#allocation3 + $0x98] sm:$0xff]  ;;  %v122_v46 = vld [vmem:[#allocation3 + $0x160] sm:$0xff]  ;;  %v91_v54 = vld [vmem:[#allocation3 + $0x68] sm:$0xff] }
  0x1f   :  { %150 = vmatpush.msra.mxu0 %v99_v18  ;;  %v1595_v48 = vld [vmem:[#allocation5 + $0x158] sm:$0xff]  ;;  %v1597_v49 = vld [vmem:[#allocation5 + $0x160] sm:$0xff]  ;;  %225 = vmatpush.msra.mxu2 %v122_v46  ;;  %v116_v55 = vld [vmem:[#allocation3 + $0x130] sm:$0xff] }
  0x20   :  { %323 = vmatpush.msra.mxu3 %v1559_v19  ;;  %189 = vmatpush.msra.mxu1 %v106_v32  ;;  %v94_v50 = vld [vmem:[#allocation3 + $0x80] sm:$0xff]  ;;  %v1607_v56 = vld [vmem:[#allocation5 + $0x128] sm:$0xff]  ;;  %v1609_v57 = vld [vmem:[#allocation5 + $0x130] sm:$0xff] }
  0x21   :  { %151 = vmatpush.msra.mxu0 %v96_v21  ;;  %v1601_v52 = vld [vmem:[#allocation5 + $0x140] sm:$0xff]  ;;  %226 = vmatpush.msra.mxu2 %v119_v51  ;;  %v1615_v58 = vld [vmem:[%s2322_s0 + $0x8] sm:$0xff]  ;;  %v88_v59 = vld [vmem:[#allocation3 + $0x50] sm:$0xff] }
  0x22   :  { %324 = vmatpush.msra.mxu3 %v1562_v22  ;;  %190 = vmatpush.msra.mxu1 %v103_v35  ;;  %v1618_v60 = vld [vmem:[#allocation5 + $0x110] sm:$0xff]  ;;  %v1620_v61 = vld [vmem:[#allocation5 + $0x118] sm:$0xff]  ;;  %v1627_v2 = vld [vmem:[#allocation5 + $0x100] sm:$0xff] }
  0x23   :  { %152 = vmatpush.msra.mxu0 %v93_v24  ;;  %227 = vmatpush.msra.mxu2 %v116_v55  ;;  %v85_v62 = vld [vmem:[#allocation3 + $0x38] sm:$0xff]  ;;  %v82_v4 = vld [vmem:[#allocation3 + $0x20] sm:$0xff]  ;;  %v1633_v10 = vld [vmem:[#allocation5 + $0xe8] sm:$0xff] }
  0x24   :  { %325 = vmatpush.msra.mxu3 %v1565_v25  ;;  %191 = vmatpush.msra.mxu1 %v100_v38  ;;  %v113_v63 = vld [vmem:[#allocation3 + $0x118] sm:$0xff]  ;;  %v110_v6 = vld [vmem:[#allocation3 + $0x100] sm:$0xff]  ;;  %v79_v12 = vld [vmem:[#allocation3 + $0x8] sm:$0xff] }
  0x25   :  { %153 = vmatpush.msra.mxu0 %v90_v26  ;;  %v1625_v0 = vld [vmem:[#allocation5 + $0xf8] sm:$0xff]  ;;  %v1631_v8 = vld [vmem:[#allocation5 + $0xe0] sm:$0xff]  ;;  %228 = vmatpush.msra.mxu2 %v113_v63  ;;  %v107_v14 = vld [vmem:[#allocation3 + $0xe8] sm:$0xff] }
  0x26   :  { %326 = vmatpush.msra.mxu3 %v1568_v28  ;;  %192 = vmatpush.msra.mxu1 %v97_v45  ;;  %v1637_v16 = vld [vmem:[#allocation5 + $0xc8] sm:$0xff]  ;;  %v1639_v17 = vld [vmem:[#allocation5 + $0xd0] sm:$0xff]  ;;  %v1650_v21 = vld [vmem:[#allocation5 + $0xb8] sm:$0xff] }
  0x27   :  { %154 = vmatpush.msra.mxu0 %v87_v30  ;;  %229 = vmatpush.msra.mxu2 %v110_v6  ;;  %v1645_v18 = vld [vmem:[%s2322_s0 + $0x10] sm:$0xff]  ;;  %v1655_v24 = vld [vmem:[#allocation5 + $0x98] sm:$0xff]  ;;  %v1658_v26 = vld [vmem:[#allocation5 + $0xa0] sm:$0xff] }
  0x28   :  { %327 = vmatpush.msra.mxu3 %v1571_v31  ;;  %193 = vmatpush.msra.mxu1 %v94_v50  ;;  %v1648_v20 = vld [vmem:[#allocation5 + $0xb0] sm:$0xff]  ;;  %v101_v27 = vld [vmem:[#allocation3 + $0xb8] sm:$0xff]  ;;  %v1662_v29 = vld [vmem:[#allocation5 + $0x80] sm:$0xff] }
  0x29   :  { %155 = vmatpush.msra.mxu0 %v84_v33  ;;  %230 = vmatpush.msra.mxu2 %v107_v14  ;;  %v104_v23 = vld [vmem:[#allocation3 + $0xd0] sm:$0xff]  ;;  %v1664_v30 = vld [vmem:[#allocation5 + $0x88] sm:$0xff]  ;;  %v98_v32 = vld [vmem:[#allocation3 + $0xa0] sm:$0xff] }
  0x2a   :  { %328 = vmatpush.msra.mxu3 %v1574_v34  ;;  %194 = vmatpush.msra.mxu1 %v91_v54  ;;  %v1669_v33 = vld [vmem:[#allocation5 + $0x68] sm:$0xff]  ;;  %v1671_v35 = vld [vmem:[#allocation5 + $0x70] sm:$0xff]  ;;  %v1683_v42 = vld [vmem:[#allocation5 + $0x58] sm:$0xff] }
  0x2b   :  { %156 = vmatpush.msra.mxu0 %v81_v36  ;;  %231 = vmatpush.msra.mxu2 %v104_v23  ;;  %v1678_v36 = vld [vmem:[%s2322_s0 + $0x18] sm:$0xff]  ;;  %v95_v38 = vld [vmem:[#allocation3 + $0x88] sm:$0xff]  ;;  %v92_v45 = vld [vmem:[#allocation3 + $0x70] sm:$0xff] }
  0x2c   :  { %329 = vmatpush.msra.mxu3 %v1577_v37  ;;  %195 = vmatpush.msra.mxu1 %v88_v59  ;;  %v1689_v46 = vld [vmem:[#allocation5 + $0x38] sm:$0xff]  ;;  %v1691_v50 = vld [vmem:[#allocation5 + $0x40] sm:$0xff]  ;;  %v1697_v55 = vld [vmem:[#allocation5 + $0x28] sm:$0xff] }
  0x2d   :  { %157 = vmatpush.msra.mxu0 %v78_v39  ;;  %232 = vmatpush.msra.mxu2 %v101_v27  ;;  %v1681_v39 = vld [vmem:[#allocation5 + $0x50] sm:$0xff]  ;;  %2358 = vst [vmem:[#allocation12_spill] sm:$0xff] %v1689_v46  ;;  %v89_v51 = vld [vmem:[#allocation3 + $0x58] sm:$0xff]  ;;  %v1695_v54 = vld [vmem:[#allocation5 + $0x20] sm:$0xff] }
  0x2e   :  { %330 = vmatpush.msra.mxu3 %v1580_v40  ;;  %158 = vmatmul.f32.vlgmr.msra.gmra.mxu0 %v1586_v41  ;;  %2359 = vst [vmem:[#allocation13_spill] sm:$0xff] %v1695_v54  ;;  %v86_v59 = vld [vmem:[#allocation3 + $0x40] sm:$0xff]  ;;  %v1704_v63 = vld [vmem:[#allocation5 + $0x10] sm:$0xff]  ;;  %v83_v6 = vld [vmem:[#allocation3 + $0x28] sm:$0xff] }
  0x2f   :  { %331 = vmatmul.f32.vlgmr.msra.gmra.mxu3 %v1486_v47  ;;  %355 = vmatpush.msrb.mxu0 %v1590_v44  ;;  %2360 = vst [vmem:[#allocation14_spill] sm:$0xff] %v1697_v55  ;;  %v1728_v14 = vld [vmem:[%s2322_s0 + $0x28] sm:$0xff] }
  0x30   :  { %335 = vmatpush.msrb.mxu3 %v1588_v43  ;;  %196 = vmatpush.msra.mxu1 %v85_v62  ;;  %v1702_v62 = vld [vmem:[#allocation5 + $0x8] sm:$0xff]  ;;  %2362 = vst [vmem:[#allocation16_spill] sm:$0xff] %v1704_v63 }
  0x31   :  { %356 = vmatpush.msrb.mxu0 %v1597_v49  ;;  %233 = vmatpush.msra.mxu2 %v98_v32  ;;  %2361 = vst [vmem:[#allocation15_spill] sm:$0xff] %v1702_v62 }
  0x32   :  { %336 = vmatpush.msrb.mxu3 %v1595_v48  ;;  %197 = vmatpush.msra.mxu1 %v82_v4  ;;  %v1711_v4 = vld [vmem:[%s2322_s0 + $0x20] sm:$0xff] }
  0x33   :  { %357 = vmatpush.msrb.mxu0 %v1603_v53  ;;  %234 = vmatpush.msra.mxu2 %v95_v38 }
  0x34   :  { %337 = vmatpush.msrb.mxu3 %v1601_v52  ;;  %198 = vmatpush.msra.mxu1 %v79_v12  ;;  %v80_v12 = vld [vmem:[#allocation3 + $0x10] sm:$0xff] }
  0x35   :  { %358 = vmatpush.msrb.mxu0 %v1609_v57  ;;  %199 = vmatmul.f32.vlgmr.msra.gmra.mxu1 %v1586_v41 }
  0x36   :  { %338 = vmatpush.msrb.mxu3 %v1607_v56  ;;  %161 = vmatmul.f32.gmra.mxu0 %v1615_v58 }
  0x37   :  { %359 = vmatpush.msrb.mxu0 %v1620_v61  ;;  %428 = vmatpush.msrb.mxu1 %v1536_v1 }
  0x38   :  { %339 = vmatpush.msrb.mxu3 %v1618_v60  ;;  %235 = vmatpush.msra.mxu2 %v92_v45 }
  0x39   :  { %360 = vmatpush.msrb.mxu0 %v1627_v2  ;;  %429 = vmatpush.msrb.mxu1 %v1539_v3 }
  0x3a   :  { %340 = vmatpush.msrb.mxu3 %v1625_v0  ;;  %236 = vmatpush.msra.mxu2 %v89_v51 }
  0x3b   :  { %361 = vmatpush.msrb.mxu0 %v1633_v10  ;;  %430 = vmatpush.msrb.mxu1 %v1541_v5 }
  0x3c   :  { %341 = vmatpush.msrb.mxu3 %v1631_v8  ;;  %237 = vmatpush.msra.mxu2 %v86_v59 }
  0x3d   :  { %362 = vmatpush.msrb.mxu0 %v1639_v17  ;;  %202 = vmatmul.f32.gmra.mxu1 %v1615_v58 }
  0x3e   :  { %342 = vmatpush.msrb.mxu3 %v1637_v16  ;;  %164 = vmatmul.f32.gmra.mxu0 %v1645_v18 }
  0x3f   :  { %363 = vmatpush.msrb.mxu0 %v1650_v21  ;;  %431 = vmatpush.msrb.mxu1 %v1544_v7 }
  0x40   :  { %343 = vmatpush.msrb.mxu3 %v1648_v20  ;;  %238 = vmatpush.msra.mxu2 %v83_v6 }
  0x41   :  { %364 = vmatpush.msrb.mxu0 %v1658_v26  ;;  %432 = vmatpush.msrb.mxu1 %v1547_v9 }
  0x42   :  { %344 = vmatpush.msrb.mxu3 %v1655_v24  ;;  %239 = vmatpush.msra.mxu2 %v80_v12 }
  0x43   :  { %365 = vmatpush.msrb.mxu0 %v1664_v30  ;;  %433 = vmatpush.msrb.mxu1 %v1550_v11 }
  0x44   :  { %345 = vmatpush.msrb.mxu3 %v1662_v29  ;;  %240 = vmatmul.f32.vlgmr.msra.gmra.mxu2 %v1586_v41  ;;  %v1749_v41 = vld [vmem:[%s2322_s0 + $0x30] sm:$0xff] }
  0x45   :  { %366 = vmatpush.msrb.mxu0 %v1671_v35  ;;  %205 = vmatmul.f32.gmra.mxu1 %v1645_v18 }
  0x46   :  { %346 = vmatpush.msrb.mxu3 %v1669_v33  ;;  %167 = vmatmul.f32.gmra.mxu0 %v1678_v36 }
  0x47   :  { %367 = vmatpush.msrb.mxu0 %v1683_v42  ;;  %434 = vmatpush.msrb.mxu1 %v1553_v13 }
  0x48   :  { %347 = vmatpush.msrb.mxu3 %v1681_v39  ;;  %448 = vmatpush.msrb.mxu2 %v1588_v43 }
  0x49   :  { %368 = vmatpush.msrb.mxu0 %v1691_v50  ;;  %435 = vmatpush.msrb.mxu1 %v1556_v15 }
  0x4a   :  { %348 = vmatpush.msrb.mxu3 %v1689_v46  ;;  %449 = vmatpush.msrb.mxu2 %v1595_v48 }
  0x4b   :  { %369 = vmatpush.msrb.mxu0 %v1697_v55  ;;  %436 = vmatpush.msrb.mxu1 %v1559_v19 }
  0x4c   :  { %349 = vmatpush.msrb.mxu3 %v1695_v54  ;;  %450 = vmatpush.msrb.mxu2 %v1601_v52 }
  0x4d   :  { %370 = vmatpush.msrb.mxu0 %v1704_v63  ;;  %437 = vmatpush.msrb.mxu1 %v1562_v22 }
  0x4e   :  { %350 = vmatpush.msrb.mxu3 %v1702_v62  ;;  %170 = vmatmul.f32.gmra.mxu0 %v1711_v4 }
  0x4f   :  { %351 = vmatmul.f32.vlgmr.msrb.gmra.mxu3 %v1486_v47  ;;  %538 = vmatpush.msra.mxu0 %v1536_v1 }
  0x50   :  { %468 = vmatpush.msra.mxu3 %v1590_v44  ;;  %208 = vmatmul.f32.gmra.mxu1 %v1678_v36 }
  0x51   :  { %451 = vmatpush.msrb.mxu2 %v1607_v56  ;;  %438 = vmatpush.msrb.mxu1 %v1565_v25 }
  0x52   :  { %469 = vmatpush.msra.mxu3 %v1597_v49  ;;  %243 = vmatmul.f32.gmra.mxu2 %v1615_v58  ;;  %v1770_v58 = vld [vmem:[%s2322_s0 + $0x38] sm:$0xff] }
  0x53   :  { %452 = vmatpush.msrb.mxu2 %v1618_v60  ;;  %439 = vmatpush.msrb.mxu1 %v1568_v28 }
  0x54   :  { %470 = vmatpush.msra.mxu3 %v1603_v53  ;;  %539 = vmatpush.msra.mxu0 %v1539_v3 }
  0x55   :  { %453 = vmatpush.msrb.mxu2 %v1625_v0  ;;  %440 = vmatpush.msrb.mxu1 %v1571_v31 }
  0x56   :  { %173 = vmatmul.f32.gmra.mxu0 %v1728_v14  ;;  %471 = vmatpush.msra.mxu3 %v1609_v57 }
  0x57   :  { %454 = vmatpush.msrb.mxu2 %v1631_v8  ;;  %441 = vmatpush.msrb.mxu1 %v1574_v34 }
  0x58   :  { %472 = vmatpush.msra.mxu3 %v1620_v61  ;;  %211 = vmatmul.f32.gmra.mxu1 %v1711_v4 }
  0x59   :  { %455 = vmatpush.msrb.mxu2 %v1637_v16  ;;  %442 = vmatpush.msrb.mxu1 %v1577_v37 }
  0x5a   :  { %473 = vmatpush.msra.mxu3 %v1627_v2  ;;  %246 = vmatmul.f32.gmra.mxu2 %v1645_v18  ;;  %v134_v18 = vld [vmem:[%s2324_s2] sm:$0x7] }
  0x5b   :  { %456 = vmatpush.msrb.mxu2 %v1648_v20  ;;  %443 = vmatpush.msrb.mxu1 %v1580_v40  ;;  %v136_v23 = vperm.slane %v134_v18, 0 }
  0x5c   :  { %474 = vmatpush.msra.mxu3 %v1633_v10  ;;  %540 = vmatpush.msra.mxu0 %v1541_v5 }
  0x5d   :  { %558 = vmatpush.msra.mxu1 %v1588_v43  ;;  %457 = vmatpush.msrb.mxu2 %v1655_v24 }
  0x5e   :  { %176 = vmatmul.f32.gmra.mxu0 %v1749_v41  ;;  %475 = vmatpush.msra.mxu3 %v1639_v17 }
  0x5f   :  { %458 = vmatpush.msrb.mxu2 %v1662_v29  ;;  %559 = vmatpush.msra.mxu1 %v1595_v48 }
  0x60   :  { %476 = vmatpush.msra.mxu3 %v1650_v21  ;;  %214 = vmatmul.f32.gmra.mxu1 %v1728_v14 }
  0x61   :  { %459 = vmatpush.msrb.mxu2 %v1669_v33  ;;  %560 = vmatpush.msra.mxu1 %v1601_v52 }
  0x62   :  { %477 = vmatpush.msra.mxu3 %v1658_v26  ;;  %249 = vmatmul.f32.gmra.mxu2 %v1678_v36 }
  0x63   :  { %460 = vmatpush.msrb.mxu2 %v1681_v39  ;;  %541 = vmatpush.msra.mxu0 %v1544_v7 }
  0x64   :  { %478 = vmatpush.msra.mxu3 %v1664_v30  ;;  %561 = vmatpush.msra.mxu1 %v1607_v56 }
  0x65   :  { %461 = vmatpush.msrb.mxu2 %v1689_v46  ;;  %542 = vmatpush.msra.mxu0 %v1547_v9 }
  0x66   :  { %179 = vmatmul.f32.gmra.mxu0 %v1770_v58  ;;  %479 = vmatpush.msra.mxu3 %v1671_v35 }
  0x67   :  { %462 = vmatpush.msrb.mxu2 %v1695_v54  ;;  %562 = vmatpush.msra.mxu1 %v1618_v60 }
  0x68   :  { %480 = vmatpush.msra.mxu3 %v1683_v42  ;;  %217 = vmatmul.f32.gmra.mxu1 %v1749_v41 }
  0x69   :  { %543 = vmatpush.msra.mxu0 %v1550_v11  ;;  %463 = vmatpush.msrb.mxu2 %v1702_v62 }
  0x6a   :  { %481 = vmatpush.msra.mxu3 %v1691_v50  ;;  %563 = vmatpush.msra.mxu1 %v1625_v0 }
  0x6b   :  { %252 = vmatmul.f32.gmra.mxu2 %v1711_v4  ;;  %544 = vmatpush.msra.mxu0 %v1553_v13 }
  0x6c   :  { %482 = vmatpush.msra.mxu3 %v1697_v55  ;;  %578 = vmatpush.msra.mxu2 %v1590_v44 }
  0x6d   :  { %564 = vmatpush.msra.mxu1 %v1631_v8  ;;  %545 = vmatpush.msra.mxu0 %v1556_v15 }
  0x6e   :  { %371 = vmatmul.f32.vlgmr.msrb.gmra.mxu0 %v1486_v47  ;;  %483 = vmatpush.msra.mxu3 %v1704_v63 }
  0x6f   :  { %579 = vmatpush.msra.mxu2 %v1597_v49  ;;  %565 = vmatpush.msra.mxu1 %v1637_v16 }
  0x70   :  { %648 = vmatpush.msrb.mxu3 %v1536_v1  ;;  %546 = vmatpush.msra.mxu0 %v1559_v19 }
  0x71   :  { %580 = vmatpush.msra.mxu2 %v1603_v53  ;;  %566 = vmatpush.msra.mxu1 %v1648_v20 }
  0x72   :  { %649 = vmatpush.msrb.mxu3 %v1539_v3  ;;  %220 = vmatmul.f32.gmra.mxu1 %v1770_v58 }
  0x73   :  { %547 = vmatpush.msra.mxu0 %v1562_v22  ;;  %581 = vmatpush.msra.mxu2 %v1609_v57 }
  0x74   :  { %567 = vmatpush.msra.mxu1 %v1655_v24  ;;  %255 = vmatmul.f32.gmra.mxu2 %v1728_v14 }
  0x75   :  { %548 = vmatpush.msra.mxu0 %v1565_v25  ;;  %582 = vmatpush.msra.mxu2 %v1620_v61 }
  0x76   :  { %568 = vmatpush.msra.mxu1 %v1662_v29  ;;  %650 = vmatpush.msrb.mxu3 %v1541_v5 }
  0x77   :  { %549 = vmatpush.msra.mxu0 %v1568_v28  ;;  %583 = vmatpush.msra.mxu2 %v1627_v2 }
  0x78   :  { %569 = vmatpush.msra.mxu1 %v1669_v33  ;;  %651 = vmatpush.msrb.mxu3 %v1544_v7 }
  0x79   :  { %550 = vmatpush.msra.mxu0 %v1571_v31  ;;  %584 = vmatpush.msra.mxu2 %v1633_v10 }
  0x7a   :  { %570 = vmatpush.msra.mxu1 %v1681_v39  ;;  %652 = vmatpush.msrb.mxu3 %v1547_v9 }
  0x7b   :  { %551 = vmatpush.msra.mxu0 %v1574_v34  ;;  %585 = vmatpush.msra.mxu2 %v1639_v17 }
  0x7c   :  { %571 = vmatpush.msra.mxu1 %v1689_v46  ;;  %258 = vmatmul.f32.gmra.mxu2 %v1749_v41  ;;  %v1884_v41 = vperm.slane %v134_v18, 1 }
  0x7d   :  { %552 = vmatpush.msra.mxu0 %v1577_v37  ;;  %586 = vmatpush.msra.mxu2 %v1650_v21 }
  0x7e   :  { %572 = vmatpush.msra.mxu1 %v1695_v54  ;;  %653 = vmatpush.msrb.mxu3 %v1550_v11  ;;  %2366 = vst [vmem:[#allocation20_spill] sm:$0xff] %v1884_v41 }
  0x7f   :  { %553 = vmatpush.msra.mxu0 %v1580_v40  ;;  %587 = vmatpush.msra.mxu2 %v1658_v26 }
  0x80   :  { %573 = vmatpush.msra.mxu1 %v1702_v62  ;;  %654 = vmatpush.msrb.mxu3 %v1553_v13 }
  0x81   :  { %668 = vmatpush.msrb.mxu0 %v1588_v43  ;;  %588 = vmatpush.msra.mxu2 %v1664_v30 }
  0x82   :  { %655 = vmatpush.msrb.mxu3 %v1556_v15 }
  0x83   :  { %669 = vmatpush.msrb.mxu0 %v1595_v48  ;;  %589 = vmatpush.msra.mxu2 %v1671_v35 }
  0x84   :  { %261 = vmatmul.f32.gmra.mxu2 %v1770_v58  ;;  %656 = vmatpush.msrb.mxu3 %v1559_v19 }
  0x85   :  { %670 = vmatpush.msrb.mxu0 %v1601_v52  ;;  %590 = vmatpush.msra.mxu2 %v1683_v42 }
  0x86   :  { %657 = vmatpush.msrb.mxu3 %v1562_v22 }
  0x87   :  { %671 = vmatpush.msrb.mxu0 %v1607_v56  ;;  %591 = vmatpush.msra.mxu2 %v1691_v50 }
  0x88   :  { %658 = vmatpush.msrb.mxu3 %v1565_v25 }
  0x89   :  { %672 = vmatpush.msrb.mxu0 %v1618_v60  ;;  %592 = vmatpush.msra.mxu2 %v1697_v55 }
  0x8a   :  { %659 = vmatpush.msrb.mxu3 %v1568_v28 }
  0x8b   :  { %673 = vmatpush.msrb.mxu0 %v1625_v0  ;;  %593 = vmatpush.msra.mxu2 %v1704_v63 }
  0x8c   :  { %660 = vmatpush.msrb.mxu3 %v1571_v31 }
  0x8d   :  { %674 = vmatpush.msrb.mxu0 %v1631_v8 }
  0x8e   :  { %661 = vmatpush.msrb.mxu3 %v1574_v34 }
  0x8f   :  { %675 = vmatpush.msrb.mxu0 %v1637_v16 }
  0x90   :  { %662 = vmatpush.msrb.mxu3 %v1577_v37 }
  0x91   :  { %676 = vmatpush.msrb.mxu0 %v1648_v20 }
  0x92   :  { %663 = vmatpush.msrb.mxu3 %v1580_v40 }
  0x93   :  { %677 = vmatpush.msrb.mxu0 %v1655_v24 }
  0x95   :  { %678 = vmatpush.msrb.mxu0 %v1662_v29 }
  0x97   :  { %679 = vmatpush.msrb.mxu0 %v1669_v33 }
  0x99   :  { %680 = vmatpush.msrb.mxu0 %v1681_v39 }
  0x9b   :  { %681 = vmatpush.msrb.mxu0 %v1689_v46 }
  0x9d   :  { %682 = vmatpush.msrb.mxu0 %v1695_v54 }
  0x9f   :  { %683 = vmatpush.msrb.mxu0 %v1702_v62 }
  0xab   :  { %v159_v47 = vpop.f32.mrf.mxu0 }
  0xac   :  { %v160_v38 = vadd.f32 %v159_v47, %v136_v23 }
  0xb2   :  { %v332_v36 = vpop.f32.mrf.mxu3  ;;  %v200_v62 = vpop.f32.mrf.mxu1 }
  0xb3   :  { %v162_v27 = vpop.f32.mrf.mxu0  ;;  %v375_v51 = vadd.f32 %v332_v36, %v160_v38 }
  0xb4   :  { %v1878_v32 = vadd.f32 %v162_v27, %v136_v23 }
  0xb5   :  { %v1248_v4 = vmul.f32 -1.442695, %v375_v51 }
  0xb6   :  { %2363 = vst [vmem:[#allocation17_spill] sm:$0xff] %v1878_v32  ;;  %v201_v32 = vadd.f32 %v200_v62, %v1884_v41 }
  0xb7   :  { %1274 = vpow2.f32 %v1248_v4 }
  0xbb   :  { %v165_v45 = vpop.f32.mrf.mxu0 }
  0xbc   :  { %v1880_v59 = vadd.f32 %v165_v45, %v136_v23 }
  0xbd   :  { %v1275_v14 = vpop.eup %1274 }
  0xbe   :  { %2364 = vst [vmem:[#allocation18_spill] sm:$0xff] %v1880_v59  ;;  %v379_v27 = vadd.f32 1.0, %v1275_v14  ;;  %v1893_v14 = vperm.slane %v134_v18, 2 }
  0xc0   :  { %1276 = vrcp.f32 %v379_v27  ;;  %2370 = vst [vmem:[#allocation24_spill] sm:$0xff] %v1893_v14  ;;  %vm385_vm1 = vweird.f32 %v379_v27 }
  0xc3   :  { %v168_v6 = vpop.f32.mrf.mxu0 }
  0xc4   :  { %v1882_v12 = vadd.f32 %v168_v6, %v136_v23 }
  0xc6   :  { %2365 = vst [vmem:[#allocation19_spill] sm:$0xff] %v1882_v12  ;;  %v1277_v6 = vpop.eup %1276 }
  0xc7   :  { %v241_v4 = vpop.f32.mrf.mxu2  ;;  %v381_v12 = vmul.f32 %v1277_v6, %v379_v27  ;;  %vm386_vm0 = vweird.f32 %v1277_v6 }
  0xc8   :  { %vm387_vm2 = vmor %vm385_vm1, %vm386_vm0 }
  0xcb   :  { %v171_v58 = vpop.f32.mrf.mxu0 }
  0xcc   :  { %v1886_v40 = vadd.f32 %v171_v58, %v136_v23 }
  0xce   :  { %2367 = vst [vmem:[#allocation21_spill] sm:$0xff] %v1886_v40  ;;  %v382_v40 = vsub.f32 1.0, %v381_v12  ;;  %v389_v12 = vand.u32 2147483647, %v379_v27 }
  0xd0   :  { %vm390_vm3 = vcmp.eq.f32.partialorder %v389_v12, 8.507059e+37 }
  0xd2   :  { %v352_v47 = vpop.f32.mrf.mxu3 }
  0xd3   :  { %v395_v36 = vadd.f32 %v352_v47, %v201_v32  ;;  %v174_v38 = vpop.f32.mrf.mxu0  ;;  %v383_v47 = vmul.f32 %v1277_v6, %v382_v40 }
  0xd4   :  { %v1889_v51 = vadd.f32 %v174_v38, %v136_v23 }
  0xd5   :  { %v1249_v45 = vmul.f32 -1.442695, %v395_v36  ;;  %v244_v62 = vpop.f32.mrf.mxu2  ;;  %v384_v41 = vadd.f32 %v1277_v6, %v383_v47 }
  0xd6   :  { %2368 = vst [vmem:[#allocation22_spill] sm:$0xff] %v1889_v51  ;;  %v1896_v32 = vadd.f32 %v244_v62, %v1893_v14  ;;  %v1906_v62 = vld [vmem:[%s2326_s4] ss:$0 sm:$0xff] }
  0xd7   :  { %1278 = vpow2.f32 %v1249_v45 }
  0xd8   :  { %2371 = vst [vmem:[#allocation25_spill] sm:$0xff] %v1896_v32 }
  0xdb   :  { %v177_v59 = vpop.f32.mrf.mxu0 }
  0xdc   :  { %v1891_v54 = vadd.f32 %v177_v59, %v136_v23  ;;  %v391_v59 = vand.u32 2147483648, %v379_v27 }
  0xdd   :  { %v1279_v63 = vpop.eup %1278  ;;  %v247_v37 = vpop.f32.mrf.mxu2 }
  0xde   :  { %2369 = vst [vmem:[#allocation23_spill] sm:$0xff] %v1891_v54  ;;  %v399_v58 = vadd.f32 1.0, %v1279_v63  ;;  %v1901_v63 = vadd.f32 %v247_v37, %v1893_v14  ;;  %v242_v54 = vadd.f32 %v241_v4, %v1893_v14 }
  0xe0   :  { %1280 = vrcp.f32 %v399_v58  ;;  %2373 = vst [vmem:[#allocation27_spill] sm:$0xff] %v1901_v63  ;;  %vm405_vm4 = vweird.f32 %v399_v58  ;;  %v411_v63 = vand.u32 2147483648, %v399_v58  ;;  %v409_v55 = vand.u32 2147483647, %v399_v58 }
  0xe2   :  { %vm410_vm7 = vcmp.eq.f32.partialorder %v409_v55, 8.507059e+37 }
  0xe3   :  { %v180_v36 = vpop.f32.mrf.mxu0 }
  0xe4   :  { %v1898_v38 = vadd.f32 %v180_v36, %v136_v23  ;;  %v388_v23 = vsel %vm387_vm2, %v1277_v6, %v384_v41  ;;  %v412_v6 = vor.u32 1.1754944e-38, %v411_v63 }
  0xe5   :  { %v250_v32 = vpop.f32.mrf.mxu2 }
  0xe6   :  { %2372 = vst [vmem:[#allocation26_spill] sm:$0xff] %v1898_v38  ;;  %v1281_v45 = vpop.eup %1280  ;;  %v392_v38 = vor.u32 1.1754944e-38, %v391_v59  ;;  %v1911_v46 = vadd.f32 %v250_v32, %v1893_v14 }
  0xe7   :  { %v401_v51 = vmul.f32 %v1281_v45, %v399_v58  ;;  %vm406_vm5 = vweird.f32 %v1281_v45 }
  0xe8   :  { %v393_v37 = vsel %vm390_vm3, %v392_v38, %v388_v23  ;;  %vm407_vm6 = vmor %vm405_vm4, %vm406_vm5 }
  0xe9   :  { %v402_v18 = vsub.f32 1.0, %v401_v51 }
  0xeb   :  { %v403_v40 = vmul.f32 %v1281_v45, %v402_v18  ;;  %v372_v36 = vpop.f32.mrf.mxu0 }
  0xec   :  { %v418_v47 = vadd.f32 %v1906_v62, %v372_v36 }
  0xed   :  { %v404_v51 = vadd.f32 %v1281_v45, %v403_v40 }
  0xee   :  { %v419_v27 = vmul.f32 %v418_v47, %v393_v37  ;;  %v253_v12 = vpop.f32.mrf.mxu2  ;;  %v2389_v37 = vld [vmem:[#allocation17_spill] sm:$0xff] }
  0xef   :  { %v408_v41 = vsel %vm407_vm6, %v1281_v45, %v404_v51  ;;  %v1914_v38 = vadd.f32 %v253_v12, %v1893_v14 }
  0xf0   :  { %v420_v18 = vadd.f32 %v419_v27, %v242_v54  ;;  %v413_v59 = vsel %vm410_vm7, %v412_v6, %v408_v41 }
  0xf1   :  { %v422_v4 = vsub.f32 1.0, %v413_v59  ;;  %2374 = vst [vmem:[#allocation28_spill] sm:$0xff] %v1914_v38  ;;  %v424_v36 = vmul.f32 0.0, %v413_v59 }
  0xf2   :  { %1282 = vtanh.f32 %v420_v18  ;;  %v2390_v18 = vld [vmem:[#allocation20_spill] sm:$0xff] }
  0xf7   :  { %v256_v54 = vpop.f32.mrf.mxu2 }
  0xf8   :  { %v1283_v40 = vpop.eup %1282  ;;  %v1923_v55 = vadd.f32 %v256_v54, %v1893_v14 }
  0xf9   :  { %v423_v23 = vmul.f32 %v1283_v40, %v422_v4 }
  0xfa   :  { %2375 = vst [vmem:[#allocation29_spill] sm:$0xff] %v1923_v55 }
  0xfb   :  { %v1916_v47 = vadd.f32 %v424_v36, %v423_v23 }
  0xfd   :  { %444 = vmatmul.f32.vlgmr.msrb.gmra.mxu1 %v1916_v47  ;;  %464 = vmatmul.f32.vlgmr.msrb.gmra.mxu2 %v1916_v47 }
  0xfe   :  { %484 = vmatmul.f32.vlgmr.msra.gmra.mxu3 %v1916_v47  ;;  %688 = vmatpush.msrb.mxu1 %v1590_v44 }
  0xff   :  { %758 = vmatpush.msrb.mxu2 %v1536_v1  ;;  %778 = vmatpush.msra.mxu3 %v1588_v43  ;;  %v259_v1 = vpop.f32.mrf.mxu2 }
 0x100   :  { %689 = vmatpush.msrb.mxu1 %v1597_v49  ;;  %v1938_v58 = vadd.f32 %v259_v1, %v1893_v14 }
 0x101   :  { %759 = vmatpush.msrb.mxu2 %v1539_v3  ;;  %779 = vmatpush.msra.mxu3 %v1595_v48  ;;  %v2377_v3 = vld [vmem:[#allocation12_spill] sm:$0xff] }
 0x102   :  { %690 = vmatpush.msrb.mxu1 %v1603_v53  ;;  %2376 = vst [vmem:[#allocation30_spill] sm:$0xff] %v1938_v58 }
 0x103   :  { %760 = vmatpush.msrb.mxu2 %v1541_v5  ;;  %780 = vmatpush.msra.mxu3 %v1601_v52  ;;  %v2378_v5 = vld [vmem:[#allocation14_spill] sm:$0xff] }
 0x104   :  { %691 = vmatpush.msrb.mxu1 %v1609_v57 }
 0x105   :  { %761 = vmatpush.msrb.mxu2 %v1544_v7  ;;  %781 = vmatpush.msra.mxu3 %v1607_v56  ;;  %v2379_v7 = vld [vmem:[#allocation10_spill] sm:$0xff] }
 0x106   :  { %692 = vmatpush.msrb.mxu1 %v1620_v61 }
 0x107   :  { %762 = vmatpush.msrb.mxu2 %v1547_v9  ;;  %782 = vmatpush.msra.mxu3 %v1618_v60  ;;  %v2380_v9 = vld [vmem:[#allocation13_spill] sm:$0xff]  ;;  %v1987_v45 = vpop.f32.mrf.mxu2 }
 0x108   :  { %693 = vmatpush.msrb.mxu1 %v1627_v2 }
 0x109   :  { %763 = vmatpush.msrb.mxu2 %v1550_v11  ;;  %783 = vmatpush.msra.mxu3 %v1625_v0  ;;  %v2381_v11 = vld [vmem:[#allocation16_spill] sm:$0xff] }
 0x10a   :  { %694 = vmatpush.msrb.mxu1 %v1633_v10  ;;  %2388 = vst [vmem:[#allocation16_spill] sm:$0xff] %v1987_v45 }
 0x10b   :  { %764 = vmatpush.msrb.mxu2 %v1553_v13  ;;  %784 = vmatpush.msra.mxu3 %v1631_v8  ;;  %v2382_v13 = vld [vmem:[#allocation11_spill] sm:$0xff] }
 0x10c   :  { %695 = vmatpush.msrb.mxu1 %v1639_v17 }
 0x10d   :  { %765 = vmatpush.msrb.mxu2 %v1556_v15  ;;  %785 = vmatpush.msra.mxu3 %v1637_v16  ;;  %v2383_v15 = vld [vmem:[#allocation15_spill] sm:$0xff] }
 0x10e   :  { %696 = vmatpush.msrb.mxu1 %v1650_v21 }
 0x10f   :  { %766 = vmatpush.msrb.mxu2 %v1559_v19  ;;  %786 = vmatpush.msra.mxu3 %v1648_v20  ;;  %v203_v19 = vpop.f32.mrf.mxu1 }
 0x110   :  { %697 = vmatpush.msrb.mxu1 %v1658_v26  ;;  %v204_v41 = vadd.f32 %v203_v19, %v2390_v18 }
 0x111   :  { %767 = vmatpush.msrb.mxu2 %v1562_v22  ;;  %787 = vmatpush.msra.mxu3 %v1655_v24 }
 0x112   :  { %698 = vmatpush.msrb.mxu1 %v1664_v30 }
 0x113   :  { %768 = vmatpush.msrb.mxu2 %v1565_v25  ;;  %788 = vmatpush.msra.mxu3 %v1662_v29 }
 0x114   :  { %699 = vmatpush.msrb.mxu1 %v1671_v35 }
 0x115   :  { %769 = vmatpush.msrb.mxu2 %v1568_v28  ;;  %789 = vmatpush.msra.mxu3 %v1669_v33 }
 0x116   :  { %700 = vmatpush.msrb.mxu1 %v1683_v42 }
 0x117   :  { %770 = vmatpush.msrb.mxu2 %v1571_v31  ;;  %790 = vmatpush.msra.mxu3 %v1681_v39  ;;  %v1975_v22 = vpop.f32.mrf.mxu1 }
 0x118   :  { %701 = vmatpush.msrb.mxu1 %v1691_v50 }
 0x119   :  { %771 = vmatpush.msrb.mxu2 %v1574_v34  ;;  %791 = vmatpush.msra.mxu3 %v2377_v3 }
 0x11a   :  { %702 = vmatpush.msrb.mxu1 %v2378_v5 }
 0x11b   :  { %772 = vmatpush.msrb.mxu2 %v2379_v7  ;;  %792 = vmatpush.msra.mxu3 %v2380_v9 }
 0x11c   :  { %703 = vmatpush.msrb.mxu1 %v2381_v11 }
 0x11d   :  { %773 = vmatpush.msrb.mxu2 %v2382_v13  ;;  %793 = vmatpush.msra.mxu3 %v2383_v15 }
 0x11f   :  { %v1977_v25 = vpop.f32.mrf.mxu1 }
 0x127   :  { %v1979_v28 = vpop.f32.mrf.mxu1 }
 0x128   :  { %2384 = vst [vmem:[#allocation12_spill] sm:$0xff] %v1979_v28 }
 0x12f   :  { %v1981_v31 = vpop.f32.mrf.mxu1 }
 0x130   :  { %2385 = vst [vmem:[#allocation14_spill] sm:$0xff] %v1981_v31 }
 0x137   :  { %v1983_v34 = vpop.f32.mrf.mxu1 }
 0x138   :  { %2386 = vst [vmem:[#allocation10_spill] sm:$0xff] %v1983_v34 }
 0x13f   :  { %v1985_v32 = vpop.f32.mrf.mxu1 }
 0x140   :  { %2387 = vst [vmem:[#allocation13_spill] sm:$0xff] %v1985_v32  ;;  %v2391_v32 = vld [vmem:[#allocation25_spill] sm:$0xff] }
 0x17a   :  { %v445_v63 = vpop.f32.mrf.mxu1 }
 0x17b   :  { %v488_v51 = vadd.f32 %v445_v63, %v2389_v37 }
 0x17d   :  { %v1250_v27 = vmul.f32 -1.442695, %v488_v51 }
 0x17f   :  { %1284 = vpow2.f32 %v1250_v27 }
 0x180   :  { %v465_v6 = vpop.f32.mrf.mxu2 }
 0x181   :  { %v508_v59 = vadd.f32 %v465_v6, %v204_v41  ;;  %v485_v19 = vpop.f32.mrf.mxu3 }
 0x183   :  { %v1251_v12 = vmul.f32 -1.442695, %v508_v59 }
 0x185   :  { %v1285_v4 = vpop.eup %1284  ;;  %1286 = vpow2.f32 %v1251_v12  ;;  %v528_v12 = vadd.f32 %v1906_v62, %v485_v19 }
 0x186   :  { %v492_v40 = vadd.f32 1.0, %v1285_v4 }
 0x188   :  { %1288 = vrcp.f32 %v492_v40  ;;  %v504_v13 = vand.u32 2147483648, %v492_v40  ;;  %v502_v63 = vand.u32 2147483647, %v492_v40  ;;  %vm498_vm9 = vweird.f32 %v492_v40 }
 0x18a   :  { %v505_v41 = vor.u32 1.1754944e-38, %v504_v13  ;;  %vm503_vm11 = vcmp.eq.f32.partialorder %v502_v63, 8.507059e+37 }
 0x18b   :  { %v1287_v23 = vpop.eup %1286 }
 0x18c   :  { %v512_v36 = vadd.f32 1.0, %v1287_v23 }
 0x18e   :  { %v1289_v54 = vpop.eup %1288  ;;  %1290 = vrcp.f32 %v512_v36  ;;  %vm518_vm13 = vweird.f32 %v512_v36 }
 0x18f   :  { %v494_v1 = vmul.f32 %v1289_v54, %v492_v40  ;;  %vm499_vm8 = vweird.f32 %v1289_v54 }
 0x190   :  { %vm500_vm10 = vmor %vm498_vm9, %vm499_vm8 }
 0x191   :  { %v495_v7 = vsub.f32 1.0, %v494_v1  ;;  %v524_v1 = vand.u32 2147483648, %v512_v36 }
 0x193   :  { %v496_v45 = vmul.f32 %v1289_v54, %v495_v7  ;;  %v522_v7 = vand.u32 2147483647, %v512_v36  ;;  %v525_v40 = vor.u32 1.1754944e-38, %v524_v1 }
 0x194   :  { %v1291_v37 = vpop.eup %1290 }
 0x195   :  { %v514_v51 = vmul.f32 %v1291_v37, %v512_v36  ;;  %v497_v27 = vadd.f32 %v1289_v54, %v496_v45  ;;  %vm519_vm12 = vweird.f32 %v1291_v37  ;;  %vm523_vm15 = vcmp.eq.f32.partialorder %v522_v7, 8.507059e+37 }
 0x196   :  { %vm520_vm14 = vmor %vm518_vm13, %vm519_vm12 }
 0x197   :  { %v515_v6 = vsub.f32 1.0, %v514_v51  ;;  %v501_v59 = vsel %vm500_vm10, %v1289_v54, %v497_v27 }
 0x198   :  { %v506_v4 = vsel %vm503_vm11, %v505_v41, %v501_v59 }
 0x199   :  { %v516_v23 = vmul.f32 %v1291_v37, %v515_v6  ;;  %v529_v14 = vmul.f32 %v528_v12, %v506_v4 }
 0x19b   :  { %v530_v58 = vadd.f32 %v529_v14, %v2391_v32  ;;  %v517_v34 = vadd.f32 %v1291_v37, %v516_v23  ;;  %v2000_v14 = vld [vmem:[#allocation5 + $0x168] sm:$0xff] }
 0x19d   :  { %1292 = vtanh.f32 %v530_v58  ;;  %v521_v45 = vsel %vm520_vm14, %v1291_v37, %v517_v34  ;;  %v2005_v58 = vld [vmem:[#allocation5 + $0x150] sm:$0xff] }
 0x19e   :  { %v526_v13 = vsel %vm523_vm15, %v525_v40, %v521_v45  ;;  %v2396_v45 = vld [vmem:[#allocation27_spill] sm:$0xff] }
 0x19f   :  { %v532_v54 = vsub.f32 1.0, %v526_v13  ;;  %v534_v19 = vmul.f32 %v526_v13, %v1916_v47  ;;  %v2010_v47 = vld [vmem:[#allocation5 + $0x138] sm:$0xff] }
 0x1a3   :  { %v1293_v63 = vpop.eup %1292 }
 0x1a4   :  { %v533_v51 = vmul.f32 %v1293_v63, %v532_v54 }
 0x1a6   :  { %v1994_v27 = vadd.f32 %v534_v19, %v533_v51 }
 0x1a8   :  { %554 = vmatmul.f32.vlgmr.msra.gmra.mxu0 %v1994_v27  ;;  %574 = vmatmul.f32.vlgmr.msra.gmra.mxu1 %v1994_v27 }
 0x1a9   :  { %594 = vmatmul.f32.vlgmr.msra.gmra.mxu2 %v1994_v27  ;;  %798 = vmatpush.msra.mxu0 %v1590_v44  ;;  %v2015_v44 = vld [vmem:[#allocation5 + $0x120] sm:$0xff] }
 0x1aa   :  { %868 = vmatpush.msra.mxu1 %v2000_v14  ;;  %888 = vmatpush.msra.mxu2 %v1588_v43  ;;  %v2020_v43 = vld [vmem:[#allocation5 + $0x108] sm:$0xff] }
 0x1ab   :  { %799 = vmatpush.msra.mxu0 %v1597_v49  ;;  %v2030_v49 = vld [vmem:[#allocation5 + $0xd8] sm:$0xff] }
 0x1ac   :  { %869 = vmatpush.msra.mxu1 %v2005_v58  ;;  %889 = vmatpush.msra.mxu2 %v1595_v48  ;;  %v2025_v48 = vld [vmem:[#allocation5 + $0xf0] sm:$0xff] }
 0x1ad   :  { %800 = vmatpush.msra.mxu0 %v1603_v53  ;;  %v2040_v53 = vld [vmem:[#allocation5 + $0xa8] sm:$0xff] }
 0x1ae   :  { %870 = vmatpush.msra.mxu1 %v2010_v47  ;;  %890 = vmatpush.msra.mxu2 %v1601_v52  ;;  %v2035_v52 = vld [vmem:[#allocation5 + $0xc0] sm:$0xff] }
 0x1af   :  { %801 = vmatpush.msra.mxu0 %v1609_v57  ;;  %v2050_v57 = vld [vmem:[#allocation5 + $0x78] sm:$0xff] }
 0x1b0   :  { %871 = vmatpush.msra.mxu1 %v2015_v44  ;;  %891 = vmatpush.msra.mxu2 %v1607_v56  ;;  %v2045_v56 = vld [vmem:[#allocation5 + $0x90] sm:$0xff] }
 0x1b1   :  { %802 = vmatpush.msra.mxu0 %v1620_v61  ;;  %v2060_v61 = vld [vmem:[#allocation5 + $0x48] sm:$0xff] }
 0x1b2   :  { %872 = vmatpush.msra.mxu1 %v2020_v43  ;;  %892 = vmatpush.msra.mxu2 %v1618_v60  ;;  %v2055_v60 = vld [vmem:[#allocation5 + $0x60] sm:$0xff] }
 0x1b3   :  { %803 = vmatpush.msra.mxu0 %v1627_v2  ;;  %v2070_v2 = vld [vmem:[#allocation5 + $0x18] sm:$0xff] }
 0x1b4   :  { %873 = vmatpush.msra.mxu1 %v2025_v48  ;;  %893 = vmatpush.msra.mxu2 %v1625_v0  ;;  %v2065_v0 = vld [vmem:[#allocation5 + $0x30] sm:$0xff]  ;;  %2393 = vst [vmem:[#allocation15_spill] sm:$0xff] %v2070_v2 }
 0x1b5   :  { %804 = vmatpush.msra.mxu0 %v1633_v10  ;;  %2392 = vst [vmem:[#allocation11_spill] sm:$0xff] %v2065_v0  ;;  %v207_v10 = vadd.f32 %v1975_v22, %v2390_v18 }
 0x1b6   :  { %874 = vmatpush.msra.mxu1 %v2030_v49  ;;  %894 = vmatpush.msra.mxu2 %v1631_v8  ;;  %v2075_v8 = vld [vmem:[#allocation5] sm:$0xff] }
 0x1b7   :  { %805 = vmatpush.msra.mxu0 %v1639_v17  ;;  %2394 = vst [vmem:[#allocation17_spill] sm:$0xff] %v2075_v8 }
 0x1b8   :  { %875 = vmatpush.msra.mxu1 %v2035_v52  ;;  %895 = vmatpush.msra.mxu2 %v1637_v16 }
 0x1b9   :  { %806 = vmatpush.msra.mxu0 %v1650_v21 }
 0x1ba   :  { %876 = vmatpush.msra.mxu1 %v2040_v53  ;;  %896 = vmatpush.msra.mxu2 %v1648_v20  ;;  %v2395_v20 = vld [vmem:[#allocation18_spill] sm:$0xff] }
 0x1bb   :  { %807 = vmatpush.msra.mxu0 %v1658_v26 }
 0x1bc   :  { %877 = vmatpush.msra.mxu1 %v2045_v56  ;;  %897 = vmatpush.msra.mxu2 %v1655_v24 }
 0x1bd   :  { %808 = vmatpush.msra.mxu0 %v1664_v30 }
 0x1be   :  { %878 = vmatpush.msra.mxu1 %v2050_v57  ;;  %898 = vmatpush.msra.mxu2 %v1662_v29 }
 0x1bf   :  { %809 = vmatpush.msra.mxu0 %v1671_v35 }
 0x1c0   :  { %879 = vmatpush.msra.mxu1 %v2055_v60  ;;  %899 = vmatpush.msra.mxu2 %v1669_v33 }
 0x1c1   :  { %810 = vmatpush.msra.mxu0 %v1683_v42 }
 0x1c2   :  { %880 = vmatpush.msra.mxu1 %v2060_v61  ;;  %900 = vmatpush.msra.mxu2 %v1681_v39 }
 0x1c3   :  { %811 = vmatpush.msra.mxu0 %v1691_v50 }
 0x1c4   :  { %881 = vmatpush.msra.mxu1 %v2065_v0  ;;  %901 = vmatpush.msra.mxu2 %v2377_v3 }
 0x1c5   :  { %812 = vmatpush.msra.mxu0 %v2378_v5 }
 0x1c6   :  { %882 = vmatpush.msra.mxu1 %v2070_v2  ;;  %902 = vmatpush.msra.mxu2 %v2380_v9 }
 0x1c7   :  { %813 = vmatpush.msra.mxu0 %v2381_v11 }
 0x1c8   :  { %883 = vmatpush.msra.mxu1 %v2075_v8  ;;  %903 = vmatpush.msra.mxu2 %v2383_v15 }
 0x225   :  { %v555_v16 = vpop.f32.mrf.mxu0  ;;  %v575_v17 = vpop.f32.mrf.mxu1 }
 0x226   :  { %v598_v21 = vadd.f32 %v555_v16, %v2395_v20  ;;  %v618_v24 = vadd.f32 %v575_v17, %v207_v10  ;;  %v2090_v20 = vld [vmem:[#allocation5 + $0x178] sm:$0xff] }
 0x228   :  { %v1252_v26 = vmul.f32 -1.442695, %v598_v21  ;;  %v1253_v29 = vmul.f32 -1.442695, %v618_v24  ;;  %v2094_v21 = vld [vmem:[#allocation5 + $0x170] sm:$0xff]  ;;  %v2097_v24 = vld [vmem:[#allocation5 + $0x160] sm:$0xff] }
 0x22a   :  { %1294 = vpow2.f32 %v1252_v26  ;;  %v2104_v26 = vld [vmem:[#allocation5 + $0x148] sm:$0xff] }
 0x22b   :  { %1296 = vpow2.f32 %v1253_v29  ;;  %v2108_v29 = vld [vmem:[#allocation5 + $0x140] sm:$0xff] }
 0x22c   :  { %v595_v36 = vpop.f32.mrf.mxu2 }
 0x22d   :  { %v638_v59 = vadd.f32 %v1906_v62, %v595_v36  ;;  %v2160_v36 = vld [vmem:[#allocation5 + $0x88] sm:$0xff] }
 0x230   :  { %v1295_v30 = vpop.eup %1294 }
 0x231   :  { %v1297_v33 = vpop.eup %1296  ;;  %v602_v35 = vadd.f32 1.0, %v1295_v30  ;;  %v2111_v30 = vld [vmem:[#allocation5 + $0x130] sm:$0xff] }
 0x232   :  { %v622_v39 = vadd.f32 1.0, %v1297_v33  ;;  %v2115_v33 = vld [vmem:[#allocation5 + $0x128] sm:$0xff] }
 0x233   :  { %1298 = vrcp.f32 %v602_v35  ;;  %v614_v15 = vand.u32 2147483648, %v602_v35  ;;  %v612_v34 = vand.u32 2147483647, %v602_v35  ;;  %vm608_vm1 = vweird.f32 %v602_v35 }
 0x234   :  { %1300 = vrcp.f32 %v622_v39  ;;  %v634_v1 = vand.u32 2147483648, %v622_v39  ;;  %vm628_vm5 = vweird.f32 %v622_v39  ;;  %v632_v7 = vand.u32 2147483647, %v622_v39 }
 0x235   :  { %v615_v41 = vor.u32 1.1754944e-38, %v614_v15  ;;  %vm613_vm3 = vcmp.eq.f32.partialorder %v612_v34, 8.507059e+37  ;;  %v2146_v15 = vld [vmem:[#allocation5 + $0xb8] sm:$0xff]  ;;  %v2153_v34 = vld [vmem:[#allocation5 + $0xa0] sm:$0xff] }
 0x236   :  { %v635_v54 = vor.u32 1.1754944e-38, %v634_v1  ;;  %vm633_vm7 = vcmp.eq.f32.partialorder %v632_v7, 8.507059e+37  ;;  %v2188_v1 = vld [vmem:[#allocation5 + $0x28] sm:$0xff]  ;;  %v2192_v7 = vld [vmem:[#allocation5 + $0x20] sm:$0xff] }
 0x237   :  { %2398 = vst [vmem:[#allocation18_spill] sm:$0xff] %v2188_v1 }
 0x238   :  { %2399 = vst [vmem:[#allocation27_spill] sm:$0xff] %v2192_v7 }
 0x239   :  { %v1299_v42 = vpop.eup %1298 }
 0x23a   :  { %v1301_v50 = vpop.eup %1300  ;;  %v604_v3 = vmul.f32 %v1299_v42, %v602_v35  ;;  %vm609_vm0 = vweird.f32 %v1299_v42  ;;  %v2118_v35 = vld [vmem:[#allocation5 + $0x118] sm:$0xff] }
 0x23b   :  { %v624_v5 = vmul.f32 %v1301_v50, %v622_v39  ;;  %vm610_vm2 = vmor %vm608_vm1, %vm609_vm0  ;;  %vm629_vm4 = vweird.f32 %v1301_v50  ;;  %v2122_v39 = vld [vmem:[#allocation5 + $0x110] sm:$0xff] }
 0x23c   :  { %v605_v9 = vsub.f32 1.0, %v604_v3  ;;  %vm630_vm6 = vmor %vm628_vm5, %vm629_vm4  ;;  %v2132_v3 = vld [vmem:[#allocation5 + $0xe8] sm:$0xff] }
 0x23d   :  { %v625_v11 = vsub.f32 1.0, %v624_v5  ;;  %v2136_v5 = vld [vmem:[#allocation5 + $0xe0] sm:$0xff] }
 0x23e   :  { %v606_v22 = vmul.f32 %v1299_v42, %v605_v9  ;;  %v2139_v9 = vld [vmem:[#allocation5 + $0xd0] sm:$0xff] }
 0x23f   :  { %v626_v32 = vmul.f32 %v1301_v50, %v625_v11  ;;  %v2143_v11 = vld [vmem:[#allocation5 + $0xc8] sm:$0xff] }
 0x240   :  { %v607_v37 = vadd.f32 %v1299_v42, %v606_v22  ;;  %v2150_v22 = vld [vmem:[#allocation5 + $0xb0] sm:$0xff] }
 0x241   :  { %v627_v4 = vadd.f32 %v1301_v50, %v626_v32  ;;  %v2157_v32 = vld [vmem:[#allocation5 + $0x98] sm:$0xff] }
 0x242   :  { %v611_v6 = vsel %vm610_vm2, %v1299_v42, %v607_v37  ;;  %v2125_v42 = vld [vmem:[#allocation5 + $0x100] sm:$0xff] }
 0x243   :  { %v616_v12 = vsel %vm613_vm3, %v615_v41, %v611_v6  ;;  %v631_v13 = vsel %vm630_vm6, %v1301_v50, %v627_v4  ;;  %v2129_v50 = vld [vmem:[#allocation5 + $0xf8] sm:$0xff]  ;;  %v2164_v37 = vld [vmem:[#allocation5 + $0x80] sm:$0xff]  ;;  %v2167_v41 = vld [vmem:[#allocation5 + $0x70] sm:$0xff] }
 0x244   :  { %v639_v23 = vmul.f32 %v638_v59, %v616_v12  ;;  %v636_v63 = vsel %vm633_vm7, %v635_v54, %v631_v13  ;;  %v2171_v6 = vld [vmem:[#allocation5 + $0x68] sm:$0xff]  ;;  %v2174_v59 = vld [vmem:[#allocation5 + $0x58] sm:$0xff]  ;;  %v2178_v12 = vld [vmem:[#allocation5 + $0x50] sm:$0xff]  ;;  %v210_v13 = vadd.f32 %v1977_v25, %v2390_v18 }
 0x245   :  { %v642_v51 = vsub.f32 1.0, %v636_v63  ;;  %v644_v16 = vmul.f32 %v636_v63, %v1994_v27  ;;  %v2101_v27 = vld [vmem:[#allocation5 + $0x158] sm:$0xff]  ;;  %v2181_v4 = vld [vmem:[#allocation5 + $0x40] sm:$0xff] }
 0x246   :  { %v640_v40 = vadd.f32 %v639_v23, %v2396_v45  ;;  %v2185_v23 = vld [vmem:[#allocation5 + $0x38] sm:$0xff]  ;;  %v2195_v45 = vld [vmem:[#allocation5 + $0x10] sm:$0xff] }
 0x247   :  { %2397 = vst [vmem:[#allocation25_spill] sm:$0xff] %v2185_v23 }
 0x248   :  { %1302 = vtanh.f32 %v640_v40  ;;  %2400 = vst [vmem:[#allocation31_spill] sm:$0xff] %v2195_v45  ;;  %v2199_v40 = vld [vmem:[#allocation5 + $0x8] sm:$0xff] }
 0x249   :  { %2401 = vst [vmem:[#allocation32_spill] sm:$0xff] %v2199_v40 }
 0x24e   :  { %v1303_v19 = vpop.eup %1302 }
 0x24f   :  { %v643_v10 = vmul.f32 %v1303_v19, %v642_v51 }
 0x251   :  { %v2085_v17 = vadd.f32 %v644_v16, %v643_v10  ;;  %v2402_v10 = vld [vmem:[#allocation19_spill] sm:$0xff] }
 0x253   :  { %664 = vmatmul.f32.vlgmr.msrb.gmra.mxu3 %v2085_v17  ;;  %684 = vmatmul.f32.vlgmr.msrb.gmra.mxu0 %v2085_v17 }
 0x254   :  { %704 = vmatmul.f32.vlgmr.msrb.gmra.mxu1 %v2085_v17  ;;  %908 = vmatpush.msrb.mxu3 %v2090_v20 }
 0x255   :  { %978 = vmatpush.msrb.mxu0 %v2000_v14  ;;  %998 = vmatpush.msrb.mxu1 %v2094_v21 }
 0x256   :  { %909 = vmatpush.msrb.mxu3 %v2097_v24 }
 0x257   :  { %979 = vmatpush.msrb.mxu0 %v2005_v58  ;;  %999 = vmatpush.msrb.mxu1 %v2101_v27 }
 0x258   :  { %910 = vmatpush.msrb.mxu3 %v2104_v26 }
 0x259   :  { %980 = vmatpush.msrb.mxu0 %v2010_v47  ;;  %1000 = vmatpush.msrb.mxu1 %v2108_v29 }
 0x25a   :  { %911 = vmatpush.msrb.mxu3 %v2111_v30 }
 0x25b   :  { %981 = vmatpush.msrb.mxu0 %v2015_v44  ;;  %1001 = vmatpush.msrb.mxu1 %v2115_v33 }
 0x25c   :  { %912 = vmatpush.msrb.mxu3 %v2118_v35 }
 0x25d   :  { %982 = vmatpush.msrb.mxu0 %v2020_v43  ;;  %1002 = vmatpush.msrb.mxu1 %v2122_v39 }
 0x25e   :  { %913 = vmatpush.msrb.mxu3 %v2125_v42 }
 0x25f   :  { %983 = vmatpush.msrb.mxu0 %v2025_v48  ;;  %1003 = vmatpush.msrb.mxu1 %v2129_v50 }
 0x260   :  { %914 = vmatpush.msrb.mxu3 %v2132_v3 }
 0x261   :  { %984 = vmatpush.msrb.mxu0 %v2030_v49  ;;  %1004 = vmatpush.msrb.mxu1 %v2136_v5 }
 0x262   :  { %915 = vmatpush.msrb.mxu3 %v2139_v9 }
 0x263   :  { %985 = vmatpush.msrb.mxu0 %v2035_v52  ;;  %1005 = vmatpush.msrb.mxu1 %v2143_v11 }
 0x264   :  { %916 = vmatpush.msrb.mxu3 %v2146_v15 }
 0x265   :  { %986 = vmatpush.msrb.mxu0 %v2040_v53  ;;  %1006 = vmatpush.msrb.mxu1 %v2150_v22 }
 0x266   :  { %917 = vmatpush.msrb.mxu3 %v2153_v34 }
 0x267   :  { %987 = vmatpush.msrb.mxu0 %v2045_v56  ;;  %1007 = vmatpush.msrb.mxu1 %v2157_v32 }
 0x268   :  { %918 = vmatpush.msrb.mxu3 %v2160_v36 }
 0x269   :  { %988 = vmatpush.msrb.mxu0 %v2050_v57  ;;  %1008 = vmatpush.msrb.mxu1 %v2164_v37 }
 0x26a   :  { %919 = vmatpush.msrb.mxu3 %v2167_v41 }
 0x26b   :  { %989 = vmatpush.msrb.mxu0 %v2055_v60  ;;  %1009 = vmatpush.msrb.mxu1 %v2171_v6 }
 0x26c   :  { %920 = vmatpush.msrb.mxu3 %v2174_v59 }
 0x26d   :  { %990 = vmatpush.msrb.mxu0 %v2060_v61  ;;  %1010 = vmatpush.msrb.mxu1 %v2178_v12 }
 0x26e   :  { %921 = vmatpush.msrb.mxu3 %v2181_v4 }
 0x26f   :  { %991 = vmatpush.msrb.mxu0 %v2065_v0  ;;  %1011 = vmatpush.msrb.mxu1 %v2185_v23 }
 0x270   :  { %922 = vmatpush.msrb.mxu3 %v2188_v1 }
 0x271   :  { %992 = vmatpush.msrb.mxu0 %v2070_v2  ;;  %1012 = vmatpush.msrb.mxu1 %v2192_v7 }
 0x272   :  { %923 = vmatpush.msrb.mxu3 %v2195_v45 }
 0x273   :  { %993 = vmatpush.msrb.mxu0 %v2075_v8  ;;  %1013 = vmatpush.msrb.mxu1 %v2199_v40 }
 0x2d0   :  { %v685_v54 = vpop.f32.mrf.mxu0 }
 0x2d1   :  { %v728_v63 = vadd.f32 %v685_v54, %v210_v13 }
 0x2d3   :  { %v1255_v51 = vmul.f32 -1.442695, %v728_v63 }
 0x2d5   :  { %1304 = vpow2.f32 %v1255_v51 }
 0x2d6   :  { %v665_v19 = vpop.f32.mrf.mxu3 }
 0x2d7   :  { %v708_v16 = vadd.f32 %v665_v19, %v2402_v10  ;;  %v705_v19 = vpop.f32.mrf.mxu1 }
 0x2d9   :  { %v1254_v55 = vmul.f32 -1.442695, %v708_v16 }
 0x2db   :  { %v1305_v31 = vpop.eup %1304  ;;  %1306 = vpow2.f32 %v1254_v55 }
 0x2dc   :  { %v732_v38 = vadd.f32 1.0, %v1305_v31  ;;  %v748_v31 = vadd.f32 %v1906_v62, %v705_v19 }
 0x2de   :  { %1308 = vrcp.f32 %v732_v38  ;;  %v744_v23 = vand.u32 2147483648, %v732_v38  ;;  %vm738_vm13 = vweird.f32 %v732_v38 }
 0x2e0   :  { %v745_v0 = vor.u32 1.1754944e-38, %v744_v23 }
 0x2e1   :  { %v1307_v28 = vpop.eup %1306 }
 0x2e2   :  { %v712_v8 = vadd.f32 1.0, %v1307_v28 }
 0x2e4   :  { %1310 = vrcp.f32 %v712_v8  ;;  %v1309_v45 = vpop.eup %1308  ;;  %v724_v13 = vand.u32 2147483648, %v712_v8  ;;  %v722_v63 = vand.u32 2147483647, %v712_v8  ;;  %vm718_vm9 = vweird.f32 %v712_v8 }
 0x2e5   :  { %v734_v40 = vmul.f32 %v1309_v45, %v732_v38  ;;  %vm739_vm12 = vweird.f32 %v1309_v45 }
 0x2e6   :  { %v725_v55 = vor.u32 1.1754944e-38, %v724_v13  ;;  %vm723_vm11 = vcmp.eq.f32.partialorder %v722_v63, 8.507059e+37  ;;  %vm740_vm14 = vmor %vm738_vm13, %vm739_vm12 }
 0x2e7   :  { %v735_v25 = vsub.f32 1.0, %v734_v40 }
 0x2e9   :  { %v736_v51 = vmul.f32 %v1309_v45, %v735_v25 }
 0x2ea   :  { %v1311_v7 = vpop.eup %1310 }
 0x2eb   :  { %v714_v2 = vmul.f32 %v1311_v7, %v712_v8  ;;  %vm719_vm8 = vweird.f32 %v1311_v7  ;;  %v737_v1 = vadd.f32 %v1309_v45, %v736_v51 }
 0x2ec   :  { %vm720_vm10 = vmor %vm718_vm9, %vm719_vm8 }
 0x2ed   :  { %v715_v18 = vsub.f32 1.0, %v714_v2  ;;  %v742_v2 = vand.u32 2147483647, %v732_v38  ;;  %v741_v25 = vsel %vm740_vm14, %v1309_v45, %v737_v1  ;;  %v2404_v38 = vld [vmem:[#allocation25_spill] sm:$0xff] }
 0x2ef   :  { %v716_v54 = vmul.f32 %v1311_v7, %v715_v18  ;;  %vm743_vm15 = vcmp.eq.f32.partialorder %v742_v2, 8.507059e+37 }
 0x2f0   :  { %v746_v8 = vsel %vm743_vm15, %v745_v0, %v741_v25  ;;  %v2414_v25 = vld [vmem:[#allocation28_spill] sm:$0xff] }
 0x2f1   :  { %v717_v10 = vadd.f32 %v1311_v7, %v716_v54  ;;  %v752_v13 = vsub.f32 1.0, %v746_v8 }
 0x2f3   :  { %v721_v28 = vsel %vm720_vm10, %v1311_v7, %v717_v10  ;;  %v754_v7 = vmul.f32 %v746_v8, %v2085_v17 }
 0x2f4   :  { %v726_v16 = vsel %vm723_vm11, %v725_v55, %v721_v28 }
 0x2f5   :  { %v749_v40 = vmul.f32 %v748_v31, %v726_v16 }
 0x2f7   :  { %v750_v18 = vadd.f32 %v749_v40, %v1911_v46  ;;  %v2403_v46 = vld [vmem:[#allocation11_spill] sm:$0xff] }
 0x2f9   :  { %1312 = vtanh.f32 %v750_v18 }
 0x2ff   :  { %v1313_v54 = vpop.eup %1312 }
 0x300   :  { %v753_v19 = vmul.f32 %v1313_v54, %v752_v13 }
 0x302   :  { %v2208_v63 = vadd.f32 %v754_v7, %v753_v19 }
 0x304   :  { %774 = vmatmul.f32.vlgmr.msrb.gmra.mxu2 %v2208_v63  ;;  %794 = vmatmul.f32.vlgmr.msra.gmra.mxu3 %v2208_v63 }
 0x305   :  { %814 = vmatmul.f32.vlgmr.msra.gmra.mxu0 %v2208_v63  ;;  %1018 = vmatpush.msrb.mxu2 %v2090_v20 }
 0x306   :  { %1088 = vmatpush.msra.mxu3 %v2000_v14  ;;  %1108 = vmatpush.msra.mxu0 %v2094_v21  ;;  %v2405_v14 = vld [vmem:[#allocation18_spill] sm:$0xff] }
 0x307   :  { %1019 = vmatpush.msrb.mxu2 %v2097_v24 }
 0x308   :  { %1089 = vmatpush.msra.mxu3 %v2005_v58  ;;  %1109 = vmatpush.msra.mxu0 %v2101_v27  ;;  %v2406_v58 = vld [vmem:[#allocation15_spill] sm:$0xff] }
 0x309   :  { %1020 = vmatpush.msrb.mxu2 %v2104_v26 }
 0x30a   :  { %1090 = vmatpush.msra.mxu3 %v2010_v47  ;;  %1110 = vmatpush.msra.mxu0 %v2108_v29  ;;  %v2407_v47 = vld [vmem:[#allocation27_spill] sm:$0xff] }
 0x30b   :  { %1021 = vmatpush.msrb.mxu2 %v2111_v30 }
 0x30c   :  { %1091 = vmatpush.msra.mxu3 %v2015_v44  ;;  %1111 = vmatpush.msra.mxu0 %v2115_v33  ;;  %v2408_v44 = vld [vmem:[#allocation31_spill] sm:$0xff] }
 0x30d   :  { %1022 = vmatpush.msrb.mxu2 %v2118_v35 }
 0x30e   :  { %1092 = vmatpush.msra.mxu3 %v2020_v43  ;;  %1112 = vmatpush.msra.mxu0 %v2122_v39  ;;  %v2409_v43 = vld [vmem:[#allocation17_spill] sm:$0xff] }
 0x30f   :  { %1023 = vmatpush.msrb.mxu2 %v2125_v42 }
 0x310   :  { %1093 = vmatpush.msra.mxu3 %v2025_v48  ;;  %1113 = vmatpush.msra.mxu0 %v2129_v50  ;;  %v2410_v48 = vld [vmem:[#allocation32_spill] sm:$0xff] }
 0x311   :  { %1024 = vmatpush.msrb.mxu2 %v2132_v3 }
 0x312   :  { %1094 = vmatpush.msra.mxu3 %v2030_v49  ;;  %1114 = vmatpush.msra.mxu0 %v2136_v5  ;;  %v2411_v49 = vld [vmem:[#allocation20_spill] sm:$0xff] }
 0x313   :  { %1025 = vmatpush.msrb.mxu2 %v2139_v9 }
 0x314   :  { %1095 = vmatpush.msra.mxu3 %v2035_v52  ;;  %1115 = vmatpush.msra.mxu0 %v2143_v11  ;;  %v2412_v52 = vld [vmem:[#allocation12_spill] sm:$0xff] }
 0x315   :  { %1026 = vmatpush.msrb.mxu2 %v2146_v15 }
 0x316   :  { %1096 = vmatpush.msra.mxu3 %v2040_v53  ;;  %1116 = vmatpush.msra.mxu0 %v2150_v22  ;;  %v213_v53 = vadd.f32 %v2412_v52, %v2411_v49 }
 0x317   :  { %1027 = vmatpush.msrb.mxu2 %v2153_v34 }
 0x318   :  { %1097 = vmatpush.msra.mxu3 %v2045_v56  ;;  %1117 = vmatpush.msra.mxu0 %v2157_v32 }
 0x319   :  { %1028 = vmatpush.msrb.mxu2 %v2160_v36 }
 0x31a   :  { %1098 = vmatpush.msra.mxu3 %v2050_v57  ;;  %1118 = vmatpush.msra.mxu0 %v2164_v37 }
 0x31b   :  { %1029 = vmatpush.msrb.mxu2 %v2167_v41 }
 0x31c   :  { %1099 = vmatpush.msra.mxu3 %v2055_v60  ;;  %1119 = vmatpush.msra.mxu0 %v2171_v6  ;;  %v2413_v60 = vld [vmem:[#allocation21_spill] sm:$0xff] }
 0x31d   :  { %1030 = vmatpush.msrb.mxu2 %v2174_v59 }
 0x31e   :  { %1100 = vmatpush.msra.mxu3 %v2060_v61  ;;  %1120 = vmatpush.msra.mxu0 %v2178_v12 }
 0x31f   :  { %1031 = vmatpush.msrb.mxu2 %v2181_v4 }
 0x320   :  { %1101 = vmatpush.msra.mxu3 %v2403_v46  ;;  %1121 = vmatpush.msra.mxu0 %v2404_v38 }
 0x321   :  { %1032 = vmatpush.msrb.mxu2 %v2405_v14 }
 0x322   :  { %1102 = vmatpush.msra.mxu3 %v2406_v58  ;;  %1122 = vmatpush.msra.mxu0 %v2407_v47 }
 0x323   :  { %1033 = vmatpush.msrb.mxu2 %v2408_v44 }
 0x324   :  { %1103 = vmatpush.msra.mxu3 %v2409_v43  ;;  %1123 = vmatpush.msra.mxu0 %v2410_v48 }
 0x382   :  { %v815_v1 = vpop.f32.mrf.mxu0 }
 0x383   :  { %v858_v55 = vadd.f32 %v1906_v62, %v815_v1 }
 0x387   :  { %v775_v56 = vpop.f32.mrf.mxu2  ;;  %v795_v57 = vpop.f32.mrf.mxu3 }
 0x388   :  { %v818_v61 = vadd.f32 %v775_v56, %v2413_v60  ;;  %v838_v0 = vadd.f32 %v795_v57, %v213_v53 }
 0x38a   :  { %v1256_v17 = vmul.f32 -1.442695, %v818_v61  ;;  %v1257_v21 = vmul.f32 -1.442695, %v838_v0 }
 0x38c   :  { %1314 = vpow2.f32 %v1256_v17 }
 0x38d   :  { %1316 = vpow2.f32 %v1257_v21 }
 0x392   :  { %v1315_v27 = vpop.eup %1314 }
 0x393   :  { %v1317_v29 = vpop.eup %1316  ;;  %v822_v33 = vadd.f32 1.0, %v1315_v27 }
 0x394   :  { %v842_v39 = vadd.f32 1.0, %v1317_v29 }
 0x395   :  { %1318 = vrcp.f32 %v822_v33  ;;  %v834_v37 = vand.u32 2147483648, %v822_v33  ;;  %v832_v23 = vand.u32 2147483647, %v822_v33  ;;  %vm828_vm1 = vweird.f32 %v822_v33 }
 0x396   :  { %1320 = vrcp.f32 %v842_v39  ;;  %v854_v40 = vand.u32 2147483648, %v842_v39  ;;  %vm848_vm5 = vweird.f32 %v842_v39  ;;  %v852_v18 = vand.u32 2147483647, %v842_v39 }
 0x397   :  { %v835_v10 = vor.u32 1.1754944e-38, %v834_v37  ;;  %vm833_vm3 = vcmp.eq.f32.partialorder %v832_v23, 8.507059e+37 }
 0x398   :  { %v855_v54 = vor.u32 1.1754944e-38, %v854_v40  ;;  %vm853_vm7 = vcmp.eq.f32.partialorder %v852_v18, 8.507059e+37 }
 0x39b   :  { %v1319_v50 = vpop.eup %1318 }
 0x39c   :  { %v1321_v5 = vpop.eup %1320  ;;  %v824_v11 = vmul.f32 %v1319_v50, %v822_v33  ;;  %vm829_vm0 = vweird.f32 %v1319_v50 }
 0x39d   :  { %v844_v22 = vmul.f32 %v1321_v5, %v842_v39  ;;  %vm830_vm2 = vmor %vm828_vm1, %vm829_vm0  ;;  %vm849_vm4 = vweird.f32 %v1321_v5 }
 0x39e   :  { %v825_v32 = vsub.f32 1.0, %v824_v11  ;;  %vm850_vm6 = vmor %vm848_vm5, %vm849_vm4 }
 0x39f   :  { %v845_v6 = vsub.f32 1.0, %v844_v22 }
 0x3a0   :  { %v826_v12 = vmul.f32 %v1319_v50, %v825_v32 }
 0x3a1   :  { %v846_v45 = vmul.f32 %v1321_v5, %v845_v6 }
 0x3a2   :  { %v827_v51 = vadd.f32 %v1319_v50, %v826_v12 }
 0x3a3   :  { %v847_v16 = vadd.f32 %v1321_v5, %v846_v45  ;;  %v2418_v45 = vld [vmem:[#allocation10_spill] sm:$0xff] }
 0x3a4   :  { %v831_v31 = vsel %vm830_vm2, %v1319_v50, %v827_v51  ;;  %v2417_v50 = vld [vmem:[#allocation29_spill] sm:$0xff]  ;;  %v219_v51 = vadd.f32 %v2418_v45, %v2411_v49 }
 0x3a5   :  { %v836_v28 = vsel %vm833_vm3, %v835_v10, %v831_v31  ;;  %v851_v13 = vsel %vm850_vm6, %v1321_v5, %v847_v16  ;;  %v2419_v31 = vld [vmem:[#allocation23_spill] sm:$0xff] }
 0x3a6   :  { %v859_v2 = vmul.f32 %v858_v55, %v836_v28  ;;  %v856_v19 = vsel %vm853_vm7, %v855_v54, %v851_v13 }
 0x3a7   :  { %v862_v7 = vsub.f32 1.0, %v856_v19  ;;  %v864_v58 = vmul.f32 %v856_v19, %v2208_v63 }
 0x3a8   :  { %v860_v8 = vadd.f32 %v859_v2, %v2414_v25 }
 0x3aa   :  { %1322 = vtanh.f32 %v860_v8 }
 0x3b0   :  { %v1323_v46 = vpop.eup %1322 }
 0x3b1   :  { %v863_v38 = vmul.f32 %v1323_v46, %v862_v7 }
 0x3b3   :  { %v2267_v47 = vadd.f32 %v864_v58, %v863_v38 }
 0x3b5   :  { %884 = vmatmul.f32.vlgmr.msra.gmra.mxu1 %v2267_v47  ;;  %904 = vmatmul.f32.vlgmr.msra.gmra.mxu2 %v2267_v47 }
 0x3b6   :  { %924 = vmatmul.f32.vlgmr.msrb.gmra.mxu3 %v2267_v47  ;;  %1128 = vmatpush.msra.mxu1 %v2090_v20 }
 0x3b8   :  { %1129 = vmatpush.msra.mxu1 %v2097_v24  ;;  %v2415_v24 = vld [vmem:[#allocation22_spill] sm:$0xff] }
 0x3ba   :  { %1130 = vmatpush.msra.mxu1 %v2104_v26 }
 0x3bc   :  { %1131 = vmatpush.msra.mxu1 %v2111_v30 }
 0x3be   :  { %1132 = vmatpush.msra.mxu1 %v2118_v35  ;;  %v2416_v35 = vld [vmem:[#allocation14_spill] sm:$0xff] }
 0x3c0   :  { %1133 = vmatpush.msra.mxu1 %v2125_v42  ;;  %v216_v42 = vadd.f32 %v2416_v35, %v2411_v49 }
 0x3c2   :  { %1134 = vmatpush.msra.mxu1 %v2132_v3 }
 0x3c4   :  { %1135 = vmatpush.msra.mxu1 %v2139_v9 }
 0x3c6   :  { %1136 = vmatpush.msra.mxu1 %v2146_v15 }
 0x3c8   :  { %1137 = vmatpush.msra.mxu1 %v2153_v34 }
 0x3ca   :  { %1138 = vmatpush.msra.mxu1 %v2160_v36 }
 0x3cc   :  { %1139 = vmatpush.msra.mxu1 %v2167_v41 }
 0x3ce   :  { %1140 = vmatpush.msra.mxu1 %v2174_v59 }
 0x3d0   :  { %1141 = vmatpush.msra.mxu1 %v2181_v4 }
 0x3d2   :  { %1142 = vmatpush.msra.mxu1 %v2405_v14 }
 0x3d4   :  { %1143 = vmatpush.msra.mxu1 %v2408_v44 }
 0x432   :  { %v885_v20 = vpop.f32.mrf.mxu1 }
 0x433   :  { %v928_v26 = vadd.f32 %v885_v20, %v2415_v24 }
 0x435   :  { %v1258_v30 = vmul.f32 -1.442695, %v928_v26 }
 0x437   :  { %1324 = vpow2.f32 %v1258_v30 }
 0x438   :  { %v905_v3 = vpop.f32.mrf.mxu2 }
 0x439   :  { %v948_v9 = vadd.f32 %v905_v3, %v216_v42  ;;  %v925_v53 = vpop.f32.mrf.mxu3 }
 0x43a   :  { %v968_v17 = vadd.f32 %v1906_v62, %v925_v53 }
 0x43b   :  { %v1259_v15 = vmul.f32 -1.442695, %v948_v9  ;;  %v2300_v9 = vld [vmem:[%s2326_s4] ss:$0 sm:$0xff] }
 0x43d   :  { %v1325_v34 = vpop.eup %1324  ;;  %1326 = vpow2.f32 %v1259_v15 }
 0x43e   :  { %v932_v36 = vadd.f32 1.0, %v1325_v34 }
 0x440   :  { %1328 = vrcp.f32 %v932_v36  ;;  %v944_v44 = vand.u32 2147483648, %v932_v36  ;;  %v942_v48 = vand.u32 2147483647, %v932_v36  ;;  %vm938_vm9 = vweird.f32 %v932_v36 }
 0x442   :  { %v945_v60 = vor.u32 1.1754944e-38, %v944_v44  ;;  %vm943_vm11 = vcmp.eq.f32.partialorder %v942_v48, 8.507059e+37 }
 0x443   :  { %v1327_v41 = vpop.eup %1326 }
 0x444   :  { %v952_v59 = vadd.f32 1.0, %v1327_v41 }
 0x446   :  { %v1329_v4 = vpop.eup %1328  ;;  %1330 = vrcp.f32 %v952_v59  ;;  %v964_v33 = vand.u32 2147483648, %v952_v59  ;;  %v962_v39 = vand.u32 2147483647, %v952_v59  ;;  %vm958_vm13 = vweird.f32 %v952_v59 }
 0x447   :  { %v934_v63 = vmul.f32 %v1329_v4, %v932_v36  ;;  %vm939_vm8 = vweird.f32 %v1329_v4 }
 0x448   :  { %vm940_vm10 = vmor %vm938_vm9, %vm939_vm8  ;;  %v965_v32 = vor.u32 1.1754944e-38, %v964_v33  ;;  %vm963_vm15 = vcmp.eq.f32.partialorder %v962_v39, 8.507059e+37  ;;  %v1211_v39 = vld [vmem:[#allocation7 + $0x50] sm:$0xff] }
 0x449   :  { %v935_v14 = vsub.f32 1.0, %v934_v63  ;;  %v2420_v63 = vld [vmem:[#allocation30_spill] sm:$0xff] }
 0x44b   :  { %v936_v43 = vmul.f32 %v1329_v4, %v935_v14 }
 0x44c   :  { %v1331_v52 = vpop.eup %1330 }
 0x44d   :  { %v954_v56 = vmul.f32 %v1331_v52, %v952_v59  ;;  %v937_v57 = vadd.f32 %v1329_v4, %v936_v43  ;;  %vm959_vm12 = vweird.f32 %v1331_v52 }
 0x44e   :  { %vm960_vm14 = vmor %vm958_vm13, %vm959_vm12 }
 0x44f   :  { %v955_v61 = vsub.f32 1.0, %v954_v56  ;;  %v941_v0 = vsel %vm940_vm10, %v1329_v4, %v937_v57 }
 0x450   :  { %v946_v21 = vsel %vm943_vm11, %v945_v60, %v941_v0  ;;  %v1215_v0 = vld [vmem:[#allocation7 + $0x70] sm:$0xff] }
 0x451   :  { %v956_v27 = vmul.f32 %v1331_v52, %v955_v61  ;;  %v969_v29 = vmul.f32 %v968_v17, %v946_v21  ;;  %v1216_v61 = vld [vmem:[#allocation7 + $0x78] sm:$0xff]  ;;  %v1214_v17 = vld [vmem:[#allocation7 + $0x68] sm:$0xff]  ;;  %v1213_v21 = vld [vmem:[#allocation7 + $0x60] sm:$0xff] }
 0x452   :  { %1221 = vmatpush.msra.mxu2 %v1216_v61 }
 0x453   :  { %v970_v5 = vadd.f32 %v969_v29, %v2417_v50  ;;  %v957_v11 = vadd.f32 %v1331_v52, %v956_v27  ;;  %v1212_v27 = vld [vmem:[#allocation7 + $0x58] sm:$0xff] }
 0x454   :  { %1222 = vmatpush.msra.mxu2 %v1215_v0  ;;  %v2421_v29 = vld [vmem:[#allocation13_spill] sm:$0xff] }
 0x455   :  { %1332 = vtanh.f32 %v970_v5  ;;  %v961_v22 = vsel %vm960_vm14, %v1331_v52, %v957_v11  ;;  %v222_v33 = vadd.f32 %v2421_v29, %v2411_v49  ;;  %v1210_v11 = vld [vmem:[#allocation7 + $0x48] sm:$0xff]  ;;  %v1205_v49 = vld [vmem:[#allocation7 + $0x20] sm:$0xff] }
 0x456   :  { %v966_v37 = vsel %vm963_vm15, %v965_v32, %v961_v22  ;;  %1223 = vmatpush.msra.mxu2 %v1214_v17  ;;  %v1209_v32 = vld [vmem:[#allocation7 + $0x40] sm:$0xff] }
 0x457   :  { %v972_v6 = vsub.f32 1.0, %v966_v37  ;;  %v974_v62 = vmul.f32 %v966_v37, %v2267_v47  ;;  %v1208_v37 = vld [vmem:[#allocation7 + $0x38] sm:$0xff] }
 0x458   :  { %1224 = vmatpush.msra.mxu2 %v1213_v21 }
 0x45a   :  { %1225 = vmatpush.msra.mxu2 %v1212_v27 }
 0x45b   :  { %v1333_v12 = vpop.eup %1332 }
 0x45c   :  { %v973_v23 = vmul.f32 %v1333_v12, %v972_v6  ;;  %1226 = vmatpush.msra.mxu2 %v1211_v39  ;;  %v1207_v6 = vld [vmem:[#allocation7 + $0x30] sm:$0xff] }
 0x45e   :  { %v975_v1 = vadd.f32 %v974_v62, %v973_v23  ;;  %1227 = vmatpush.msra.mxu2 %v1210_v11  ;;  %v2422_v23 = vld [vmem:[#allocation26_spill] sm:$0xff] }
 0x460   :  { %994 = vmatmul.f32.vlgmr.msrb.gmra.mxu0 %v975_v1  ;;  %1014 = vmatmul.f32.vlgmr.msrb.gmra.mxu1 %v975_v1 }
 0x461   :  { %1034 = vmatmul.f32.vlgmr.msrb.gmra.mxu2 %v975_v1 }
 0x462   :  { %1228 = vmatpush.msra.mxu2 %v1209_v32 }
 0x464   :  { %1229 = vmatpush.msra.mxu2 %v1208_v37 }
 0x466   :  { %1230 = vmatpush.msra.mxu2 %v1207_v6 }
 0x4dd   :  { %v995_v10 = vpop.f32.mrf.mxu0  ;;  %v1015_v55 = vpop.f32.mrf.mxu1 }
 0x4de   :  { %v1038_v28 = vadd.f32 %v995_v10, %v2419_v31  ;;  %v1058_v16 = vadd.f32 %v1015_v55, %v219_v51  ;;  %v1204_v10 = vld [vmem:[#allocation7 + $0x18] sm:$0xff]  ;;  %v1203_v31 = vld [vmem:[#allocation7 + $0x10] sm:$0xff] }
 0x4e0   :  { %v1260_v40 = vmul.f32 -1.442695, %v1038_v28  ;;  %v1261_v2 = vmul.f32 -1.442695, %v1058_v16  ;;  %v1202_v28 = vld [vmem:[#allocation7 + $0x8] sm:$0xff] }
 0x4e2   :  { %1334 = vpow2.f32 %v1260_v40  ;;  %v1201_v40 = vld [vmem:[#allocation7] sm:$0xff] }
 0x4e3   :  { %1336 = vpow2.f32 %v1261_v2 }
 0x4e4   :  { %v1035_v30 = vpop.f32.mrf.mxu2 }
 0x4e5   :  { %v1078_v15 = vadd.f32 %v2300_v9, %v1035_v30 }
 0x4e8   :  { %v1335_v18 = vpop.eup %1334 }
 0x4e9   :  { %v1337_v25 = vpop.eup %1336  ;;  %v1042_v8 = vadd.f32 1.0, %v1335_v18 }
 0x4ea   :  { %v1062_v13 = vadd.f32 1.0, %v1337_v25 }
 0x4eb   :  { %1338 = vrcp.f32 %v1042_v8  ;;  %v1054_v47 = vand.u32 2147483648, %v1042_v8  ;;  %v1052_v24 = vand.u32 2147483647, %v1042_v8  ;;  %vm1048_vm1 = vweird.f32 %v1042_v8 }
 0x4ec   :  { %1340 = vrcp.f32 %v1062_v13  ;;  %v1074_v59 = vand.u32 2147483648, %v1062_v13  ;;  %vm1068_vm5 = vweird.f32 %v1062_v13  ;;  %v1072_v4 = vand.u32 2147483647, %v1062_v13 }
 0x4ed   :  { %v1055_v42 = vor.u32 1.1754944e-38, %v1054_v47  ;;  %vm1053_vm3 = vcmp.eq.f32.partialorder %v1052_v24, 8.507059e+37 }
 0x4ee   :  { %v1075_v43 = vor.u32 1.1754944e-38, %v1074_v59  ;;  %vm1073_vm7 = vcmp.eq.f32.partialorder %v1072_v4, 8.507059e+37 }
 0x4f1   :  { %v1339_v54 = vpop.eup %1338 }
 0x4f2   :  { %v1341_v19 = vpop.eup %1340  ;;  %v1044_v7 = vmul.f32 %v1339_v54, %v1042_v8  ;;  %vm1049_vm0 = vweird.f32 %v1339_v54 }
 0x4f3   :  { %v1064_v46 = vmul.f32 %v1341_v19, %v1062_v13  ;;  %vm1050_vm2 = vmor %vm1048_vm1, %vm1049_vm0  ;;  %vm1069_vm4 = vweird.f32 %v1341_v19 }
 0x4f4   :  { %v1045_v38 = vsub.f32 1.0, %v1044_v7  ;;  %vm1070_vm6 = vmor %vm1068_vm5, %vm1069_vm4 }
 0x4f5   :  { %v1065_v58 = vsub.f32 1.0, %v1064_v46 }
 0x4f6   :  { %v1046_v20 = vmul.f32 %v1339_v54, %v1045_v38 }
 0x4f7   :  { %v1066_v26 = vmul.f32 %v1341_v19, %v1065_v58 }
 0x4f8   :  { %v1047_v35 = vadd.f32 %v1339_v54, %v1046_v20 }
 0x4f9   :  { %v1067_v36 = vadd.f32 %v1341_v19, %v1066_v26 }
 0x4fa   :  { %v1051_v3 = vsel %vm1050_vm2, %v1339_v54, %v1047_v35 }
 0x4fb   :  { %v1056_v34 = vsel %vm1053_vm3, %v1055_v42, %v1051_v3  ;;  %v1071_v44 = vsel %vm1070_vm6, %v1341_v19, %v1067_v36  ;;  %v2423_v3 = vld [vmem:[#allocation24_spill] sm:$0xff] }
 0x4fc   :  { %v1079_v41 = vmul.f32 %v1078_v15, %v1056_v34  ;;  %v1076_v48 = vsel %vm1073_vm7, %v1075_v43, %v1071_v44  ;;  %v2424_v15 = vld [vmem:[#allocation16_spill] sm:$0xff] }
 0x4fd   :  { %v1082_v52 = vsub.f32 1.0, %v1076_v48  ;;  %v1084_v57 = vmul.f32 %v1076_v48, %v975_v1  ;;  %v1206_v1 = vld [vmem:[#allocation7 + $0x28] sm:$0xff]  ;;  %v263_v34 = vadd.f32 %v2424_v15, %v2423_v3 }
 0x4fe   :  { %v1080_v14 = vadd.f32 %v1079_v41, %v2420_v63  ;;  %1231 = vmatpush.msra.mxu2 %v1206_v1 }
 0x500   :  { %1342 = vtanh.f32 %v1080_v14  ;;  %1232 = vmatpush.msra.mxu2 %v1205_v49 }
 0x502   :  { %1233 = vmatpush.msra.mxu2 %v1204_v10 }
 0x504   :  { %1234 = vmatpush.msra.mxu2 %v1203_v31 }
 0x506   :  { %v1343_v53 = vpop.eup %1342  ;;  %1235 = vmatpush.msra.mxu2 %v1202_v28 }
 0x507   :  { %v1083_v56 = vmul.f32 %v1343_v53, %v1082_v52 }
 0x508   :  { %1236 = vmatpush.msra.mxu2 %v1201_v40 }
 0x509   :  { %v2304_v60 = vadd.f32 %v1084_v57, %v1083_v56  ;;  %v1273_v56 = vld [vmem:[%s2328_s6] ss:$0 sm:$0xff] }
 0x50b   :  { %1104 = vmatmul.f32.vlgmr.msra.gmra.mxu3 %v2304_v60  ;;  %1124 = vmatmul.f32.vlgmr.msra.gmra.mxu0 %v2304_v60 }
 0x50c   :  { %1144 = vmatmul.f32.vlgmr.msra.gmra.mxu1 %v2304_v60 }
 0x588   :  { %v1125_v50 = vpop.f32.mrf.mxu0 }
 0x589   :  { %v1168_v5 = vadd.f32 %v1125_v50, %v222_v33  ;;  %v1145_v47 = vpop.f32.mrf.mxu1 }
 0x58a   :  { %v1188_v26 = vadd.f32 %v2300_v9, %v1145_v47 }
 0x58b   :  { %v1263_v22 = vmul.f32 -1.442695, %v1168_v5 }
 0x58d   :  { %1344 = vpow2.f32 %v1263_v22 }
 0x58e   :  { %v1105_v12 = vpop.f32.mrf.mxu3 }
 0x58f   :  { %v1148_v62 = vadd.f32 %v1105_v12, %v2422_v23 }
 0x591   :  { %v1262_v45 = vmul.f32 -1.442695, %v1148_v62 }
 0x593   :  { %v1345_v51 = vpop.eup %1344  ;;  %1346 = vpow2.f32 %v1262_v45 }
 0x594   :  { %v1172_v55 = vadd.f32 1.0, %v1345_v51 }
 0x596   :  { %1348 = vrcp.f32 %v1172_v55  ;;  %v1184_v36 = vand.u32 2147483648, %v1172_v55  ;;  %vm1178_vm13 = vweird.f32 %v1172_v55  ;;  %v1182_v59 = vand.u32 2147483647, %v1172_v55 }
 0x598   :  { %v1185_v14 = vor.u32 1.1754944e-38, %v1184_v36  ;;  %vm1183_vm15 = vcmp.eq.f32.partialorder %v1182_v59, 8.507059e+37 }
 0x599   :  { %v1347_v16 = vpop.eup %1346 }
 0x59a   :  { %v1152_v2 = vadd.f32 1.0, %v1347_v16 }
 0x59c   :  { %1350 = vrcp.f32 %v1152_v2  ;;  %v1349_v18 = vpop.eup %1348  ;;  %v1164_v7 = vand.u32 2147483648, %v1152_v2  ;;  %v1162_v38 = vand.u32 2147483647, %v1152_v2  ;;  %vm1158_vm9 = vweird.f32 %v1152_v2 }
 0x59d   :  { %v1174_v25 = vmul.f32 %v1349_v18, %v1172_v55  ;;  %vm1179_vm12 = vweird.f32 %v1349_v18 }
 0x59e   :  { %v1165_v24 = vor.u32 1.1754944e-38, %v1164_v7  ;;  %vm1163_vm11 = vcmp.eq.f32.partialorder %v1162_v38, 8.507059e+37  ;;  %vm1180_vm14 = vmor %vm1178_vm13, %vm1179_vm12 }
 0x59f   :  { %v1175_v54 = vsub.f32 1.0, %v1174_v25 }
 0x5a1   :  { %v1176_v58 = vmul.f32 %v1349_v18, %v1175_v54 }
 0x5a2   :  { %v1351_v8 = vpop.eup %1350 }
 0x5a3   :  { %v1154_v13 = vmul.f32 %v1351_v8, %v1152_v2  ;;  %vm1159_vm8 = vweird.f32 %v1351_v8  ;;  %v1177_v42 = vadd.f32 %v1349_v18, %v1176_v58 }
 0x5a4   :  { %vm1160_vm10 = vmor %vm1158_vm9, %vm1159_vm8 }
 0x5a5   :  { %v1155_v19 = vsub.f32 1.0, %v1154_v13  ;;  %v1181_v63 = vsel %vm1180_vm14, %v1349_v18, %v1177_v42 }
 0x5a6   :  { %v1186_v44 = vsel %vm1183_vm15, %v1185_v14, %v1181_v63 }
 0x5a7   :  { %v1156_v46 = vmul.f32 %v1351_v8, %v1155_v19  ;;  %v1192_v9 = vsub.f32 1.0, %v1186_v44  ;;  %v1194_v52 = vmul.f32 %v1186_v44, %v2304_v60 }
 0x5a9   :  { %v1157_v20 = vadd.f32 %v1351_v8, %v1156_v46 }
 0x5ab   :  { %v1161_v30 = vsel %vm1160_vm10, %v1351_v8, %v1157_v20 }
 0x5ac   :  { %v1166_v35 = vsel %vm1163_vm11, %v1165_v24, %v1161_v30 }
 0x5ad   :  { %v1189_v41 = vmul.f32 %v1188_v26, %v1166_v35 }
 0x5af   :  { %v1190_v4 = vadd.f32 %v1189_v41, %v263_v34 }
 0x5b1   :  { %1352 = vtanh.f32 %v1190_v4 }
 0x5b7   :  { %v1353_v43 = vpop.eup %1352 }
 0x5b8   :  { %v1193_v48 = vmul.f32 %v1353_v43, %v1192_v9 }
 0x5ba   :  { %v1195_v53 = vadd.f32 %v1194_v52, %v1193_v48 }
 0x5bc   :  { %1237 = vmatmul.f32.vlgmr.msra.gmra.mxu2 %v1195_v53 }
 0x63f   :  { %v1238_v57 = vpop.f32.mrf.mxu2 }
 0x640   :  { %v1239_v61 = vadd.f32 %v1273_v56, %v1238_v57 }
 0x642   :  { %1241 = vst [vmem:[%s2329_s7] sm:$0xff] %v1239_v61 }
 0x643   :  { %1246 = vsyncpa [#allocation4], 1 }
 0x644   :  { %1247 = vsyncpa [#allocation6], 1 }

</bundles_post_ra>
